<compile_context>
chip_gen: v6e
topology: v6e:2x2x1
jax: 0.10.0
libtpu: 0.0.40
codegen_flags: <defaults>
</compile_context>

<pallas_src>
import jax
import jax.numpy as jnp
from jax.experimental import pallas as pl
from jax.experimental.pallas import tpu as pltpu


def _mlp_kernel(x_ref, w2_ref, b2_ref, w3_ref, b3_ref, wo_ref, bo_ref, out_ref):
    # Cast to bf16 in-register (no-op if the producer already supplies bf16); the HBM
    # stream stays in x's native dtype, so there is no separate wrapper cast pass.
    x = x_ref[...].astype(jnp.bfloat16)

    # layer_2: Linear(D -> H) + ReLU.  bf16 MXU operands, f32 accumulate.
    h = jnp.dot(x, w2_ref[...], preferred_element_type=jnp.float32)
    h = jnp.maximum(h + b2_ref[...], 0.0)          # b2 is (1, H), broadcasts over batch
    # dropout(p=0.1): identity at inference.
    # TODO(synk): training-mode stochastic dropout not implemented.

    # layer_3: Linear(H -> H) + ReLU.  Cast back to bf16 only at the MXU boundary.
    h3 = jnp.dot(h.astype(w3_ref.dtype), w3_ref[...],
                 preferred_element_type=jnp.float32)
    h3 = jnp.maximum(h3 + b3_ref[...], 0.0)
    # dropout(p=0.1): identity at inference.

    # layer_out: Linear(H -> 1) as VPU broadcast-mul + lane reduction (avoids an N=1
    # MXU matmul that would waste 127/128 of the MXU columns).
    o = jnp.sum(h3 * wo_ref[...], axis=-1) + bo_ref[0]          # (tile_b,)

    # Lane-dense store: (tile_b,) -> (tile_b//128, 128), batch on the 128-lane axis.
    out_ref[...] = o.reshape(out_ref.shape).astype(out_ref.dtype)


def _round_up(n, m):
    return ((n + m - 1) // m) * m


def prepare_params(w2, b2, w3, b3, wo, bo):
    """One-time conversion of parameters to kernel dtype/layout (call at load time).

    Expects (in, out)-layout weights: w2 (D, H), w3 (H, H), wo (H, 1); biases b2/b3
    of size H, bo of size 1.  Returns the tuple the pallas wrapper consumes.
    """
    H = w2.shape[1]
    return (
        w2.astype(jnp.bfloat16),                       # (D, H) bf16  MXU operand
        jnp.asarray(b2, jnp.float32).reshape(1, H),    # (1, H) f32
        w3.astype(jnp.bfloat16),                       # (H, H) bf16  MXU operand
        jnp.asarray(b3, jnp.float32).reshape(1, H),    # (1, H) f32
        jnp.asarray(wo, jnp.float32).reshape(1, H),    # (1, H) f32   VPU reduce row
        jnp.asarray(bo, jnp.float32).reshape(1),       # (1,)   f32   SMEM scalar
    )


def thin_multiclass_classification(x, w2, b2, w3, b3, wo, bo, *, tile_b=8192):
    """Forward pass.

    x : (B, D) f32 (or bf16)
    w2: (D, H) bf16, b2: (1, H) f32      (H = D // 2)
    w3: (H, H) bf16, b3: (1, H) f32
    wo: (1, H) f32,  bo: (1,)  f32       (as produced by prepare_params)
    returns (B, 1) f32
    """
    B, D = x.shape
    H = w2.shape[1]
    assert w2.shape[0] == D
    assert tile_b % 1024 == 0, "tile_b must be a multiple of 1024 (8x128 out slab)"

    # Effective batch tile: never larger than needed, and aim for >= 2 grid steps
    # whenever B > 1024 so the "parallel" batch axis feeds both TensorCores on v7x.
    tile_eff = max(1024, min(tile_b, _round_up(pl.cdiv(B, 2), 1024)))
    num_tiles = pl.cdiv(B, tile_eff)          # edge block (if any) is handled by Pallas
    b_ceil = num_tiles * tile_eff             # output slab rows (>= B); tail sliced off

    # Per-step VMEM footprint -> explicit scoped-VMEM limit.  (v7x: 64 MiB physical /
    # 32 MiB default scoped; v5e/v6e: 128 MiB physical.)
    x_tile_bytes = tile_eff * D * x.dtype.itemsize      # Pallas double-buffers this
    inter_bytes = tile_eff * H * 4                       # h / h3 f32 intermediates
    weight_bytes = (D * H + H * H) * 2 + 3 * H * 4
    out_tile_bytes = tile_eff * 4
    vmem_est = 2 * x_tile_bytes + 3 * inter_bytes + weight_bytes + 2 * out_tile_bytes
    vmem_limit = int(min(max(32 << 20, 2 * vmem_est), 64 << 20))

    flops = 2 * B * (D * H + H * H + H)
    bytes_accessed = (x.size * x.dtype.itemsize          # x in its native dtype
                      + (D * H + H * H) * 2 + 3 * H * 4  # bf16 weights + f32 biases
                      + b_ceil * 4)                       # f32 output slab

    out = pl.pallas_call(
        _mlp_kernel,
        out_shape=jax.ShapeDtypeStruct((b_ceil // 128, 128), jnp.float32),
        grid=(num_tiles,),
        in_specs=[
            pl.BlockSpec((tile_eff, D), lambda i: (i, 0)),        # x tile (pipelined)
            pl.BlockSpec((D, H), lambda i: (0, 0)),               # w2 (VMEM resident)
            pl.BlockSpec((1, H), lambda i: (0, 0)),               # b2 (resident)
            pl.BlockSpec((H, H), lambda i: (0, 0)),               # w3 (resident)
            pl.BlockSpec((1, H), lambda i: (0, 0)),               # b3 (resident)
            pl.BlockSpec((1, H), lambda i: (0, 0)),               # wo row (resident)
            pl.BlockSpec(memory_space=pltpu.MemorySpace.SMEM),    # bo scalar
        ],
        out_specs=pl.BlockSpec((tile_eff // 128, 128), lambda i: (i, 0)),
        compiler_params=pltpu.CompilerParams(
            dimension_semantics=("parallel",),                    # 2 TCs on v7x
            vmem_limit_bytes=vmem_limit),
        cost_estimate=pl.CostEstimate(
            flops=flops, transcendentals=0, bytes_accessed=bytes_accessed),
    )(x, w2, b2, w3, b3, wo, bo)

    return out.reshape(b_ceil, 1)[:B]


def init_params(key, input_dim):
    """Deterministic synthetic parameter init (shapes match the nn.Module, (in,out) layout)."""
    hidden = int(input_dim * 0.5)
    k = jax.random.split(key, 6)
    scale2 = 1.0 / jnp.sqrt(input_dim)
    scale3 = 1.0 / jnp.sqrt(hidden)
    w2 = jax.random.uniform(k[0], (input_dim, hidden), jnp.float32, -scale2, scale2)
    b2 = jax.random.uniform(k[1], (1, hidden), jnp.float32, -scale2, scale2)
    w3 = jax.random.uniform(k[2], (hidden, hidden), jnp.float32, -scale3, scale3)
    b3 = jax.random.uniform(k[3], (1, hidden), jnp.float32, -scale3, scale3)
    wo = jax.random.uniform(k[4], (hidden, 1), jnp.float32, -scale3, scale3)
    bo = jax.random.uniform(k[5], (1, 1), jnp.float32, -scale3, scale3)
    return w2, b2, w3, b3, wo, bo


if __name__ == "__main__":
    INPUT_DIM = 64        # -> hidden = 32, output = 1  (small, per the spec)

    key = jax.random.PRNGKey(0)
    kx, kp = jax.random.split(key)
    raw = init_params(kp, INPUT_DIM)
    params = prepare_params(*raw)           # one-time layout/dtype conversion
    w2, b2, w3, b3, wo, bo = raw

    # Two small cases: full tiles (2 grid steps -> exercises pipelining / parallel axis)
    # and a batch that is not a tile multiple (exercises the no-pad edge-block path).
    for B in (2048, 1500):
        x = jax.random.normal(jax.random.fold_in(kx, B), (B, INPUT_DIM), jnp.float32)
        out = jax.block_until_ready(thin_multiclass_classification(x, *params))

        # Pure-JAX f32 reference (eval-mode dropout = identity).  Kernel uses bf16 MXU
        # operands with f32 accumulation, hence the loosened tolerance.
        ref = jnp.maximum(x @ w2 + b2, 0.0)
        ref = jnp.maximum(ref @ w3 + b3, 0.0)
        ref = ref @ wo + bo

        assert out.shape == (B, 1)
        err = float(jnp.max(jnp.abs(out - ref)))
        assert jnp.allclose(out, ref, atol=3e-2, rtol=3e-2), err

    print("KERNEL_OK")
</pallas_src>

<mosaic_0001>
module attributes {stable_mosaic.version = 11 : i64} {
  func.func @_mlp_kernel(%arg0: i32, %arg1: memref<1024x64xf32, #tpu.memory_space<vmem>>, %arg2: memref<64x32xbf16, #tpu.memory_space<vmem>>, %arg3: memref<1x32xf32, #tpu.memory_space<vmem>>, %arg4: memref<32x32xbf16, #tpu.memory_space<vmem>>, %arg5: memref<1x32xf32, #tpu.memory_space<vmem>>, %arg6: memref<1x32xf32, #tpu.memory_space<vmem>>, %arg7: memref<1xf32, #tpu.memory_space<smem>>, %arg8: memref<8x128xf32, #tpu.memory_space<vmem>>) attributes {dimension_semantics = [#tpu.dimension_semantics<parallel>], iteration_bounds = array<i64: 2>, scalar_prefetch = 0 : i64, scratch_operands = 0 : i64, tpu.core_type = #tpu.core_type<tc>, window_params = [{transform_indices = @transform_0, window_bounds = array<i64: 1024, 64>}, {pipeline_mode = #tpu.pipeline_mode<synchronous>, transform_indices = @transform_1, window_bounds = array<i64: 64, 32>}, {pipeline_mode = #tpu.pipeline_mode<synchronous>, transform_indices = @transform_2, window_bounds = array<i64: 1, 32>}, {pipeline_mode = #tpu.pipeline_mode<synchronous>, transform_indices = @transform_3, window_bounds = array<i64: 32, 32>}, {pipeline_mode = #tpu.pipeline_mode<synchronous>, transform_indices = @transform_4, window_bounds = array<i64: 1, 32>}, {pipeline_mode = #tpu.pipeline_mode<synchronous>, transform_indices = @transform_5, window_bounds = array<i64: 1, 32>}, {transform_indices = @transform_6, window_bounds = array<i64: 1>}, {transform_indices = @transform_7, window_bounds = array<i64: 8, 128>}]} {
    %c0 = arith.constant 0 : index
    %c0_0 = arith.constant 0 : index
    %0 = vector.load %arg1[%c0, %c0_0] : memref<1024x64xf32, #tpu.memory_space<vmem>>, vector<1024x64xf32>
    %1 = arith.truncf %0 : vector<1024x64xf32> to vector<1024x64xbf16>
    %c0_1 = arith.constant 0 : index
    %c0_2 = arith.constant 0 : index
    %2 = vector.load %arg2[%c0_1, %c0_2] : memref<64x32xbf16, #tpu.memory_space<vmem>>, vector<64x32xbf16>
    %cst = arith.constant dense<0.000000e+00> : vector<1024x32xf32>
    %3 = tpu.matmul %1, %2, %cst {dimension_numbers = #tpu.dot_dimension_numbers<[1], [0], [0], [1], [0, 0, 1, 1], [], []>} : vector<1024x64xbf16>, vector<64x32xbf16>, vector<1024x32xf32> -> vector<1024x32xf32>
    %c0_3 = arith.constant 0 : index
    %c0_4 = arith.constant 0 : index
    %4 = vector.load %arg3[%c0_3, %c0_4] : memref<1x32xf32, #tpu.memory_space<vmem>>, vector<1x32xf32>
    %5 = vector.broadcast %4 : vector<1x32xf32> to vector<1024x32xf32>
    %6 = arith.addf %3, %5 : vector<1024x32xf32>
    %cst_5 = arith.constant 0.000000e+00 : f32
    %7 = vector.broadcast %cst_5 : f32 to vector<1024x32xf32>
    %8 = arith.maximumf %6, %7 : vector<1024x32xf32>
    %9 = arith.truncf %8 : vector<1024x32xf32> to vector<1024x32xbf16>
    %c0_6 = arith.constant 0 : index
    %c0_7 = arith.constant 0 : index
    %10 = vector.load %arg4[%c0_6, %c0_7] : memref<32x32xbf16, #tpu.memory_space<vmem>>, vector<32x32xbf16>
    %cst_8 = arith.constant dense<0.000000e+00> : vector<1024x32xf32>
    %11 = tpu.matmul %9, %10, %cst_8 {dimension_numbers = #tpu.dot_dimension_numbers<[1], [0], [0], [1], [0, 0, 1, 1], [], []>} : vector<1024x32xbf16>, vector<32x32xbf16>, vector<1024x32xf32> -> vector<1024x32xf32>
    %c0_9 = arith.constant 0 : index
    %c0_10 = arith.constant 0 : index
    %12 = vector.load %arg5[%c0_9, %c0_10] : memref<1x32xf32, #tpu.memory_space<vmem>>, vector<1x32xf32>
    %13 = vector.broadcast %12 : vector<1x32xf32> to vector<1024x32xf32>
    %14 = arith.addf %11, %13 : vector<1024x32xf32>
    %cst_11 = arith.constant 0.000000e+00 : f32
    %15 = vector.broadcast %cst_11 : f32 to vector<1024x32xf32>
    %16 = arith.maximumf %14, %15 : vector<1024x32xf32>
    %c0_12 = arith.constant 0 : index
    %c0_13 = arith.constant 0 : index
    %17 = vector.load %arg6[%c0_12, %c0_13] : memref<1x32xf32, #tpu.memory_space<vmem>>, vector<1x32xf32>
    %18 = vector.broadcast %17 : vector<1x32xf32> to vector<1024x32xf32>
    %19 = arith.mulf %16, %18 : vector<1024x32xf32>
    %cst_14 = arith.constant dense<0.000000e+00> : vector<1024xf32>
    %20 = vector.multi_reduction <add>, %19, %cst_14 [1] : vector<1024x32xf32> to vector<1024xf32>
    %c0_15 = arith.constant 0 : index
    %21 = memref.load %arg7[%c0_15] : memref<1xf32, #tpu.memory_space<smem>>
    %22 = vector.broadcast %21 : f32 to vector<1024xf32>
    %23 = arith.addf %20, %22 : vector<1024xf32>
    %24 = vector.shape_cast %23 : vector<1024xf32> to vector<8x128xf32>
    %c0_16 = arith.constant 0 : index
    %c0_17 = arith.constant 0 : index
    %25 = vector.load %arg8[%c0_16, %c0_17] : memref<8x128xf32, #tpu.memory_space<vmem>>, vector<8x128xf32>
    tpu.vector_store %arg8[%c0_16, %c0_17], %24 {strides = array<i32>} : memref<8x128xf32, #tpu.memory_space<vmem>>, vector<8x128xf32>,
    return
  }
  func.func @transform_0(%arg0: i32) -> (i32, i32) {
    %c0_i32 = arith.constant 0 : i32
    %c0_i32_0 = arith.constant 0 : i32
    return %arg0, %c0_i32 : i32, i32
  }
  func.func @transform_1(%arg0: i32) -> (i32, i32) {
    %c0_i32 = arith.constant 0 : i32
    %c0_i32_0 = arith.constant 0 : i32
    %c0_i32_1 = arith.constant 0 : i32
    return %c0_i32, %c0_i32_0 : i32, i32
  }
  func.func @transform_2(%arg0: i32) -> (i32, i32) {
    %c0_i32 = arith.constant 0 : i32
    %c0_i32_0 = arith.constant 0 : i32
    %c0_i32_1 = arith.constant 0 : i32
    return %c0_i32, %c0_i32_0 : i32, i32
  }
  func.func @transform_3(%arg0: i32) -> (i32, i32) {
    %c0_i32 = arith.constant 0 : i32
    %c0_i32_0 = arith.constant 0 : i32
    %c0_i32_1 = arith.constant 0 : i32
    return %c0_i32, %c0_i32_0 : i32, i32
  }
  func.func @transform_4(%arg0: i32) -> (i32, i32) {
    %c0_i32 = arith.constant 0 : i32
    %c0_i32_0 = arith.constant 0 : i32
    %c0_i32_1 = arith.constant 0 : i32
    return %c0_i32, %c0_i32_0 : i32, i32
  }
  func.func @transform_5(%arg0: i32) -> (i32, i32) {
    %c0_i32 = arith.constant 0 : i32
    %c0_i32_0 = arith.constant 0 : i32
    %c0_i32_1 = arith.constant 0 : i32
    return %c0_i32, %c0_i32_0 : i32, i32
  }
  func.func @transform_6(%arg0: i32) -> i32 {
    %c0_i32 = arith.constant 0 : i32
    %c0_i32_0 = arith.constant 0 : i32
    return %c0_i32 : i32
  }
  func.func @transform_7(%arg0: i32) -> (i32, i32) {
    %c0_i32 = arith.constant 0 : i32
    %c0_i32_0 = arith.constant 0 : i32
    return %arg0, %c0_i32 : i32, i32
  }
}

</mosaic_0001>

<bundles_post_ra>
// kernel: tpu_custom_call.1
= control target key start
LH: loop header
LB: loop body
LE: loop exit
PB: predicated region body
PF: predicated region fallthrough
CT: control target
= control target key end

     0   :  { %s5980_s0 = inlined_call_operand.vmem [shape: f32[2048,64], index: 0, kind: input, shape index: {}]   ;;  %s5981_s1 = inlined_call_operand.vmem [shape: bf16[64,32], index: 1, kind: input, shape index: {}]   ;;  %s5982_s2 = inlined_call_operand.vmem [shape: f32[1,32], index: 2, kind: input, shape index: {}]   ;;  %s5983_s3 = inlined_call_operand.vmem [shape: bf16[32,32], index: 3, kind: input, shape index: {}]   ;;  %s5984_s4 = inlined_call_operand.vmem [shape: f32[1,32], index: 4, kind: input, shape index: {}]   ;;  %s5985_s5 = inlined_call_operand.vmem [shape: f32[1,32], index: 5, kind: input, shape index: {}]   ;;  %s5986_s6 = inlined_call_operand.<no memory space> [shape: f32[1], index: 6, kind: input, shape index: {}]   ;;  %s5987_s7 = inlined_call_operand.hbm [shape: f32[16,128], index: 7, kind: output, shape index: {}]  }
   0x1   :  { %12 = sst [smem:[#allocation2]] %s5986_s6 }
   0x2   :  { %13 = vsyncpa [#allocation4], 0 }
   0x3   :  { %15 = vsyncpa [#allocation4 + $0x1], 0  ;;  %s4581_s26 = smov 0   ;;  %s4583_s27 = smov 0  }
   0x4   :  { %s4585_s28 = smov 0   ;;  %s4587_s29 = smov 0  }
   0x5 LB: > { %s3867_s6 = sadd.s32 4294967295, %s4535_s29   ;;  %s3868_s30 = sadd.s32 4294967294, %s4535_s29   ;;  %s4535_s29 = sphi %s4587_s29, %s5993_s29   ;;  %s4531_s28 = sphi %s4585_s28, %s5992_s28   ;;  %s4527_s27 = sphi %s4583_s27, %s5991_s27   ;;  %s4523_s26 = sphi %s4581_s26, %s5990_s26  }
   0x6   : > { %s4604_s8 = sadd.s32 1, %s4535_s29   ;;  %s180_s9 = sadd.s32 1, %s4531_s28 }
   0x7   : > { %s177_s10 = ssub.s32 %s4535_s29, %s4604_s8  ;;  %p190_p0 = scmp.ne.s32.totalorder %s4531_s28, %s4527_s27 }
   0x8   : > { %p178_p1 = scmp.eq.s32.totalorder %s177_s10, 0  ;;  %p191_p2 = scmp.eq.s32.totalorder %s3867_s6, 1 }
   0x9   : > { %p196_p3 = scmp.ne.s32.totalorder %s4527_s27, %s4523_s26  ;;  %p197_p4 = scmp.eq.s32.totalorder %s3868_s30, 1 }
   0xa   : > { %s4614_s11 = scalar_select %p178_p1, %s4531_s28, %s180_s9  }
   0xb   : > { %p4616_p5 = por %p191_p2, %p190_p0  ;;  %p4620_p6 = por %p197_p4, %p196_p3 }
   0xc   : > { %p3871_p7 = scmp.ge.s32.totalorder %s4535_s29, 1  ;;  %p242_p8 = scmp.lt.s32.totalorder %s4535_s29, 3 }
   0xe   : > { %p243_p9 = pnand %p3871_p7, %p242_p8 }
   0xf   : > { %s4629_s16 = sshll.u32 (!%p243_p9), %s3867_s6, 7  ;;  %s271_s14 = sand.u32 (!%p243_p9), 1, %s4527_s27  }
  0x10   : > { %246 = sbr.rel (%p243_p9) target bundleno = 859 (0x35b), region = 48  ;;  %p275_p10 = scmp.lt.s32.totalorder (!%p243_p9), %s4629_s16, 255 }
  0x11   : > { %s3872_s15 = sshll.u32 (!%p243_p9), %s271_s14, 3  ;;  %s3796_s6 = scalar_lea.sflag (!%p243_p9), [#allocation4], %s271_s14 }
  0x12   : > { %s5457_s17 = scalar_lea.vmem (!%p243_p9), [#allocation3], %s3872_s15 }
  0x15   : > { %v4464_v0 = vld [vmem:[%s5981_s1 + $0x18] sm:$0xff]   ;;  %v4465_v1 = vld [vmem:[%s5981_s1 + $0x10] sm:$0xff]   ;;  %v4466_v2 = vld [vmem:[%s5981_s1 + $0x8] sm:$0xff]   ;;  %s276_s21 = scalar_select %p275_p10, %s4629_s16, 255  ;;  %vm512_vm0 = vcmask 523264   ;;  %vm1465_vm1 = vcmask 261120  }
  0x16   : > { %4157 = vmatprep.subr.bf16.mxu0 %v4464_v0  ;;  %v4467_v5 = vld [vmem:[%s5981_s1] sm:$0xff]   ;;  %vm3007_vm2 = vcmask 130112   ;;  %vm3014_vm3 = vcmask 195712   ;;  %vm3021_vm4 = vcmask 261312   ;;  %vm3028_vm5 = vcmask 326912  }
  0x17   : > { %4158 = vmatpush3.bf16.msra.mxu0 %v4464_v0  ;;  %s3874_s22 = sshll.u32 %s276_s21, 3  ;;  %vm3035_vm6 = vcmask 392512   ;;  %vm3042_vm7 = vcmask 458112   ;;  %vm3049_vm8 = vcmask 523712   ;;  %vm3056_vm9 = vcmask 589312  }
  0x18   : > { %4159 = vmatprep.subr.bf16.mxu0 %v4465_v1  ;;  %s4642_s25 = scalar_lea.vmem %s5980_s0, %s3874_s22  ;;  %vm3063_vm10 = vcmask 654912   ;;  %vm3070_vm11 = vcmask 720512   ;;  %vm3077_vm12 = vcmask 786112   ;;  %vm3084_vm13 = vcmask 851712   ;;  %s3809_s22 = sshll.u32 %s5457_s17, 4  ;;  %s5935_s22 = int_to_ptr.vmem [resolvable:$true] %s3809_s22 }
  0x19   : > { %v281_v3 = vld [vmem:[%s4642_s25] sm:$0xff]  ;;  %v282_v4 = vld [vmem:[%s4642_s25 + $0x8] sm:$0xff]  ;;  %v283_v7 = vld [vmem:[%s4642_s25 + $0x10] sm:$0xff]  ;;  %vm3091_vm14 = vcmask 917312   ;;  %vm3098_vm15 = vcmask 982912   ;;  %s4475_s30 = scalar_lea.vmem %s5935_s22, 128 }
  0x1a   : > { %v409_v6 = vpack.c.bf16 %v282_v4, %v281_v3  ;;  %v284_v8 = vld [vmem:[%s4642_s25 + $0x18] sm:$0xff]  ;;  %v285_v9 = vld [vmem:[%s4642_s25 + $0x20] sm:$0xff]  ;;  %v286_v10 = vld [vmem:[%s4642_s25 + $0x28] sm:$0xff]  ;;  %p4476_p11 = scmp.ne.s32.totalorder %s5935_s22, %s4475_s30 }
  0x1b   : > { %4160 = vmatpush3.bf16.msra.mxu0 %v4465_v1  ;;  %v410_v11 = vpack.c.bf16 %v284_v8, %v283_v7  ;;  %v411_v12 = vpack.c.bf16 %v286_v10, %v285_v9  ;;  %v287_v13 = vld [vmem:[%s4642_s25 + $0x30] sm:$0xff]  ;;  %v288_v14 = vld [vmem:[%s4642_s25 + $0x38] sm:$0xff]  ;;  %v289_v15 = vld [vmem:[%s4642_s25 + $0x40] sm:$0xff] }
  0x1c   : > { %4161 = vmatprep.subr.bf16.mxu0 %v4466_v2  ;;  %4165 = vmatprep.mubr.msk.bf16.mxu0 %vm512_vm0, %v409_v6  ;;  %v290_v16 = vld [vmem:[%s4642_s25 + $0x48] sm:$0xff]  ;;  %v412_v17 = vpack.c.bf16 %v288_v14, %v287_v13  ;;  %v291_v19 = vld [vmem:[%s4642_s25 + $0x50] sm:$0xff]  ;;  %v292_v20 = vld [vmem:[%s4642_s25 + $0x58] sm:$0xff]  ;;  %p4477_p12 = pnand %p4476_p11, %p4616_p5 }
  0x1d   : > { %v413_v18 = vpack.c.bf16 %v290_v16, %v289_v15  ;;  %v293_v21 = vld [vmem:[%s4642_s25 + $0x60] sm:$0xff]  ;;  %v294_v22 = vld [vmem:[%s4642_s25 + $0x68] sm:$0xff]  ;;  %v414_v23 = vpack.c.bf16 %v292_v20, %v291_v19  ;;  %v295_v25 = vld [vmem:[%s4642_s25 + $0x70] sm:$0xff] }
  0x1e   : > { %v415_v24 = vpack.c.bf16 %v294_v22, %v293_v21  ;;  %v296_v26 = vld [vmem:[%s4642_s25 + $0x78] sm:$0xff]  ;;  %v297_v27 = vld [vmem:[%s4642_s25 + $0x80] sm:$0xff]  ;;  %v298_v28 = vld [vmem:[%s4642_s25 + $0x88] sm:$0xff]  ;;  %p4478_p13 = pneg %p4477_p12 }
  0x1f   : > { %4162 = vmatpush3.bf16.msra.mxu0 %v4466_v2  ;;  %v416_v29 = vpack.c.bf16 %v296_v26, %v295_v25  ;;  %v417_v30 = vpack.c.bf16 %v298_v28, %v297_v27  ;;  %v299_v31 = vld [vmem:[%s4642_s25 + $0x90] sm:$0xff]  ;;  %v300_v32 = vld [vmem:[%s4642_s25 + $0x98] sm:$0xff]  ;;  %v301_v33 = vld [vmem:[%s4642_s25 + $0xa0] sm:$0xff] }
  0x20   : > { %4163 = vmatprep.subr.bf16.mxu0 %v4467_v5  ;;  %v302_v34 = vld [vmem:[%s4642_s25 + $0xa8] sm:$0xff]  ;;  %v418_v35 = vpack.c.bf16 %v300_v32, %v299_v31  ;;  %v303_v37 = vld [vmem:[%s4642_s25 + $0xb0] sm:$0xff]  ;;  %v304_v38 = vld [vmem:[%s4642_s25 + $0xb8] sm:$0xff] }
  0x21   : > { %v419_v36 = vpack.c.bf16 %v302_v34, %v301_v33  ;;  %v305_v39 = vld [vmem:[%s4642_s25 + $0xc0] sm:$0xff]  ;;  %v306_v40 = vld [vmem:[%s4642_s25 + $0xc8] sm:$0xff]  ;;  %v420_v41 = vpack.c.bf16 %v304_v38, %v303_v37  ;;  %v307_v43 = vld [vmem:[%s4642_s25 + $0xd0] sm:$0xff] }
  0x22   : > { %v421_v42 = vpack.c.bf16 %v306_v40, %v305_v39  ;;  %v308_v44 = vld [vmem:[%s4642_s25 + $0xd8] sm:$0xff]  ;;  %v309_v45 = vld [vmem:[%s4642_s25 + $0xe0] sm:$0xff]  ;;  %v310_v46 = vld [vmem:[%s4642_s25 + $0xe8] sm:$0xff] }
  0x23   : > { %4164 = vmatpush3.bf16.msra.mxu0 %v4467_v5  ;;  %v422_v47 = vpack.c.bf16 %v308_v44, %v307_v43  ;;  %v423_v48 = vpack.c.bf16 %v310_v46, %v309_v45  ;;  %v311_v49 = vld [vmem:[%s4642_s25 + $0xf0] sm:$0xff]  ;;  %v312_v50 = vld [vmem:[%s4642_s25 + $0xf8] sm:$0xff]  ;;  %v313_v51 = vld [vmem:[%s4642_s25 + $0x100] sm:$0xff] }
  0x24   : > { %v314_v52 = vld [vmem:[%s4642_s25 + $0x108] sm:$0xff]  ;;  %v424_v53 = vpack.c.bf16 %v312_v50, %v311_v49  ;;  %v315_v55 = vld [vmem:[%s4642_s25 + $0x110] sm:$0xff]  ;;  %v316_v56 = vld [vmem:[%s4642_s25 + $0x118] sm:$0xff] }
  0x25   : > { %v425_v54 = vpack.c.bf16 %v314_v52, %v313_v51  ;;  %v317_v57 = vld [vmem:[%s4642_s25 + $0x120] sm:$0xff]  ;;  %v318_v58 = vld [vmem:[%s4642_s25 + $0x128] sm:$0xff]  ;;  %v426_v59 = vpack.c.bf16 %v316_v56, %v315_v55  ;;  %v319_v61 = vld [vmem:[%s4642_s25 + $0x130] sm:$0xff] }
  0x26   : > { %4166 = vmatmul.mubr.msk.bf16.vlgmr.msra.gmra.mxu0 %vm512_vm0, %v410_v11  ;;  %v427_v60 = vpack.c.bf16 %v318_v58, %v317_v57  ;;  %v320_v62 = vld [vmem:[%s4642_s25 + $0x138] sm:$0xff]  ;;  %v321_v63 = vld [vmem:[%s4642_s25 + $0x140] sm:$0xff]  ;;  %v322_v0 = vld [vmem:[%s4642_s25 + $0x148] sm:$0xff] }
  0x27   : > { %4169 = vmatprep.mubr.msk.bf16.mxu0 %vm512_vm0, %v411_v12  ;;  %v428_v1 = vpack.c.bf16 %v320_v62, %v319_v61  ;;  %v4468_v2 = vld [vmem:[%s5983_s3 + $0x8] sm:$0xff]   ;;  %v429_v3 = vpack.c.bf16 %v322_v0, %v321_v63  ;;  %v4469_v4 = vld [vmem:[%s5983_s3] sm:$0xff]   ;;  %v323_v5 = vld [vmem:[%s4642_s25 + $0x150] sm:$0xff] }
  0x28   : > { %4293 = vmatprep.subr.bf16.mxu1 %v4468_v2  ;;  %v324_v6 = vld [vmem:[%s4642_s25 + $0x158] sm:$0xff]  ;;  %v325_v7 = vld [vmem:[%s4642_s25 + $0x160] sm:$0xff]  ;;  %v326_v8 = vld [vmem:[%s4642_s25 + $0x168] sm:$0xff] }
  0x29   : > { %4294 = vmatpush3.bf16.msra.mxu1 %v4468_v2  ;;  %v430_v9 = vpack.c.bf16 %v324_v6, %v323_v5  ;;  %v431_v10 = vpack.c.bf16 %v326_v8, %v325_v7  ;;  %v327_v11 = vld [vmem:[%s4642_s25 + $0x170] sm:$0xff]  ;;  %v328_v12 = vld [vmem:[%s4642_s25 + $0x178] sm:$0xff]  ;;  %v329_v13 = vld [vmem:[%s4642_s25 + $0x180] sm:$0xff] }
  0x2a   : > { %4295 = vmatprep.subr.bf16.mxu1 %v4469_v4  ;;  %v330_v14 = vld [vmem:[%s4642_s25 + $0x188] sm:$0xff]  ;;  %v432_v15 = vpack.c.bf16 %v328_v12, %v327_v11  ;;  %v333_v19 = vld [vmem:[%s4642_s25 + $0x1a0] sm:$0xff]  ;;  %v364_v2 = vld [vmem:[%s4642_s25 + $0x298] sm:$0xff] }
  0x2b   : > { %v433_v16 = vpack.c.bf16 %v330_v14, %v329_v13  ;;  %v334_v20 = vld [vmem:[%s4642_s25 + $0x1a8] sm:$0xff]  ;;  %v337_v25 = vld [vmem:[%s4642_s25 + $0x1c0] sm:$0xff]  ;;  %v367_v7 = vld [vmem:[%s4642_s25 + $0x2b0] sm:$0xff] }
  0x2c   : > { %v435_v22 = vpack.c.bf16 %v334_v20, %v333_v19  ;;  %v338_v26 = vld [vmem:[%s4642_s25 + $0x1c8] sm:$0xff]  ;;  %v341_v31 = vld [vmem:[%s4642_s25 + $0x1e0] sm:$0xff]  ;;  %v368_v8 = vld [vmem:[%s4642_s25 + $0x2b8] sm:$0xff] }
  0x2d   : > { %4296 = vmatpush3.bf16.msra.mxu1 %v4469_v4  ;;  %v437_v28 = vpack.c.bf16 %v338_v26, %v337_v25  ;;  %v342_v32 = vld [vmem:[%s4642_s25 + $0x1e8] sm:$0xff]  ;;  %v345_v37 = vld [vmem:[%s4642_s25 + $0x200] sm:$0xff]  ;;  %v452_v11 = vpack.c.bf16 %v368_v8, %v367_v7  ;;  %v371_v13 = vld [vmem:[%s4642_s25 + $0x2d0] sm:$0xff] }
  0x2e   : > { %4170 = vmatmul.mubr.msk.bf16.gmra.mxu0 %vm512_vm0, %v412_v17  ;;  %v331_v17 = vld [vmem:[%s4642_s25 + $0x190] sm:$0xff]  ;;  %v439_v34 = vpack.c.bf16 %v342_v32, %v341_v31  ;;  %v346_v38 = vld [vmem:[%s4642_s25 + $0x208] sm:$0xff]  ;;  %v349_v43 = vld [vmem:[%s4642_s25 + $0x220] sm:$0xff] }
  0x2f   : > { %4173 = vmatprep.mubr.msk.bf16.mxu0 %vm512_vm0, %v413_v18  ;;  %v332_v18 = vld [vmem:[%s4642_s25 + $0x198] sm:$0xff]  ;;  %v441_v40 = vpack.c.bf16 %v346_v38, %v345_v37  ;;  %v350_v44 = vld [vmem:[%s4642_s25 + $0x228] sm:$0xff]  ;;  %v353_v49 = vld [vmem:[%s4642_s25 + $0x240] sm:$0xff] }
  0x30   : > { %v434_v21 = vpack.c.bf16 %v332_v18, %v331_v17  ;;  %v443_v46 = vpack.c.bf16 %v350_v44, %v349_v43  ;;  %v354_v50 = vld [vmem:[%s4642_s25 + $0x248] sm:$0xff]  ;;  %v357_v55 = vld [vmem:[%s4642_s25 + $0x260] sm:$0xff]  ;;  %v372_v14 = vld [vmem:[%s4642_s25 + $0x2d8] sm:$0xff] }
  0x31   : > { %v445_v52 = vpack.c.bf16 %v354_v50, %v353_v49  ;;  %v358_v56 = vld [vmem:[%s4642_s25 + $0x268] sm:$0xff]  ;;  %v361_v61 = vld [vmem:[%s4642_s25 + $0x280] sm:$0xff]  ;;  %v454_v17 = vpack.c.bf16 %v372_v14, %v371_v13  ;;  %v375_v19 = vld [vmem:[%s4642_s25 + $0x2f0] sm:$0xff] }
  0x32   : > { %v447_v58 = vpack.c.bf16 %v358_v56, %v357_v55  ;;  %v362_v62 = vld [vmem:[%s4642_s25 + $0x288] sm:$0xff]  ;;  %v376_v20 = vld [vmem:[%s4642_s25 + $0x2f8] sm:$0xff]  ;;  %v379_v25 = vld [vmem:[%s4642_s25 + $0x310] sm:$0xff] }
  0x33   : > { %v449_v0 = vpack.c.bf16 %v362_v62, %v361_v61  ;;  %v366_v4 = vld [vmem:[%s4642_s25 + $0x2a8] sm:$0xff]  ;;  %v380_v26 = vld [vmem:[%s4642_s25 + $0x318] sm:$0xff]  ;;  %v383_v32 = vld [vmem:[%s4642_s25 + $0x330] sm:$0xff] }
  0x34   : > { %v4813_v37 = vld [vmem:[%s5982_s2] ss:$0 sm:$0xff]  ;;  %v387_v50 = vld [vmem:[%s4642_s25 + $0x350] sm:$0xff]  ;;  %v390_v55 = vld [vmem:[%s4642_s25 + $0x368] sm:$0xff] }
  0x35   : > { %v392_v7 = vld [vmem:[%s4642_s25 + $0x378] sm:$0xff] }
  0x36   : > { %4174 = vmatmul.mubr.msk.bf16.gmra.mxu0 %vm512_vm0, %v414_v23  ;;  %v335_v23 = vld [vmem:[%s4642_s25 + $0x1b0] sm:$0xff] }
  0x37   : > { %4177 = vmatprep.mubr.msk.bf16.mxu0 %vm512_vm0, %v415_v24  ;;  %v336_v24 = vld [vmem:[%s4642_s25 + $0x1b8] sm:$0xff] }
  0x38   : > { %v436_v27 = vpack.c.bf16 %v336_v24, %v335_v23  ;;  %v456_v23 = vpack.c.bf16 %v376_v20, %v375_v19 }
  0x3e   : > { %4178 = vmatmul.mubr.msk.bf16.gmra.mxu0 %vm512_vm0, %v416_v29  ;;  %v339_v29 = vld [vmem:[%s4642_s25 + $0x1d0] sm:$0xff] }
  0x3f   : > { %4181 = vmatprep.mubr.msk.bf16.mxu0 %vm512_vm0, %v417_v30  ;;  %v340_v30 = vld [vmem:[%s4642_s25 + $0x1d8] sm:$0xff] }
  0x40   : > { %v438_v33 = vpack.c.bf16 %v340_v30, %v339_v29  ;;  %v458_v29 = vpack.c.bf16 %v380_v26, %v379_v25  ;;  %v395_v26 = vld [vmem:[%s4642_s25 + $0x390] sm:$0xff] }
  0x46   : > { %4182 = vmatmul.mubr.msk.bf16.gmra.mxu0 %vm512_vm0, %v418_v35  ;;  %v343_v35 = vld [vmem:[%s4642_s25 + $0x1f0] sm:$0xff] }
  0x47   : > { %4185 = vmatprep.mubr.msk.bf16.mxu0 %vm512_vm0, %v419_v36  ;;  %v344_v36 = vld [vmem:[%s4642_s25 + $0x1f8] sm:$0xff] }
  0x48   : > { %v440_v39 = vpack.c.bf16 %v344_v36, %v343_v35  ;;  %v385_v35 = vld [vmem:[%s4642_s25 + $0x340] sm:$0xff]  ;;  %v386_v36 = vld [vmem:[%s4642_s25 + $0x348] sm:$0xff] }
  0x4e   : > { %4186 = vmatmul.mubr.msk.bf16.gmra.mxu0 %vm512_vm0, %v420_v41  ;;  %v347_v41 = vld [vmem:[%s4642_s25 + $0x210] sm:$0xff] }
  0x4f   : > { %4189 = vmatprep.mubr.msk.bf16.mxu0 %vm512_vm0, %v421_v42  ;;  %v348_v42 = vld [vmem:[%s4642_s25 + $0x218] sm:$0xff] }
  0x50   : > { %v442_v45 = vpack.c.bf16 %v348_v42, %v347_v41  ;;  %v461_v42 = vpack.c.bf16 %v386_v36, %v385_v35 }
  0x56   : > { %4190 = vmatmul.mubr.msk.bf16.gmra.mxu0 %vm512_vm0, %v422_v47  ;;  %v351_v47 = vld [vmem:[%s4642_s25 + $0x230] sm:$0xff] }
  0x57   : > { %4193 = vmatprep.mubr.msk.bf16.mxu0 %vm512_vm0, %v423_v48  ;;  %v352_v48 = vld [vmem:[%s4642_s25 + $0x238] sm:$0xff] }
  0x58   : > { %v444_v51 = vpack.c.bf16 %v352_v48, %v351_v47 }
  0x5e   : > { %4194 = vmatmul.mubr.msk.bf16.gmra.mxu0 %vm512_vm0, %v424_v53  ;;  %v355_v53 = vld [vmem:[%s4642_s25 + $0x250] sm:$0xff] }
  0x5f   : > { %4197 = vmatprep.mubr.msk.bf16.mxu0 %vm512_vm0, %v425_v54  ;;  %v356_v54 = vld [vmem:[%s4642_s25 + $0x258] sm:$0xff] }
  0x60   : > { %v446_v57 = vpack.c.bf16 %v356_v54, %v355_v53  ;;  %v389_v54 = vld [vmem:[%s4642_s25 + $0x360] sm:$0xff] }
  0x61   : > { %v463_v62 = vpack.c.bf16 %v390_v55, %v389_v54 }
  0x66   : > { %4198 = vmatmul.mubr.msk.bf16.gmra.mxu0 %vm512_vm0, %v426_v59  ;;  %v359_v59 = vld [vmem:[%s4642_s25 + $0x270] sm:$0xff] }
  0x67   : > { %4201 = vmatprep.mubr.msk.bf16.mxu0 %vm512_vm0, %v427_v60  ;;  %v360_v60 = vld [vmem:[%s4642_s25 + $0x278] sm:$0xff] }
  0x68   : > { %v448_v63 = vpack.c.bf16 %v360_v60, %v359_v59 }
  0x6e   : > { %4202 = vmatmul.mubr.msk.bf16.gmra.mxu0 %vm512_vm0, %v428_v1  ;;  %v363_v1 = vld [vmem:[%s4642_s25 + $0x290] sm:$0xff] }
  0x6f   : > { %4205 = vmatprep.mubr.msk.bf16.mxu0 %vm512_vm0, %v429_v3  ;;  %v365_v3 = vld [vmem:[%s4642_s25 + $0x2a0] sm:$0xff]  ;;  %v450_v5 = vpack.c.bf16 %v364_v2, %v363_v1 }
  0x70   : > { %v451_v6 = vpack.c.bf16 %v366_v4, %v365_v3 }
  0x76   : > { %4206 = vmatmul.mubr.msk.bf16.gmra.mxu0 %vm512_vm0, %v430_v9  ;;  %v369_v9 = vld [vmem:[%s4642_s25 + $0x2c0] sm:$0xff] }
  0x77   : > { %4209 = vmatprep.mubr.msk.bf16.mxu0 %vm512_vm0, %v431_v10  ;;  %v370_v10 = vld [vmem:[%s4642_s25 + $0x2c8] sm:$0xff] }
  0x78   : > { %v453_v12 = vpack.c.bf16 %v370_v10, %v369_v9  ;;  %v393_v10 = vld [vmem:[%s4642_s25 + $0x380] sm:$0xff] }
  0x7e   : > { %4210 = vmatmul.mubr.msk.bf16.gmra.mxu0 %vm512_vm0, %v432_v15  ;;  %v373_v15 = vld [vmem:[%s4642_s25 + $0x2e0] sm:$0xff] }
  0x7f   : > { %4213 = vmatprep.mubr.msk.bf16.mxu0 %vm512_vm0, %v433_v16  ;;  %v374_v16 = vld [vmem:[%s4642_s25 + $0x2e8] sm:$0xff] }
  0x80   : > { %v455_v18 = vpack.c.bf16 %v374_v16, %v373_v15 }
  0x86   : > { %4214 = vmatmul.mubr.msk.bf16.gmra.mxu0 %vm512_vm0, %v434_v21  ;;  %v377_v21 = vld [vmem:[%s4642_s25 + $0x300] sm:$0xff] }
  0x87   : > { %4217 = vmatprep.mubr.msk.bf16.mxu0 %vm512_vm0, %v435_v22  ;;  %v378_v22 = vld [vmem:[%s4642_s25 + $0x308] sm:$0xff] }
  0x88   : > { %v457_v24 = vpack.c.bf16 %v378_v22, %v377_v21 }
  0x8e   : > { %4218 = vmatmul.mubr.msk.bf16.gmra.mxu0 %vm512_vm0, %v436_v27  ;;  %v381_v27 = vld [vmem:[%s4642_s25 + $0x320] sm:$0xff] }
  0x8f   : > { %4221 = vmatprep.mubr.msk.bf16.mxu0 %vm512_vm0, %v437_v28  ;;  %v382_v28 = vld [vmem:[%s4642_s25 + $0x328] sm:$0xff] }
  0x90   : > { %v459_v30 = vpack.c.bf16 %v382_v28, %v381_v27  ;;  %v396_v27 = vld [vmem:[%s4642_s25 + $0x398] sm:$0xff] }
  0x91   : > { %v466_v35 = vpack.c.bf16 %v396_v27, %v395_v26 }
  0x96   : > { %4222 = vmatmul.mubr.msk.bf16.gmra.mxu0 %vm512_vm0, %v438_v33  ;;  %v384_v33 = vld [vmem:[%s4642_s25 + $0x338] sm:$0xff] }
  0x97   : > { %4225 = vmatprep.mubr.msk.bf16.mxu0 %vm512_vm0, %v439_v34 }
  0x9e   : > { %4226 = vmatmul.mubr.msk.bf16.gmra.mxu0 %vm512_vm0, %v440_v39  ;;  %v460_v39 = vpack.c.bf16 %v384_v33, %v383_v32 }
  0x9f   : > { %4229 = vmatprep.mubr.msk.bf16.mxu0 %vm512_vm0, %v441_v40 }
  0xa6   : > { %4230 = vmatmul.mubr.msk.bf16.gmra.mxu0 %vm512_vm0, %v442_v45 }
  0xa7   : > { %4233 = vmatprep.mubr.msk.bf16.mxu0 %vm512_vm0, %v443_v46 }
  0xae   : > { %4234 = vmatmul.mubr.msk.bf16.gmra.mxu0 %vm512_vm0, %v444_v51  ;;  %v388_v51 = vld [vmem:[%s4642_s25 + $0x358] sm:$0xff] }
  0xaf   : > { %4237 = vmatprep.mubr.msk.bf16.mxu0 %vm512_vm0, %v445_v52  ;;  %v462_v59 = vpack.c.bf16 %v388_v51, %v387_v50  ;;  %v401_v51 = vld [vmem:[%s4642_s25 + $0x3c0] sm:$0xff] }
  0xb6   : > { %4238 = vmatmul.mubr.msk.bf16.gmra.mxu0 %vm512_vm0, %v446_v57 }
  0xb7   : > { %4241 = vmatprep.mubr.msk.bf16.mxu0 %vm512_vm0, %v447_v58 }
  0xbe   : > { %4242 = vmatmul.mubr.msk.bf16.gmra.mxu0 %vm512_vm0, %v448_v63 }
  0xbf   : > { %4245 = vmatprep.mubr.msk.bf16.mxu0 %vm512_vm0, %v449_v0 }
  0xc6   : > { %4246 = vmatmul.mubr.msk.bf16.gmra.mxu0 %vm512_vm0, %v450_v5 }
  0xc7   : > { %4249 = vmatprep.mubr.msk.bf16.mxu0 %vm512_vm0, %v451_v6  ;;  %v391_v6 = vld [vmem:[%s4642_s25 + $0x370] sm:$0xff] }
  0xc8   : > { %v464_v15 = vpack.c.bf16 %v392_v7, %v391_v6  ;;  %v405_v7 = vld [vmem:[%s4642_s25 + $0x3e0] sm:$0xff] }
  0xce   : > { %4250 = vmatmul.mubr.msk.bf16.gmra.mxu0 %vm512_vm0, %v452_v11  ;;  %v394_v11 = vld [vmem:[%s4642_s25 + $0x388] sm:$0xff] }
  0xcf   : > { %4253 = vmatprep.mubr.msk.bf16.mxu0 %vm512_vm0, %v453_v12 }
  0xd6   : > { %4254 = vmatmul.mubr.msk.bf16.gmra.mxu0 %vm512_vm0, %v454_v17 }
  0xd7   : > { %4257 = vmatprep.mubr.msk.bf16.mxu0 %vm512_vm0, %v455_v18  ;;  %v465_v18 = vpack.c.bf16 %v394_v11, %v393_v10 }
  0xde   : > { %4258 = vmatmul.mubr.msk.bf16.gmra.mxu0 %vm512_vm0, %v456_v23 }
  0xdf   : > { %4261 = vmatprep.mubr.msk.bf16.mxu0 %vm512_vm0, %v457_v24 }
  0xe6   : > { %v4167_v31 = vpop.f32.mrf.mxu0  ;;  %4262 = vmatmul.mubr.msk.bf16.gmra.mxu0 %vm512_vm0, %v458_v29 }
  0xe7   : > { %4265 = vmatprep.mubr.msk.bf16.mxu0 %vm512_vm0, %v459_v30  ;;  %v748_v43 = vadd.f32 %v4167_v31, %v4813_v37  ;;  %v397_v30 = vld [vmem:[%s4642_s25 + $0x3a0] sm:$0xff]  ;;  %v398_v31 = vld [vmem:[%s4642_s25 + $0x3a8] sm:$0xff] }
  0xe8   : > { %v739_v34 = vpop.f32.mrf.mxu0 }
  0xe9   : > { %v740_v40 = vadd.f32 %v4813_v37, %v739_v34  ;;  %v1252_v52 = vmax.f32 %v748_v43, 0.0 }
  0xea   : > { %v4168_v38 = vpop.f32.mrf.mxu0 }
  0xeb   : > { %v751_v41 = vadd.f32 %v4168_v38, %v4813_v37  ;;  %v1250_v48 = vmax.f32 %v740_v40, 0.0 }
  0xec   : > { %v742_v44 = vpop.f32.mrf.mxu0 }
  0xed   : > { %v743_v45 = vadd.f32 %v4813_v37, %v742_v44  ;;  %v1253_v46 = vmax.f32 %v751_v41, 0.0 }
  0xee   : > { %v4171_v47 = vpop.f32.mrf.mxu0  ;;  %4266 = vmatmul.mubr.msk.bf16.gmra.mxu0 %vm512_vm0, %v460_v39  ;;  %v467_v39 = vpack.c.bf16 %v398_v31, %v397_v30 }
  0xef   : > { %v1251_v49 = vmax.f32 %v743_v45, 0.0  ;;  %4269 = vmatprep.mubr.msk.bf16.mxu0 %vm512_vm0, %v461_v42  ;;  %v1379_v57 = vpack.c.bf16 %v1253_v46, %v1252_v52  ;;  %v764_v63 = vadd.f32 %v4171_v47, %v4813_v37  ;;  %v399_v47 = vld [vmem:[%s4642_s25 + $0x3b0] sm:$0xff]  ;;  %v402_v52 = vld [vmem:[%s4642_s25 + $0x3c8] sm:$0xff] }
  0xf0   : > { %v755_v53 = vpop.f32.mrf.mxu0 }
  0xf1   : > { %v1378_v56 = vpack.c.bf16 %v1251_v49, %v1250_v48  ;;  %v756_v60 = vadd.f32 %v4813_v37, %v755_v53  ;;  %v1256_v8 = vmax.f32 %v764_v63, 0.0  ;;  %v400_v48 = vld [vmem:[%s4642_s25 + $0x3b8] sm:$0xff] }
  0xf2   : > { %v4172_v58 = vpop.f32.mrf.mxu0 }
  0xf3   : > { %v767_v61 = vadd.f32 %v4172_v58, %v4813_v37  ;;  %4297 = vmatprep.mubr.msk.bf16.mxu1 %vm1465_vm1, %v1378_v56  ;;  %v1254_v4 = vmax.f32 %v756_v60, 0.0  ;;  %v468_v56 = vpack.c.bf16 %v400_v48, %v399_v47 }
  0xf4   : > { %v758_v0 = vpop.f32.mrf.mxu0  ;;  %4298 = vmatmul.mubr.msk.bf16.vlgmr.msra.gmra.mxu1 %vm1465_vm1, %v1379_v57 }
  0xf5   : > { %v759_v1 = vadd.f32 %v4813_v37, %v758_v0  ;;  %v1257_v2 = vmax.f32 %v767_v61, 0.0 }
  0xf6   : > { %v4175_v3 = vpop.f32.mrf.mxu0  ;;  %4270 = vmatmul.mubr.msk.bf16.gmra.mxu0 %vm512_vm0, %v462_v59  ;;  %v469_v59 = vpack.c.bf16 %v402_v52, %v401_v51 }
  0xf7   : > { %v1255_v5 = vmax.f32 %v759_v1, 0.0  ;;  %4273 = vmatprep.mubr.msk.bf16.mxu0 %vm512_vm0, %v463_v62  ;;  %v1381_v13 = vpack.c.bf16 %v1257_v2, %v1256_v8  ;;  %v780_v19 = vadd.f32 %v4175_v3, %v4813_v37  ;;  %v403_v3 = vld [vmem:[%s4642_s25 + $0x3d0] sm:$0xff]  ;;  %v406_v8 = vld [vmem:[%s4642_s25 + $0x3e8] sm:$0xff] }
  0xf8   : > { %v771_v9 = vpop.f32.mrf.mxu0 }
  0xf9   : > { %v1380_v12 = vpack.c.bf16 %v1255_v5, %v1254_v4  ;;  %v772_v16 = vadd.f32 %v4813_v37, %v771_v9  ;;  %v1260_v28 = vmax.f32 %v780_v19, 0.0  ;;  %v404_v4 = vld [vmem:[%s4642_s25 + $0x3d8] sm:$0xff] }
  0xfa   : > { %v4176_v14 = vpop.f32.mrf.mxu0 }
  0xfb   : > { %v783_v17 = vadd.f32 %v4176_v14, %v4813_v37  ;;  %4301 = vmatprep.mubr.msk.bf16.mxu1 %vm1465_vm1, %v1380_v12  ;;  %v1258_v24 = vmax.f32 %v772_v16, 0.0  ;;  %v470_v12 = vpack.c.bf16 %v404_v4, %v403_v3 }
  0xfc   : > { %v774_v20 = vpop.f32.mrf.mxu0  ;;  %4302 = vmatmul.mubr.msk.bf16.gmra.mxu1 %vm1465_vm1, %v1381_v13 }
  0xfd   : > { %v775_v21 = vadd.f32 %v4813_v37, %v774_v20  ;;  %v1261_v22 = vmax.f32 %v783_v17, 0.0 }
  0xfe   : > { %v4179_v23 = vpop.f32.mrf.mxu0  ;;  %4274 = vmatmul.mubr.msk.bf16.gmra.mxu0 %vm512_vm0, %v464_v15  ;;  %v471_v15 = vpack.c.bf16 %v406_v8, %v405_v7 }
  0xff   : > { %v1259_v25 = vmax.f32 %v775_v21, 0.0  ;;  %4277 = vmatprep.mubr.msk.bf16.mxu0 %vm512_vm0, %v465_v18  ;;  %v1383_v33 = vpack.c.bf16 %v1261_v22, %v1260_v28  ;;  %v796_v40 = vadd.f32 %v4179_v23, %v4813_v37  ;;  %v407_v23 = vld [vmem:[%s4642_s25 + $0x3f0] sm:$0xff] }
 0x100   : > { %v787_v29 = vpop.f32.mrf.mxu0 }
 0x101   : > { %v1382_v32 = vpack.c.bf16 %v1259_v25, %v1258_v24  ;;  %v788_v36 = vadd.f32 %v4813_v37, %v787_v29  ;;  %v1264_v49 = vmax.f32 %v796_v40, 0.0  ;;  %v408_v24 = vld [vmem:[%s4642_s25 + $0x3f8] sm:$0xff]  ;;  %s2850_s25 = sld [smem:[#allocation2]] }
 0x102   : > { %v4180_v34 = vpop.f32.mrf.mxu0  ;;  %v472_v30 = vpack.c.bf16 %v408_v24, %v407_v23 }
 0x103   : > { %v799_v38 = vadd.f32 %v4180_v34, %v4813_v37  ;;  %4305 = vmatprep.mubr.msk.bf16.mxu1 %vm1465_vm1, %v1382_v32  ;;  %v1262_v45 = vmax.f32 %v788_v36, 0.0 }
 0x104   : > { %v790_v41 = vpop.f32.mrf.mxu0  ;;  %4306 = vmatmul.mubr.msk.bf16.gmra.mxu1 %vm1465_vm1, %v1383_v33 }
 0x105   : > { %v791_v42 = vadd.f32 %v4813_v37, %v790_v41  ;;  %v1265_v43 = vmax.f32 %v799_v38, 0.0 }
 0x106   : > { %v4183_v44 = vpop.f32.mrf.mxu0  ;;  %4278 = vmatmul.mubr.msk.bf16.gmra.mxu0 %vm512_vm0, %v466_v35 }
 0x107   : > { %v1263_v46 = vmax.f32 %v791_v42, 0.0  ;;  %4281 = vmatprep.mubr.msk.bf16.mxu0 %vm512_vm0, %v467_v39  ;;  %v1385_v54 = vpack.c.bf16 %v1265_v43, %v1264_v49  ;;  %v812_v60 = vadd.f32 %v4183_v44, %v4813_v37 }
 0x108   : > { %v803_v50 = vpop.f32.mrf.mxu0 }
 0x109   : > { %v1384_v53 = vpack.c.bf16 %v1263_v46, %v1262_v45  ;;  %v804_v57 = vadd.f32 %v4813_v37, %v803_v50  ;;  %v1268_v5 = vmax.f32 %v812_v60, 0.0 }
 0x10a   : > { %v4184_v55 = vpop.f32.mrf.mxu0 }
 0x10b   : > { %v815_v58 = vadd.f32 %v4184_v55, %v4813_v37  ;;  %4309 = vmatprep.mubr.msk.bf16.mxu1 %vm1465_vm1, %v1384_v53  ;;  %v1266_v1 = vmax.f32 %v804_v57, 0.0 }
 0x10c   : > { %v806_v61 = vpop.f32.mrf.mxu0  ;;  %4310 = vmatmul.mubr.msk.bf16.gmra.mxu1 %vm1465_vm1, %v1385_v54 }
 0x10d   : > { %v807_v62 = vadd.f32 %v4813_v37, %v806_v61  ;;  %v1269_v63 = vmax.f32 %v815_v58, 0.0 }
 0x10e   : > { %v4187_v0 = vpop.f32.mrf.mxu0  ;;  %4282 = vmatmul.mubr.msk.bf16.gmra.mxu0 %vm512_vm0, %v468_v56 }
 0x10f   : > { %v1267_v2 = vmax.f32 %v807_v62, 0.0  ;;  %4285 = vmatprep.mubr.msk.bf16.mxu0 %vm512_vm0, %v469_v59  ;;  %v1387_v10 = vpack.c.bf16 %v1269_v63, %v1268_v5  ;;  %v828_v16 = vadd.f32 %v4187_v0, %v4813_v37 }
 0x110   : > { %v819_v6 = vpop.f32.mrf.mxu0 }
 0x111   : > { %v1386_v9 = vpack.c.bf16 %v1267_v2, %v1266_v1  ;;  %v820_v13 = vadd.f32 %v4813_v37, %v819_v6  ;;  %v1272_v25 = vmax.f32 %v828_v16, 0.0 }
 0x112   : > { %v4188_v11 = vpop.f32.mrf.mxu0 }
 0x113   : > { %v831_v14 = vadd.f32 %v4188_v11, %v4813_v37  ;;  %4313 = vmatprep.mubr.msk.bf16.mxu1 %vm1465_vm1, %v1386_v9  ;;  %v1270_v21 = vmax.f32 %v820_v13, 0.0 }
 0x114   : > { %v822_v17 = vpop.f32.mrf.mxu0  ;;  %4314 = vmatmul.mubr.msk.bf16.gmra.mxu1 %vm1465_vm1, %v1387_v10 }
 0x115   : > { %v823_v18 = vadd.f32 %v4813_v37, %v822_v17  ;;  %v1273_v19 = vmax.f32 %v831_v14, 0.0 }
 0x116   : > { %v4191_v20 = vpop.f32.mrf.mxu0  ;;  %4286 = vmatmul.mubr.msk.bf16.gmra.mxu0 %vm512_vm0, %v470_v12 }
 0x117   : > { %v1271_v22 = vmax.f32 %v823_v18, 0.0  ;;  %4289 = vmatprep.mubr.msk.bf16.mxu0 %vm512_vm0, %v471_v15  ;;  %v1389_v28 = vpack.c.bf16 %v1273_v19, %v1272_v25  ;;  %v844_v33 = vadd.f32 %v4191_v20, %v4813_v37 }
 0x118   : > { %v835_v26 = vpop.f32.mrf.mxu0 }
 0x119   : > { %v1388_v27 = vpack.c.bf16 %v1271_v22, %v1270_v21  ;;  %v836_v31 = vadd.f32 %v4813_v37, %v835_v26  ;;  %v1276_v41 = vmax.f32 %v844_v33, 0.0 }
 0x11a   : > { %v4192_v29 = vpop.f32.mrf.mxu0 }
 0x11b   : > { %v847_v32 = vadd.f32 %v4192_v29, %v4813_v37  ;;  %4317 = vmatprep.mubr.msk.bf16.mxu1 %vm1465_vm1, %v1388_v27  ;;  %v1274_v39 = vmax.f32 %v836_v31, 0.0 }
 0x11c   : > { %v838_v34 = vpop.f32.mrf.mxu0  ;;  %4318 = vmatmul.mubr.msk.bf16.gmra.mxu1 %vm1465_vm1, %v1389_v28 }
 0x11d   : > { %v839_v35 = vadd.f32 %v4813_v37, %v838_v34  ;;  %v1277_v36 = vmax.f32 %v847_v32, 0.0 }
 0x11e   : > { %v4195_v38 = vpop.f32.mrf.mxu0  ;;  %4290 = vmatmul.mubr.msk.bf16.gmra.mxu0 %vm512_vm0, %v472_v30  ;;  %vm3105_vm0 = vcmask 1048512  }
 0x11f   : > { %v1275_v40 = vmax.f32 %v839_v35, 0.0  ;;  %v1391_v44 = vpack.c.bf16 %v1277_v36, %v1276_v41  ;;  %v860_v48 = vadd.f32 %v4195_v38, %v4813_v37 }
 0x120   : > { %v851_v42 = vpop.f32.mrf.mxu0 }
 0x121   : > { %v1390_v43 = vpack.c.bf16 %v1275_v40, %v1274_v39  ;;  %v852_v46 = vadd.f32 %v4813_v37, %v851_v42  ;;  %v1280_v55 = vmax.f32 %v860_v48, 0.0 }
 0x122   : > { %v4196_v45 = vpop.f32.mrf.mxu0 }
 0x123   : > { %v863_v47 = vadd.f32 %v4196_v45, %v4813_v37  ;;  %4321 = vmatprep.mubr.msk.bf16.mxu1 %vm1465_vm1, %v1390_v43  ;;  %v1278_v53 = vmax.f32 %v852_v46, 0.0 }
 0x124   : > { %v854_v49 = vpop.f32.mrf.mxu0  ;;  %4322 = vmatmul.mubr.msk.bf16.gmra.mxu1 %vm1465_vm1, %v1391_v44 }
 0x125   : > { %v855_v50 = vadd.f32 %v4813_v37, %v854_v49  ;;  %v1281_v51 = vmax.f32 %v863_v47, 0.0 }
 0x126   : > { %v4199_v52 = vpop.f32.mrf.mxu0 }
 0x127   : > { %v1279_v54 = vmax.f32 %v855_v50, 0.0  ;;  %v1393_v58 = vpack.c.bf16 %v1281_v51, %v1280_v55  ;;  %v876_v62 = vadd.f32 %v4199_v52, %v4813_v37 }
 0x128   : > { %v867_v56 = vpop.f32.mrf.mxu0 }
 0x129   : > { %v1392_v57 = vpack.c.bf16 %v1279_v54, %v1278_v53  ;;  %v868_v60 = vadd.f32 %v4813_v37, %v867_v56  ;;  %v1284_v5 = vmax.f32 %v876_v62, 0.0 }
 0x12a   : > { %v4200_v59 = vpop.f32.mrf.mxu0 }
 0x12b   : > { %v879_v61 = vadd.f32 %v4200_v59, %v4813_v37  ;;  %4325 = vmatprep.mubr.msk.bf16.mxu1 %vm1465_vm1, %v1392_v57  ;;  %v1282_v3 = vmax.f32 %v868_v60, 0.0 }
 0x12c   : > { %v870_v63 = vpop.f32.mrf.mxu0  ;;  %4326 = vmatmul.mubr.msk.bf16.gmra.mxu1 %vm1465_vm1, %v1393_v58 }
 0x12d   : > { %v871_v0 = vadd.f32 %v4813_v37, %v870_v63  ;;  %v1285_v1 = vmax.f32 %v879_v61, 0.0 }
 0x12e   : > { %v4203_v2 = vpop.f32.mrf.mxu0 }
 0x12f   : > { %v1283_v4 = vmax.f32 %v871_v0, 0.0  ;;  %v1395_v8 = vpack.c.bf16 %v1285_v1, %v1284_v5  ;;  %v892_v12 = vadd.f32 %v4203_v2, %v4813_v37 }
 0x130   : > { %v883_v6 = vpop.f32.mrf.mxu0 }
 0x131   : > { %v1394_v7 = vpack.c.bf16 %v1283_v4, %v1282_v3  ;;  %v884_v10 = vadd.f32 %v4813_v37, %v883_v6  ;;  %v1288_v19 = vmax.f32 %v892_v12, 0.0 }
 0x132   : > { %v4204_v9 = vpop.f32.mrf.mxu0 }
 0x133   : > { %v895_v11 = vadd.f32 %v4204_v9, %v4813_v37  ;;  %4329 = vmatprep.mubr.msk.bf16.mxu1 %vm1465_vm1, %v1394_v7  ;;  %v1286_v17 = vmax.f32 %v884_v10, 0.0 }
 0x134   : > { %v886_v13 = vpop.f32.mrf.mxu0  ;;  %4330 = vmatmul.mubr.msk.bf16.gmra.mxu1 %vm1465_vm1, %v1395_v8 }
 0x135   : > { %v887_v14 = vadd.f32 %v4813_v37, %v886_v13  ;;  %v1289_v15 = vmax.f32 %v895_v11, 0.0 }
 0x136   : > { %v4207_v16 = vpop.f32.mrf.mxu0 }
 0x137   : > { %v1287_v18 = vmax.f32 %v887_v14, 0.0  ;;  %v1397_v22 = vpack.c.bf16 %v1289_v15, %v1288_v19  ;;  %v908_v26 = vadd.f32 %v4207_v16, %v4813_v37 }
 0x138   : > { %v899_v20 = vpop.f32.mrf.mxu0 }
 0x139   : > { %v1396_v21 = vpack.c.bf16 %v1287_v18, %v1286_v17  ;;  %v900_v24 = vadd.f32 %v4813_v37, %v899_v20  ;;  %v1292_v33 = vmax.f32 %v908_v26, 0.0 }
 0x13a   : > { %v4208_v23 = vpop.f32.mrf.mxu0 }
 0x13b   : > { %v911_v25 = vadd.f32 %v4208_v23, %v4813_v37  ;;  %4333 = vmatprep.mubr.msk.bf16.mxu1 %vm1465_vm1, %v1396_v21  ;;  %v1290_v31 = vmax.f32 %v900_v24, 0.0 }
 0x13c   : > { %v902_v27 = vpop.f32.mrf.mxu0  ;;  %4334 = vmatmul.mubr.msk.bf16.gmra.mxu1 %vm1465_vm1, %v1397_v22 }
 0x13d   : > { %v903_v28 = vadd.f32 %v4813_v37, %v902_v27  ;;  %v1293_v29 = vmax.f32 %v911_v25, 0.0 }
 0x13e   : > { %v4211_v30 = vpop.f32.mrf.mxu0 }
 0x13f   : > { %v1291_v32 = vmax.f32 %v903_v28, 0.0  ;;  %v1399_v36 = vpack.c.bf16 %v1293_v29, %v1292_v33  ;;  %v924_v41 = vadd.f32 %v4211_v30, %v4813_v37 }
 0x140   : > { %v915_v34 = vpop.f32.mrf.mxu0 }
 0x141   : > { %v1398_v35 = vpack.c.bf16 %v1291_v32, %v1290_v31  ;;  %v916_v39 = vadd.f32 %v4813_v37, %v915_v34  ;;  %v1296_v48 = vmax.f32 %v924_v41, 0.0 }
 0x142   : > { %v4212_v38 = vpop.f32.mrf.mxu0 }
 0x143   : > { %v927_v40 = vadd.f32 %v4212_v38, %v4813_v37  ;;  %4337 = vmatprep.mubr.msk.bf16.mxu1 %vm1465_vm1, %v1398_v35  ;;  %v1294_v46 = vmax.f32 %v916_v39, 0.0 }
 0x144   : > { %v918_v42 = vpop.f32.mrf.mxu0  ;;  %4338 = vmatmul.mubr.msk.bf16.gmra.mxu1 %vm1465_vm1, %v1399_v36 }
 0x145   : > { %v919_v43 = vadd.f32 %v4813_v37, %v918_v42  ;;  %v1297_v44 = vmax.f32 %v927_v40, 0.0 }
 0x146   : > { %v4215_v45 = vpop.f32.mrf.mxu0 }
 0x147   : > { %v1295_v47 = vmax.f32 %v919_v43, 0.0  ;;  %v1401_v51 = vpack.c.bf16 %v1297_v44, %v1296_v48  ;;  %v940_v55 = vadd.f32 %v4215_v45, %v4813_v37 }
 0x148   : > { %v931_v49 = vpop.f32.mrf.mxu0 }
 0x149   : > { %v1400_v50 = vpack.c.bf16 %v1295_v47, %v1294_v46  ;;  %v932_v53 = vadd.f32 %v4813_v37, %v931_v49  ;;  %v1300_v62 = vmax.f32 %v940_v55, 0.0 }
 0x14a   : > { %v4216_v52 = vpop.f32.mrf.mxu0 }
 0x14b   : > { %v943_v54 = vadd.f32 %v4216_v52, %v4813_v37  ;;  %4341 = vmatprep.mubr.msk.bf16.mxu1 %vm1465_vm1, %v1400_v50  ;;  %v1298_v60 = vmax.f32 %v932_v53, 0.0 }
 0x14c   : > { %v934_v56 = vpop.f32.mrf.mxu0  ;;  %4342 = vmatmul.mubr.msk.bf16.gmra.mxu1 %vm1465_vm1, %v1401_v51 }
 0x14d   : > { %v935_v57 = vadd.f32 %v4813_v37, %v934_v56  ;;  %v1301_v58 = vmax.f32 %v943_v54, 0.0 }
 0x14e   : > { %v4219_v59 = vpop.f32.mrf.mxu0 }
 0x14f   : > { %v1299_v61 = vmax.f32 %v935_v57, 0.0  ;;  %v1403_v1 = vpack.c.bf16 %v1301_v58, %v1300_v62  ;;  %v956_v5 = vadd.f32 %v4219_v59, %v4813_v37 }
 0x150   : > { %v947_v63 = vpop.f32.mrf.mxu0 }
 0x151   : > { %v1402_v0 = vpack.c.bf16 %v1299_v61, %v1298_v60  ;;  %v948_v3 = vadd.f32 %v4813_v37, %v947_v63  ;;  %v1304_v12 = vmax.f32 %v956_v5, 0.0 }
 0x152   : > { %v4220_v2 = vpop.f32.mrf.mxu0 }
 0x153   : > { %v959_v4 = vadd.f32 %v4220_v2, %v4813_v37  ;;  %4345 = vmatprep.mubr.msk.bf16.mxu1 %vm1465_vm1, %v1402_v0  ;;  %v1302_v10 = vmax.f32 %v948_v3, 0.0 }
 0x154   : > { %v950_v6 = vpop.f32.mrf.mxu0  ;;  %4346 = vmatmul.mubr.msk.bf16.gmra.mxu1 %vm1465_vm1, %v1403_v1 }
 0x155   : > { %v951_v7 = vadd.f32 %v4813_v37, %v950_v6  ;;  %v1305_v8 = vmax.f32 %v959_v4, 0.0 }
 0x156   : > { %v4223_v9 = vpop.f32.mrf.mxu0 }
 0x157   : > { %v1303_v11 = vmax.f32 %v951_v7, 0.0  ;;  %v1405_v15 = vpack.c.bf16 %v1305_v8, %v1304_v12  ;;  %v972_v19 = vadd.f32 %v4223_v9, %v4813_v37 }
 0x158   : > { %v963_v13 = vpop.f32.mrf.mxu0 }
 0x159   : > { %v1404_v14 = vpack.c.bf16 %v1303_v11, %v1302_v10  ;;  %v964_v17 = vadd.f32 %v4813_v37, %v963_v13  ;;  %v1308_v26 = vmax.f32 %v972_v19, 0.0 }
 0x15a   : > { %v4224_v16 = vpop.f32.mrf.mxu0 }
 0x15b   : > { %v975_v18 = vadd.f32 %v4224_v16, %v4813_v37  ;;  %4349 = vmatprep.mubr.msk.bf16.mxu1 %vm1465_vm1, %v1404_v14  ;;  %v1306_v24 = vmax.f32 %v964_v17, 0.0 }
 0x15c   : > { %v966_v20 = vpop.f32.mrf.mxu0  ;;  %4350 = vmatmul.mubr.msk.bf16.gmra.mxu1 %vm1465_vm1, %v1405_v15 }
 0x15d   : > { %v967_v21 = vadd.f32 %v4813_v37, %v966_v20  ;;  %v1309_v22 = vmax.f32 %v975_v18, 0.0 }
 0x15e   : > { %v4227_v23 = vpop.f32.mrf.mxu0 }
 0x15f   : > { %v1307_v25 = vmax.f32 %v967_v21, 0.0  ;;  %v1407_v29 = vpack.c.bf16 %v1309_v22, %v1308_v26  ;;  %v988_v33 = vadd.f32 %v4227_v23, %v4813_v37 }
 0x160   : > { %v979_v27 = vpop.f32.mrf.mxu0 }
 0x161   : > { %v1406_v28 = vpack.c.bf16 %v1307_v25, %v1306_v24  ;;  %v980_v31 = vadd.f32 %v4813_v37, %v979_v27  ;;  %v1312_v41 = vmax.f32 %v988_v33, 0.0 }
 0x162   : > { %v4228_v30 = vpop.f32.mrf.mxu0 }
 0x163   : > { %v991_v32 = vadd.f32 %v4228_v30, %v4813_v37  ;;  %4353 = vmatprep.mubr.msk.bf16.mxu1 %vm1465_vm1, %v1406_v28  ;;  %v1310_v39 = vmax.f32 %v980_v31, 0.0 }
 0x164   : > { %v982_v34 = vpop.f32.mrf.mxu0  ;;  %4354 = vmatmul.mubr.msk.bf16.gmra.mxu1 %vm1465_vm1, %v1407_v29 }
 0x165   : > { %v983_v35 = vadd.f32 %v4813_v37, %v982_v34  ;;  %v1313_v36 = vmax.f32 %v991_v32, 0.0 }
 0x166   : > { %v4231_v38 = vpop.f32.mrf.mxu0 }
 0x167   : > { %v1311_v40 = vmax.f32 %v983_v35, 0.0  ;;  %v1409_v44 = vpack.c.bf16 %v1313_v36, %v1312_v41  ;;  %v1004_v48 = vadd.f32 %v4231_v38, %v4813_v37 }
 0x168   : > { %v995_v42 = vpop.f32.mrf.mxu0 }
 0x169   : > { %v1408_v43 = vpack.c.bf16 %v1311_v40, %v1310_v39  ;;  %v996_v46 = vadd.f32 %v4813_v37, %v995_v42  ;;  %v1316_v55 = vmax.f32 %v1004_v48, 0.0 }
 0x16a   : > { %v4232_v45 = vpop.f32.mrf.mxu0 }
 0x16b   : > { %v1007_v47 = vadd.f32 %v4232_v45, %v4813_v37  ;;  %4357 = vmatprep.mubr.msk.bf16.mxu1 %vm1465_vm1, %v1408_v43  ;;  %v1314_v53 = vmax.f32 %v996_v46, 0.0 }
 0x16c   : > { %v998_v49 = vpop.f32.mrf.mxu0  ;;  %4358 = vmatmul.mubr.msk.bf16.gmra.mxu1 %vm1465_vm1, %v1409_v44 }
 0x16d   : > { %v999_v50 = vadd.f32 %v4813_v37, %v998_v49  ;;  %v1317_v51 = vmax.f32 %v1007_v47, 0.0 }
 0x16e   : > { %v4235_v52 = vpop.f32.mrf.mxu0 }
 0x16f   : > { %v1315_v54 = vmax.f32 %v999_v50, 0.0  ;;  %v1411_v58 = vpack.c.bf16 %v1317_v51, %v1316_v55  ;;  %v1020_v62 = vadd.f32 %v4235_v52, %v4813_v37 }
 0x170   : > { %v1011_v56 = vpop.f32.mrf.mxu0 }
 0x171   : > { %v1410_v57 = vpack.c.bf16 %v1315_v54, %v1314_v53  ;;  %v1012_v60 = vadd.f32 %v4813_v37, %v1011_v56  ;;  %v1320_v5 = vmax.f32 %v1020_v62, 0.0 }
 0x172   : > { %v4236_v59 = vpop.f32.mrf.mxu0 }
 0x173   : > { %v1023_v61 = vadd.f32 %v4236_v59, %v4813_v37  ;;  %4361 = vmatprep.mubr.msk.bf16.mxu1 %vm1465_vm1, %v1410_v57  ;;  %v1318_v3 = vmax.f32 %v1012_v60, 0.0 }
 0x174   : > { %v1014_v63 = vpop.f32.mrf.mxu0  ;;  %4362 = vmatmul.mubr.msk.bf16.gmra.mxu1 %vm1465_vm1, %v1411_v58 }
 0x175   : > { %v1015_v0 = vadd.f32 %v4813_v37, %v1014_v63  ;;  %v1321_v1 = vmax.f32 %v1023_v61, 0.0 }
 0x176   : > { %v4239_v2 = vpop.f32.mrf.mxu0 }
 0x177   : > { %v1319_v4 = vmax.f32 %v1015_v0, 0.0  ;;  %v1413_v8 = vpack.c.bf16 %v1321_v1, %v1320_v5  ;;  %v1036_v12 = vadd.f32 %v4239_v2, %v4813_v37 }
 0x178   : > { %v1027_v6 = vpop.f32.mrf.mxu0 }
 0x179   : > { %v1412_v7 = vpack.c.bf16 %v1319_v4, %v1318_v3  ;;  %v1028_v10 = vadd.f32 %v4813_v37, %v1027_v6  ;;  %v1324_v19 = vmax.f32 %v1036_v12, 0.0 }
 0x17a   : > { %v4240_v9 = vpop.f32.mrf.mxu0 }
 0x17b   : > { %v1039_v11 = vadd.f32 %v4240_v9, %v4813_v37  ;;  %4365 = vmatprep.mubr.msk.bf16.mxu1 %vm1465_vm1, %v1412_v7  ;;  %v1322_v17 = vmax.f32 %v1028_v10, 0.0 }
 0x17c   : > { %v1030_v13 = vpop.f32.mrf.mxu0  ;;  %4366 = vmatmul.mubr.msk.bf16.gmra.mxu1 %vm1465_vm1, %v1413_v8 }
 0x17d   : > { %v1031_v14 = vadd.f32 %v4813_v37, %v1030_v13  ;;  %v1325_v15 = vmax.f32 %v1039_v11, 0.0 }
 0x17e   : > { %v4243_v16 = vpop.f32.mrf.mxu0 }
 0x17f   : > { %v1323_v18 = vmax.f32 %v1031_v14, 0.0  ;;  %v1415_v22 = vpack.c.bf16 %v1325_v15, %v1324_v19  ;;  %v1052_v26 = vadd.f32 %v4243_v16, %v4813_v37 }
 0x180   : > { %v1043_v20 = vpop.f32.mrf.mxu0 }
 0x181   : > { %v1414_v21 = vpack.c.bf16 %v1323_v18, %v1322_v17  ;;  %v1044_v24 = vadd.f32 %v4813_v37, %v1043_v20  ;;  %v1328_v33 = vmax.f32 %v1052_v26, 0.0 }
 0x182   : > { %v4244_v23 = vpop.f32.mrf.mxu0 }
 0x183   : > { %v1055_v25 = vadd.f32 %v4244_v23, %v4813_v37  ;;  %4369 = vmatprep.mubr.msk.bf16.mxu1 %vm1465_vm1, %v1414_v21  ;;  %v1326_v31 = vmax.f32 %v1044_v24, 0.0 }
 0x184   : > { %v1046_v27 = vpop.f32.mrf.mxu0  ;;  %4370 = vmatmul.mubr.msk.bf16.gmra.mxu1 %vm1465_vm1, %v1415_v22 }
 0x185   : > { %v1047_v28 = vadd.f32 %v4813_v37, %v1046_v27  ;;  %v1329_v29 = vmax.f32 %v1055_v25, 0.0 }
 0x186   : > { %v4247_v30 = vpop.f32.mrf.mxu0 }
 0x187   : > { %v1327_v32 = vmax.f32 %v1047_v28, 0.0  ;;  %v1417_v36 = vpack.c.bf16 %v1329_v29, %v1328_v33  ;;  %v1068_v41 = vadd.f32 %v4247_v30, %v4813_v37 }
 0x188   : > { %v1059_v34 = vpop.f32.mrf.mxu0 }
 0x189   : > { %v1416_v35 = vpack.c.bf16 %v1327_v32, %v1326_v31  ;;  %v1060_v39 = vadd.f32 %v4813_v37, %v1059_v34  ;;  %v1332_v48 = vmax.f32 %v1068_v41, 0.0 }
 0x18a   : > { %v4248_v38 = vpop.f32.mrf.mxu0 }
 0x18b   : > { %v1071_v40 = vadd.f32 %v4248_v38, %v4813_v37  ;;  %4373 = vmatprep.mubr.msk.bf16.mxu1 %vm1465_vm1, %v1416_v35  ;;  %v1330_v46 = vmax.f32 %v1060_v39, 0.0 }
 0x18c   : > { %v1062_v42 = vpop.f32.mrf.mxu0  ;;  %4374 = vmatmul.mubr.msk.bf16.gmra.mxu1 %vm1465_vm1, %v1417_v36 }
 0x18d   : > { %v1063_v43 = vadd.f32 %v4813_v37, %v1062_v42  ;;  %v1333_v44 = vmax.f32 %v1071_v40, 0.0 }
 0x18e   : > { %v4251_v45 = vpop.f32.mrf.mxu0 }
 0x18f   : > { %v1331_v47 = vmax.f32 %v1063_v43, 0.0  ;;  %v1419_v51 = vpack.c.bf16 %v1333_v44, %v1332_v48  ;;  %v1084_v55 = vadd.f32 %v4251_v45, %v4813_v37 }
 0x190   : > { %v1075_v49 = vpop.f32.mrf.mxu0 }
 0x191   : > { %v1418_v50 = vpack.c.bf16 %v1331_v47, %v1330_v46  ;;  %v1076_v53 = vadd.f32 %v4813_v37, %v1075_v49  ;;  %v1336_v62 = vmax.f32 %v1084_v55, 0.0  ;;  %v5001_v46 = vld [vmem:[%s5984_s4] ss:$0 sm:$0xff] }
 0x192   : > { %v4252_v52 = vpop.f32.mrf.mxu0 }
 0x193   : > { %v1087_v54 = vadd.f32 %v4252_v52, %v4813_v37  ;;  %4377 = vmatprep.mubr.msk.bf16.mxu1 %vm1465_vm1, %v1418_v50  ;;  %v1334_v60 = vmax.f32 %v1076_v53, 0.0 }
 0x194   : > { %v1078_v56 = vpop.f32.mrf.mxu0  ;;  %4378 = vmatmul.mubr.msk.bf16.gmra.mxu1 %vm1465_vm1, %v1419_v51 }
 0x195   : > { %v1079_v57 = vadd.f32 %v4813_v37, %v1078_v56  ;;  %v1337_v58 = vmax.f32 %v1087_v54, 0.0 }
 0x196   : > { %v4255_v59 = vpop.f32.mrf.mxu0 }
 0x197   : > { %v1335_v61 = vmax.f32 %v1079_v57, 0.0  ;;  %v1421_v1 = vpack.c.bf16 %v1337_v58, %v1336_v62  ;;  %v1100_v5 = vadd.f32 %v4255_v59, %v4813_v37 }
 0x198   : > { %v1091_v63 = vpop.f32.mrf.mxu0 }
 0x199   : > { %v1420_v0 = vpack.c.bf16 %v1335_v61, %v1334_v60  ;;  %v1092_v3 = vadd.f32 %v4813_v37, %v1091_v63  ;;  %v1340_v12 = vmax.f32 %v1100_v5, 0.0  ;;  %v5013_v60 = vld [vmem:[%s5985_s5] ss:$0 sm:$0xff] }
 0x19a   : > { %v4256_v2 = vpop.f32.mrf.mxu0 }
 0x19b   : > { %v1103_v4 = vadd.f32 %v4256_v2, %v4813_v37  ;;  %4381 = vmatprep.mubr.msk.bf16.mxu1 %vm1465_vm1, %v1420_v0  ;;  %v1338_v10 = vmax.f32 %v1092_v3, 0.0 }
 0x19c   : > { %v1094_v6 = vpop.f32.mrf.mxu0  ;;  %4382 = vmatmul.mubr.msk.bf16.gmra.mxu1 %vm1465_vm1, %v1421_v1 }
 0x19d   : > { %v1095_v7 = vadd.f32 %v4813_v37, %v1094_v6  ;;  %v1341_v8 = vmax.f32 %v1103_v4, 0.0 }
 0x19e   : > { %v4259_v9 = vpop.f32.mrf.mxu0 }
 0x19f   : > { %v1339_v11 = vmax.f32 %v1095_v7, 0.0  ;;  %v1423_v15 = vpack.c.bf16 %v1341_v8, %v1340_v12  ;;  %v1116_v19 = vadd.f32 %v4259_v9, %v4813_v37 }
 0x1a0   : > { %v1107_v13 = vpop.f32.mrf.mxu0 }
 0x1a1   : > { %v1422_v14 = vpack.c.bf16 %v1339_v11, %v1338_v10  ;;  %v1108_v17 = vadd.f32 %v4813_v37, %v1107_v13  ;;  %v1344_v26 = vmax.f32 %v1116_v19, 0.0 }
 0x1a2   : > { %v4260_v16 = vpop.f32.mrf.mxu0 }
 0x1a3   : > { %v1119_v18 = vadd.f32 %v4260_v16, %v4813_v37  ;;  %4385 = vmatprep.mubr.msk.bf16.mxu1 %vm1465_vm1, %v1422_v14  ;;  %v1342_v24 = vmax.f32 %v1108_v17, 0.0 }
 0x1a4   : > { %v1110_v20 = vpop.f32.mrf.mxu0  ;;  %4386 = vmatmul.mubr.msk.bf16.gmra.mxu1 %vm1465_vm1, %v1423_v15 }
 0x1a5   : > { %v1111_v21 = vadd.f32 %v4813_v37, %v1110_v20  ;;  %v1345_v22 = vmax.f32 %v1119_v18, 0.0 }
 0x1a6   : > { %v4263_v23 = vpop.f32.mrf.mxu0 }
 0x1a7   : > { %v1343_v25 = vmax.f32 %v1111_v21, 0.0  ;;  %v1425_v29 = vpack.c.bf16 %v1345_v22, %v1344_v26  ;;  %v1132_v33 = vadd.f32 %v4263_v23, %v4813_v37 }
 0x1a8   : > { %v1123_v27 = vpop.f32.mrf.mxu0 }
 0x1a9   : > { %v1424_v28 = vpack.c.bf16 %v1343_v25, %v1342_v24  ;;  %v1124_v31 = vadd.f32 %v4813_v37, %v1123_v27  ;;  %v1348_v41 = vmax.f32 %v1132_v33, 0.0 }
 0x1aa   : > { %v4264_v30 = vpop.f32.mrf.mxu0 }
 0x1ab   : > { %v1135_v32 = vadd.f32 %v4264_v30, %v4813_v37  ;;  %4389 = vmatprep.mubr.msk.bf16.mxu1 %vm1465_vm1, %v1424_v28  ;;  %v1346_v39 = vmax.f32 %v1124_v31, 0.0 }
 0x1ac   : > { %v1126_v34 = vpop.f32.mrf.mxu0  ;;  %4390 = vmatmul.mubr.msk.bf16.gmra.mxu1 %vm1465_vm1, %v1425_v29 }
 0x1ad   : > { %v1127_v35 = vadd.f32 %v4813_v37, %v1126_v34  ;;  %v1349_v36 = vmax.f32 %v1135_v32, 0.0 }
 0x1ae   : > { %v4267_v38 = vpop.f32.mrf.mxu0 }
 0x1af   : > { %v1347_v40 = vmax.f32 %v1127_v35, 0.0  ;;  %v1427_v44 = vpack.c.bf16 %v1349_v36, %v1348_v41  ;;  %v1148_v49 = vadd.f32 %v4267_v38, %v4813_v37 }
 0x1b0   : > { %v1139_v42 = vpop.f32.mrf.mxu0 }
 0x1b1   : > { %v1426_v43 = vpack.c.bf16 %v1347_v40, %v1346_v39  ;;  %v1140_v47 = vadd.f32 %v4813_v37, %v1139_v42  ;;  %v1352_v61 = vmax.f32 %v1148_v49, 0.0  ;;  %v5039_v42 = vld [vmem:[%s5982_s2] ss:$0 sm:$0xff] }
 0x1b2   : > { %v4268_v45 = vpop.f32.mrf.mxu0 }
 0x1b3   : > { %v1151_v48 = vadd.f32 %v4268_v45, %v4813_v37  ;;  %4393 = vmatprep.mubr.msk.bf16.mxu1 %vm1465_vm1, %v1426_v43  ;;  %v1350_v57 = vmax.f32 %v1140_v47, 0.0 }
 0x1b4   : > { %v1142_v50 = vpop.f32.mrf.mxu0  ;;  %v4299_v51 = vpop.f32.mrf.mxu1  ;;  %4394 = vmatmul.mubr.msk.bf16.gmra.mxu1 %vm1465_vm1, %v1427_v44 }
 0x1b5   : > { %v1143_v52 = vadd.f32 %v4813_v37, %v1142_v50  ;;  %v1701_v53 = vadd.f32 %v4299_v51, %v5001_v46  ;;  %v1353_v54 = vmax.f32 %v1151_v48, 0.0 }
 0x1b6   : > { %v4271_v55 = vpop.f32.mrf.mxu0  ;;  %v1692_v56 = vpop.f32.mrf.mxu1 }
 0x1b7   : > { %v1351_v58 = vmax.f32 %v1143_v52, 0.0  ;;  %v2205_v59 = vmax.f32 %v1701_v53, 0.0  ;;  %v1693_v62 = vadd.f32 %v5001_v46, %v1692_v56  ;;  %v1429_v3 = vpack.c.bf16 %v1353_v54, %v1352_v61 }
 0x1b8   : > { %v1155_v63 = vpop.f32.mrf.mxu0  ;;  %v4300_v0 = vpop.f32.mrf.mxu1  ;;  %v1164_v12 = vadd.f32 %v4271_v55, %v4813_v37 }
 0x1b9   : > { %v1428_v1 = vpack.c.bf16 %v1351_v58, %v1350_v57  ;;  %v1704_v2 = vadd.f32 %v4300_v0, %v5001_v46  ;;  %v2203_v4 = vmax.f32 %v1693_v62, 0.0  ;;  %v2340_v7 = vmul.f32 %v5013_v60, %v2205_v59 }
 0x1ba   : > { %v4272_v5 = vpop.f32.mrf.mxu0  ;;  %v1695_v6 = vpop.f32.mrf.mxu1  ;;  %v1156_v8 = vadd.f32 %v4813_v37, %v1155_v63  ;;  %v1356_v28 = vmax.f32 %v1164_v12, 0.0 }
 0x1bb   : > { %v2206_v9 = vmax.f32 %v1704_v2, 0.0  ;;  %v1167_v10 = vadd.f32 %v4272_v5, %v4813_v37  ;;  %v1696_v11 = vadd.f32 %v5001_v46, %v1695_v6  ;;  %4397 = vmatprep.mubr.msk.bf16.mxu1 %vm1465_vm1, %v1428_v1  ;;  %v2472_v14 = vsel %vm1465_vm1, %v2340_v7, 0.0 }
 0x1bc   : > { %v1158_v13 = vpop.f32.mrf.mxu0  ;;  %4398 = vmatmul.mubr.msk.bf16.gmra.mxu1 %vm1465_vm1, %v1429_v3  ;;  %v4303_v15 = vpop.f32.mrf.mxu1  ;;  %v2338_v16 = vmul.f32 %v5013_v60, %v2203_v4  ;;  %2473 = vadd.xlane.f32.xlu1 %v2472_v14  ;;  %v1354_v25 = vmax.f32 %v1156_v8, 0.0 }
 0x1bd   : > { %v2204_v17 = vmax.f32 %v1696_v11, 0.0  ;;  %v1159_v18 = vadd.f32 %v4813_v37, %v1158_v13  ;;  %v1717_v19 = vadd.f32 %v4303_v15, %v5001_v46  ;;  %v1357_v20 = vmax.f32 %v1167_v10, 0.0 }
 0x1be   : > { %v4275_v21 = vpop.f32.mrf.mxu0  ;;  %v1708_v22 = vpop.f32.mrf.mxu1  ;;  %v2466_v23 = vsel %vm1465_vm1, %v2338_v16, 0.0  ;;  %v2341_v24 = vmul.f32 %v5013_v60, %v2206_v9 }
 0x1bf   : > { %v1355_v26 = vmax.f32 %v1159_v18, 0.0  ;;  %v2209_v27 = vmax.f32 %v1717_v19, 0.0  ;;  %2467 = vadd.xlane.f32.xlu0 %v2466_v23  ;;  %v1709_v29 = vadd.f32 %v5001_v46, %v1708_v22  ;;  %v2339_v32 = vmul.f32 %v5013_v60, %v2204_v17 }
 0x1c0   : > { %v1171_v30 = vpop.f32.mrf.mxu0  ;;  %v2475_v37 = vsel %vm1465_vm1, %v2341_v24, 0.0  ;;  %v4304_v31 = vpop.f32.mrf.mxu1  ;;  %v1431_v35 = vpack.c.bf16 %v1357_v20, %v1356_v28  ;;  %v1180_v48 = vadd.f32 %v5039_v42, %v4275_v21 }
 0x1c1   : > { %v1430_v33 = vpack.c.bf16 %v1355_v26, %v1354_v25  ;;  %2476 = vadd.xlane.f32.xlu1 %v2475_v37  ;;  %v1720_v34 = vadd.f32 %v4304_v31, %v5001_v46  ;;  %v2207_v36 = vmax.f32 %v1709_v29, 0.0  ;;  %v2469_v40 = vsel %vm1465_vm1, %v2339_v32, 0.0 }
 0x1c2   : > { %v4276_v38 = vpop.f32.mrf.mxu0  ;;  %v1711_v39 = vpop.f32.mrf.mxu1  ;;  %v2344_v41 = vmul.f32 %v5013_v60, %v2209_v27  ;;  %v1172_v43 = vadd.f32 %v5039_v42, %v1171_v30  ;;  %v1360_v0 = vmax.f32 %v1180_v48, 0.0 }
 0x1c3   : > { %v2210_v44 = vmax.f32 %v1720_v34, 0.0  ;;  %v1183_v45 = vadd.f32 %v5039_v42, %v4276_v38  ;;  %v1712_v47 = vadd.f32 %v5001_v46, %v1711_v39  ;;  %2470 = vadd.xlane.f32.xlu0 %v2469_v40  ;;  %4401 = vmatprep.mubr.msk.bf16.mxu1 %vm1465_vm1, %v1430_v33  ;;  %v2342_v59 = vmul.f32 %v5013_v60, %v2207_v36 }
 0x1c4   : > { %v1174_v49 = vpop.f32.mrf.mxu0  ;;  %v4307_v50 = vpop.f32.mrf.mxu1  ;;  %4402 = vmatmul.mubr.msk.bf16.gmra.mxu1 %vm1465_vm1, %v1431_v35  ;;  %v2484_v57 = vsel %vm1465_vm1, %v2344_v41, 0.0  ;;  %v1358_v61 = vmax.f32 %v1172_v43, 0.0 }
 0x1c5   : > { %v2208_v51 = vmax.f32 %v1712_v47, 0.0  ;;  %v1175_v52 = vadd.f32 %v5039_v42, %v1174_v49  ;;  %v1733_v53 = vadd.f32 %v4307_v50, %v5001_v46  ;;  %v1361_v54 = vmax.f32 %v1183_v45, 0.0 }
 0x1c6   : > { %v4279_v55 = vpop.f32.mrf.mxu0  ;;  %v1724_v56 = vpop.f32.mrf.mxu1  ;;  %v2345_v58 = vmul.f32 %v5013_v60, %v2210_v44  ;;  %v2478_v12 = vsel %vm1465_vm1, %v2342_v59, 0.0 }
 0x1c7   : > { %v1359_v62 = vmax.f32 %v1175_v52, 0.0  ;;  %v2213_v63 = vmax.f32 %v1733_v53, 0.0  ;;  %2485 = vadd.xlane.f32.xlu0 %v2484_v57  ;;  %v1725_v1 = vadd.f32 %v5001_v46, %v1724_v56  ;;  %v2343_v5 = vmul.f32 %v5013_v60, %v2208_v51 }
 0x1c8   : > { %v1187_v2 = vpop.f32.mrf.mxu0  ;;  %v2487_v3 = vsel %vm1465_vm1, %v2345_v58, 0.0  ;;  %v4308_v4 = vpop.f32.mrf.mxu1  ;;  %v1433_v8 = vpack.c.bf16 %v1361_v54, %v1360_v0  ;;  %v1196_v18 = vadd.f32 %v5039_v42, %v4279_v55 }
 0x1c9   : > { %v1432_v6 = vpack.c.bf16 %v1359_v62, %v1358_v61  ;;  %2488 = vadd.xlane.f32.xlu1 %v2487_v3  ;;  %v1736_v7 = vadd.f32 %v4308_v4, %v5001_v46  ;;  %v2211_v9 = vmax.f32 %v1725_v1, 0.0  ;;  %v2348_v13 = vmul.f32 %v5013_v60, %v2213_v63 }
 0x1ca   : > { %v4280_v10 = vpop.f32.mrf.mxu0  ;;  %v1727_v11 = vpop.f32.mrf.mxu1  ;;  %v1188_v14 = vadd.f32 %v5039_v42, %v1187_v2  ;;  %v2481_v21 = vsel %vm1465_vm1, %v2343_v5, 0.0  ;;  %v1364_v33 = vmax.f32 %v1196_v18, 0.0 }
 0x1cb   : > { %v2214_v15 = vmax.f32 %v1736_v7, 0.0  ;;  %v1199_v16 = vadd.f32 %v5039_v42, %v4280_v10  ;;  %v1728_v17 = vadd.f32 %v5001_v46, %v1727_v11  ;;  %2479 = vadd.xlane.f32.xlu0 %v2478_v12  ;;  %4405 = vmatprep.mubr.msk.bf16.mxu1 %vm1465_vm1, %v1432_v6  ;;  %v2496_v28 = vsel %vm1465_vm1, %v2348_v13, 0.0 }
 0x1cc   : > { %v1190_v19 = vpop.f32.mrf.mxu0  ;;  %v4311_v20 = vpop.f32.mrf.mxu1  ;;  %4406 = vmatmul.mubr.msk.bf16.gmra.mxu1 %vm1465_vm1, %v1433_v8  ;;  %v2346_v30 = vmul.f32 %v5013_v60, %v2211_v9  ;;  %v1362_v37 = vmax.f32 %v1188_v14, 0.0 }
 0x1cd   : > { %v2212_v22 = vmax.f32 %v1728_v17, 0.0  ;;  %v1191_v23 = vadd.f32 %v5039_v42, %v1190_v19  ;;  %v1749_v24 = vadd.f32 %v4311_v20, %v5001_v46  ;;  %2482 = vadd.xlane.f32.xlu1 %v2481_v21  ;;  %v1365_v25 = vmax.f32 %v1199_v16, 0.0 }
 0x1ce   : > { %v4283_v26 = vpop.f32.mrf.mxu0  ;;  %v1740_v27 = vpop.f32.mrf.mxu1  ;;  %v2349_v29 = vmul.f32 %v5013_v60, %v2214_v15  ;;  %v2490_v48 = vsel %vm1465_vm1, %v2346_v30, 0.0 }
 0x1cf   : > { %v1363_v31 = vmax.f32 %v1191_v23, 0.0  ;;  %v2217_v32 = vmax.f32 %v1749_v24, 0.0  ;;  %2497 = vadd.xlane.f32.xlu0 %v2496_v28  ;;  %v1741_v34 = vadd.f32 %v5001_v46, %v1740_v27  ;;  %v2347_v39 = vmul.f32 %v5013_v60, %v2212_v22 }
 0x1d0   : > { %v1203_v35 = vpop.f32.mrf.mxu0  ;;  %v4312_v36 = vpop.f32.mrf.mxu1  ;;  %v2499_v38 = vsel %vm1465_vm1, %v2349_v29, 0.0  ;;  %v1435_v43 = vpack.c.bf16 %v1365_v25, %v1364_v33  ;;  %v1212_v54 = vadd.f32 %v5039_v42, %v4283_v26 }
 0x1d1   : > { %v1434_v40 = vpack.c.bf16 %v1363_v31, %v1362_v37  ;;  %v1752_v41 = vadd.f32 %v4312_v36, %v5001_v46  ;;  %2500 = vadd.xlane.f32.xlu1 %v2499_v38  ;;  %v2215_v44 = vmax.f32 %v1741_v34, 0.0  ;;  %v2352_v49 = vmul.f32 %v5013_v60, %v2217_v32 }
 0x1d2   : > { %v4284_v45 = vpop.f32.mrf.mxu0  ;;  %v1743_v47 = vpop.f32.mrf.mxu1  ;;  %v1204_v50 = vadd.f32 %v5039_v42, %v1203_v35  ;;  %v2493_v57 = vsel %vm1465_vm1, %v2347_v39, 0.0  ;;  %v1368_v7 = vmax.f32 %v1212_v54, 0.0 }
 0x1d3   : > { %v2218_v51 = vmax.f32 %v1752_v41, 0.0  ;;  %v1215_v52 = vadd.f32 %v5039_v42, %v4284_v45  ;;  %v1744_v53 = vadd.f32 %v5001_v46, %v1743_v47  ;;  %2491 = vadd.xlane.f32.xlu0 %v2490_v48  ;;  %4409 = vmatprep.mubr.msk.bf16.mxu1 %vm1465_vm1, %v1434_v40  ;;  %v2508_v1 = vsel %vm1465_vm1, %v2352_v49, 0.0 }
 0x1d4   : > { %v1206_v55 = vpop.f32.mrf.mxu0  ;;  %v4315_v56 = vpop.f32.mrf.mxu1  ;;  %4410 = vmatmul.mubr.msk.bf16.gmra.mxu1 %vm1465_vm1, %v1435_v43  ;;  %v2350_v3 = vmul.f32 %v5013_v60, %v2215_v44  ;;  %v1366_v4 = vmax.f32 %v1204_v50, 0.0 }
 0x1d5   : > { %v2216_v58 = vmax.f32 %v1744_v53, 0.0  ;;  %v1207_v59 = vadd.f32 %v5039_v42, %v1206_v55  ;;  %v1765_v61 = vadd.f32 %v4315_v56, %v5001_v46  ;;  %2494 = vadd.xlane.f32.xlu1 %v2493_v57  ;;  %v1369_v62 = vmax.f32 %v1215_v52, 0.0 }
 0x1d6   : > { %v4287_v63 = vpop.f32.mrf.mxu0  ;;  %v1756_v0 = vpop.f32.mrf.mxu1  ;;  %v2353_v2 = vmul.f32 %v5013_v60, %v2218_v51  ;;  %v2502_v19 = vsel %vm1465_vm1, %v2350_v3, 0.0 }
 0x1d7   : > { %v1367_v5 = vmax.f32 %v1207_v59, 0.0  ;;  %v2221_v6 = vmax.f32 %v1765_v61, 0.0  ;;  %2509 = vadd.xlane.f32.xlu0 %v2508_v1  ;;  %v1757_v8 = vadd.f32 %v5001_v46, %v1756_v0  ;;  %v2351_v12 = vmul.f32 %v5013_v60, %v2216_v58 }
 0x1d8   : > { %v1219_v9 = vpop.f32.mrf.mxu0  ;;  %v4316_v10 = vpop.f32.mrf.mxu1  ;;  %v2511_v11 = vsel %vm1465_vm1, %v2353_v2, 0.0  ;;  %v1437_v15 = vpack.c.bf16 %v1369_v62, %v1368_v7  ;;  %v1228_v25 = vadd.f32 %v5039_v42, %v4287_v63 }
 0x1d9   : > { %v1436_v13 = vpack.c.bf16 %v1367_v5, %v1366_v4  ;;  %v1768_v14 = vadd.f32 %v4316_v10, %v5001_v46  ;;  %2512 = vadd.xlane.f32.xlu1 %v2511_v11  ;;  %v2219_v16 = vmax.f32 %v1757_v8, 0.0  ;;  %v2356_v20 = vmul.f32 %v5013_v60, %v2221_v6 }
 0x1da   : > { %v4288_v17 = vpop.f32.mrf.mxu0  ;;  %v1759_v18 = vpop.f32.mrf.mxu1  ;;  %v1220_v21 = vadd.f32 %v5039_v42, %v1219_v9  ;;  %v2505_v28 = vsel %vm1465_vm1, %v2351_v12, 0.0  ;;  %v1372_v41 = vmax.f32 %v1228_v25, 0.0 }
 0x1db   : > { %v2222_v22 = vmax.f32 %v1768_v14, 0.0  ;;  %v1231_v23 = vadd.f32 %v5039_v42, %v4288_v17  ;;  %v1760_v24 = vadd.f32 %v5001_v46, %v1759_v18  ;;  %2503 = vadd.xlane.f32.xlu0 %v2502_v19  ;;  %4413 = vmatprep.mubr.msk.bf16.mxu1 %vm1465_vm1, %v1436_v13  ;;  %v2520_v34 = vsel %vm1465_vm1, %v2356_v20, 0.0 }
 0x1dc   : > { %v1222_v26 = vpop.f32.mrf.mxu0  ;;  %v4319_v27 = vpop.f32.mrf.mxu1  ;;  %4414 = vmatmul.mubr.msk.bf16.gmra.mxu1 %vm1465_vm1, %v1437_v15  ;;  %v2354_v36 = vmul.f32 %v5013_v60, %v2219_v16  ;;  %v1370_v38 = vmax.f32 %v1220_v21, 0.0 }
 0x1dd   : > { %v2220_v29 = vmax.f32 %v1760_v24, 0.0  ;;  %v1223_v30 = vadd.f32 %v5039_v42, %v1222_v26  ;;  %v1781_v37 = vadd.f32 %v4319_v27, %v5001_v46  ;;  %2506 = vadd.xlane.f32.xlu1 %v2505_v28  ;;  %v1373_v31 = vmax.f32 %v1231_v23, 0.0 }
 0x1de   : > { %v4291_v32 = vpop.f32.mrf.mxu0  ;;  %v1772_v33 = vpop.f32.mrf.mxu1  ;;  %v2357_v35 = vmul.f32 %v5013_v60, %v2222_v22  ;;  %v2514_v55 = vsel %vm1465_vm1, %v2354_v36, 0.0 }
 0x1df   : > { %v1371_v39 = vmax.f32 %v1223_v30, 0.0  ;;  %v2225_v40 = vmax.f32 %v1781_v37, 0.0  ;;  %2521 = vadd.xlane.f32.xlu0 %v2520_v34  ;;  %v1773_v43 = vadd.f32 %v5001_v46, %v1772_v33  ;;  %v2355_v48 = vmul.f32 %v5013_v60, %v2220_v29 }
 0x1e0   : > { %v1235_v44 = vpop.f32.mrf.mxu0  ;;  %v4320_v45 = vpop.f32.mrf.mxu1  ;;  %v2523_v47 = vsel %vm1465_vm1, %v2357_v35, 0.0  ;;  %v1439_v51 = vpack.c.bf16 %v1373_v31, %v1372_v41  ;;  %v1244_v62 = vadd.f32 %v5039_v42, %v4291_v32 }
 0x1e1   : > { %v1438_v49 = vpack.c.bf16 %v1371_v39, %v1370_v38  ;;  %v1784_v50 = vadd.f32 %v4320_v45, %v5001_v46  ;;  %2524 = vadd.xlane.f32.xlu1 %v2523_v47  ;;  %v2223_v52 = vmax.f32 %v1773_v43, 0.0  ;;  %v2360_v56 = vmul.f32 %v5013_v60, %v2225_v40 }
 0x1e2   : > { %v4292_v53 = vpop.f32.mrf.mxu0  ;;  %v1775_v54 = vpop.f32.mrf.mxu1  ;;  %v1236_v57 = vadd.f32 %v5039_v42, %v1235_v44  ;;  %v2517_v1 = vsel %vm1465_vm1, %v2355_v48, 0.0  ;;  %v1376_v14 = vmax.f32 %v1244_v62, 0.0 }
 0x1e3   : > { %v2226_v58 = vmax.f32 %v1784_v50, 0.0  ;;  %v1247_v59 = vadd.f32 %v5039_v42, %v4292_v53  ;;  %v1776_v61 = vadd.f32 %v5001_v46, %v1775_v54  ;;  %2515 = vadd.xlane.f32.xlu0 %v2514_v55  ;;  %4417 = vmatprep.mubr.msk.bf16.mxu1 %vm1465_vm1, %v1438_v49  ;;  %v2532_v7 = vsel %vm1465_vm1, %v2360_v56, 0.0 }
 0x1e4   : > { %v1238_v63 = vpop.f32.mrf.mxu0  ;;  %v4323_v0 = vpop.f32.mrf.mxu1  ;;  %4418 = vmatmul.mubr.msk.bf16.gmra.mxu1 %vm1465_vm1, %v1439_v51  ;;  %v2358_v9 = vmul.f32 %v5013_v60, %v2223_v52  ;;  %v1374_v10 = vmax.f32 %v1236_v57, 0.0 }
 0x1e5   : > { %v2224_v2 = vmax.f32 %v1776_v61, 0.0  ;;  %v1239_v3 = vadd.f32 %v5039_v42, %v1238_v63  ;;  %v1797_v4 = vadd.f32 %v4323_v0, %v5001_v46  ;;  %2518 = vadd.xlane.f32.xlu1 %v2517_v1  ;;  %v1377_v5 = vmax.f32 %v1247_v59, 0.0 }
 0x1e6   : > { %v1788_v6 = vpop.f32.mrf.mxu1  ;;  %v2361_v8 = vmul.f32 %v5013_v60, %v2226_v58  ;;  %v2526_v22 = vsel %vm1465_vm1, %v2358_v9, 0.0 }
 0x1e7   : > { %v1375_v11 = vmax.f32 %v1239_v3, 0.0  ;;  %v2229_v12 = vmax.f32 %v1797_v4, 0.0  ;;  %v1789_v13 = vadd.f32 %v5001_v46, %v1788_v6  ;;  %2533 = vadd.xlane.f32.xlu0 %v2532_v7  ;;  %v2359_v16 = vmul.f32 %v5013_v60, %v2224_v2 }
 0x1e8   : > { %v4324_v15 = vpop.f32.mrf.mxu1  ;;  %v2535_v42 = vsel %vm1465_vm1, %v2361_v8, 0.0  ;;  %v1441_v19 = vpack.c.bf16 %v1377_v5, %v1376_v14 }
 0x1e9   : > { %v1440_v17 = vpack.c.bf16 %v1375_v11, %v1374_v10  ;;  %v1800_v18 = vadd.f32 %v4324_v15, %v5001_v46  ;;  %2536 = vadd.xlane.f32.xlu1 %v2535_v42  ;;  %v2227_v20 = vmax.f32 %v1789_v13, 0.0  ;;  %v2364_v23 = vmul.f32 %v5013_v60, %v2229_v12 }
 0x1ea   : > { %v1791_v21 = vpop.f32.mrf.mxu1  ;;  %v2529_v27 = vsel %vm1465_vm1, %v2359_v16, 0.0 }
 0x1eb   : > { %v2230_v24 = vmax.f32 %v1800_v18, 0.0  ;;  %v1792_v25 = vadd.f32 %v5001_v46, %v1791_v21  ;;  %2527 = vadd.xlane.f32.xlu0 %v2526_v22  ;;  %4421 = vmatprep.mubr.msk.bf16.mxu1 %vm1465_vm1, %v1440_v17  ;;  %v2544_v31 = vsel %vm1465_vm1, %v2364_v23, 0.0  ;;  %v2362_v32 = vmul.f32 %v5013_v60, %v2227_v20 }
 0x1ec   : > { %v4327_v26 = vpop.f32.mrf.mxu1  ;;  %4422 = vmatmul.mubr.msk.bf16.gmra.mxu1 %vm1465_vm1, %v1441_v19 }
 0x1ed   : > { %v2228_v28 = vmax.f32 %v1792_v25, 0.0  ;;  %v1813_v29 = vadd.f32 %v4327_v26, %v5001_v46  ;;  %2530 = vadd.xlane.f32.xlu1 %v2529_v27  ;;  %v2365_v30 = vmul.f32 %v5013_v60, %v2230_v24  ;;  %v2538_v43 = vsel %vm1465_vm1, %v2362_v32, 0.0 }
 0x1ee   : > { %v1804_v37 = vpop.f32.mrf.mxu1 }
 0x1ef   : > { %v2233_v33 = vmax.f32 %v1813_v29, 0.0  ;;  %v1805_v34 = vadd.f32 %v5001_v46, %v1804_v37  ;;  %2545 = vadd.xlane.f32.xlu0 %v2544_v31  ;;  %v2547_v35 = vsel %vm1465_vm1, %v2365_v30, 0.0  ;;  %v2363_v38 = vmul.f32 %v5013_v60, %v2228_v28 }
 0x1f0   : > { %v4328_v36 = vpop.f32.mrf.mxu1 }
 0x1f1   : > { %v1816_v39 = vadd.f32 %v4328_v36, %v5001_v46  ;;  %2548 = vadd.xlane.f32.xlu1 %v2547_v35  ;;  %v2231_v40 = vmax.f32 %v1805_v34, 0.0  ;;  %v2368_v44 = vmul.f32 %v5013_v60, %v2233_v33  ;;  %v2541_v49 = vsel %vm1465_vm1, %v2363_v38, 0.0 }
 0x1f2   : > { %v1807_v41 = vpop.f32.mrf.mxu1 }
 0x1f3   : > { %v2234_v45 = vmax.f32 %v1816_v39, 0.0  ;;  %v1808_v47 = vadd.f32 %v5001_v46, %v1807_v41  ;;  %2539 = vadd.xlane.f32.xlu0 %v2538_v43  ;;  %v2556_v54 = vsel %vm1465_vm1, %v2368_v44, 0.0  ;;  %v2366_v55 = vmul.f32 %v5013_v60, %v2231_v40 }
 0x1f4   : > { %v4331_v48 = vpop.f32.mrf.mxu1 }
 0x1f5   : > { %v2232_v50 = vmax.f32 %v1808_v47, 0.0  ;;  %v1829_v51 = vadd.f32 %v4331_v48, %v5001_v46  ;;  %2542 = vadd.xlane.f32.xlu1 %v2541_v49  ;;  %v2369_v52 = vmul.f32 %v5013_v60, %v2234_v45  ;;  %v2550_v1 = vsel %vm1465_vm1, %v2366_v55, 0.0 }
 0x1f6   : > { %v1820_v53 = vpop.f32.mrf.mxu1 }
 0x1f7   : > { %v2237_v56 = vmax.f32 %v1829_v51, 0.0  ;;  %v1821_v57 = vadd.f32 %v5001_v46, %v1820_v53  ;;  %2557 = vadd.xlane.f32.xlu0 %v2556_v54  ;;  %v2559_v58 = vsel %vm1465_vm1, %v2369_v52, 0.0  ;;  %v2367_v61 = vmul.f32 %v5013_v60, %v2232_v50 }
 0x1f8   : > { %v4332_v59 = vpop.f32.mrf.mxu1 }
 0x1f9   : > { %v1832_v62 = vadd.f32 %v4332_v59, %v5001_v46  ;;  %2560 = vadd.xlane.f32.xlu1 %v2559_v58  ;;  %v2235_v63 = vmax.f32 %v1821_v57, 0.0  ;;  %v2372_v2 = vmul.f32 %v5013_v60, %v2237_v56  ;;  %v2553_v6 = vsel %vm1465_vm1, %v2367_v61, 0.0 }
 0x1fa   : > { %v1823_v0 = vpop.f32.mrf.mxu1 }
 0x1fb   : > { %v2238_v3 = vmax.f32 %v1832_v62, 0.0  ;;  %v1824_v4 = vadd.f32 %v5001_v46, %v1823_v0  ;;  %2551 = vadd.xlane.f32.xlu0 %v2550_v1  ;;  %v2568_v11 = vsel %vm1465_vm1, %v2372_v2, 0.0  ;;  %v2370_v12 = vmul.f32 %v5013_v60, %v2235_v63 }
 0x1fc   : > { %v4335_v5 = vpop.f32.mrf.mxu1 }
 0x1fd   : > { %v2236_v7 = vmax.f32 %v1824_v4, 0.0  ;;  %v1845_v8 = vadd.f32 %v4335_v5, %v5001_v46  ;;  %2554 = vadd.xlane.f32.xlu1 %v2553_v6  ;;  %v2373_v9 = vmul.f32 %v5013_v60, %v2238_v3  ;;  %v2562_v20 = vsel %vm1465_vm1, %v2370_v12, 0.0 }
 0x1fe   : > { %v1836_v10 = vpop.f32.mrf.mxu1 }
 0x1ff   : > { %v2241_v13 = vmax.f32 %v1845_v8, 0.0  ;;  %v1837_v14 = vadd.f32 %v5001_v46, %v1836_v10  ;;  %2569 = vadd.xlane.f32.xlu0 %v2568_v11  ;;  %v2571_v15 = vsel %vm1465_vm1, %v2373_v9, 0.0  ;;  %v2371_v16 = vmul.f32 %v5013_v60, %v2236_v7 }
 0x200   : > { %v4336_v42 = vpop.f32.mrf.mxu1 }
 0x201   : > { %v1848_v17 = vadd.f32 %v4336_v42, %v5001_v46  ;;  %2572 = vadd.xlane.f32.xlu1 %v2571_v15  ;;  %v2239_v18 = vmax.f32 %v1837_v14, 0.0  ;;  %v2376_v21 = vmul.f32 %v5013_v60, %v2241_v13  ;;  %v2565_v25 = vsel %vm1465_vm1, %v2371_v16, 0.0 }
 0x202   : > { %v1839_v19 = vpop.f32.mrf.mxu1 }
 0x203   : > { %v2242_v22 = vmax.f32 %v1848_v17, 0.0  ;;  %v1840_v23 = vadd.f32 %v5001_v46, %v1839_v19  ;;  %2563 = vadd.xlane.f32.xlu0 %v2562_v20  ;;  %v2580_v30 = vsel %vm1465_vm1, %v2376_v21, 0.0  ;;  %v2374_v37 = vmul.f32 %v5013_v60, %v2239_v18 }
 0x204   : > { %v4339_v24 = vpop.f32.mrf.mxu1 }
 0x205   : > { %v2240_v26 = vmax.f32 %v1840_v23, 0.0  ;;  %v1861_v27 = vadd.f32 %v4339_v24, %v5001_v46  ;;  %2566 = vadd.xlane.f32.xlu1 %v2565_v25  ;;  %v2377_v28 = vmul.f32 %v5013_v60, %v2242_v22  ;;  %v2574_v40 = vsel %vm1465_vm1, %v2374_v37, 0.0 }
 0x206   : > { %v1852_v29 = vpop.f32.mrf.mxu1 }
 0x207   : > { %v2245_v31 = vmax.f32 %v1861_v27, 0.0  ;;  %v1853_v32 = vadd.f32 %v5001_v46, %v1852_v29  ;;  %2581 = vadd.xlane.f32.xlu0 %v2580_v30  ;;  %v2583_v33 = vsel %vm1465_vm1, %v2377_v28, 0.0  ;;  %v2375_v35 = vmul.f32 %v5013_v60, %v2240_v26 }
 0x208   : > { %v4340_v34 = vpop.f32.mrf.mxu1 }
 0x209   : > { %v1864_v36 = vadd.f32 %v4340_v34, %v5001_v46  ;;  %2584 = vadd.xlane.f32.xlu1 %v2583_v33  ;;  %v2243_v38 = vmax.f32 %v1853_v32, 0.0  ;;  %v2380_v41 = vmul.f32 %v5013_v60, %v2245_v31  ;;  %v2577_v47 = vsel %vm1465_vm1, %v2375_v35, 0.0 }
 0x20a   : > { %v1855_v39 = vpop.f32.mrf.mxu1 }
 0x20b   : > { %v2246_v43 = vmax.f32 %v1864_v36, 0.0  ;;  %v1856_v44 = vadd.f32 %v5001_v46, %v1855_v39  ;;  %2575 = vadd.xlane.f32.xlu0 %v2574_v40  ;;  %v2592_v52 = vsel %vm1465_vm1, %v2380_v41, 0.0  ;;  %v2378_v53 = vmul.f32 %v5013_v60, %v2243_v38 }
 0x20c   : > { %v4343_v45 = vpop.f32.mrf.mxu1 }
 0x20d   : > { %v2244_v48 = vmax.f32 %v1856_v44, 0.0  ;;  %v1877_v49 = vadd.f32 %v4343_v45, %v5001_v46  ;;  %2578 = vadd.xlane.f32.xlu1 %v2577_v47  ;;  %v2381_v50 = vmul.f32 %v5013_v60, %v2246_v43  ;;  %v2586_v63 = vsel %vm1465_vm1, %v2378_v53, 0.0 }
 0x20e   : > { %v1868_v51 = vpop.f32.mrf.mxu1 }
 0x20f   : > { %v2249_v54 = vmax.f32 %v1877_v49, 0.0  ;;  %v1869_v55 = vadd.f32 %v5001_v46, %v1868_v51  ;;  %2593 = vadd.xlane.f32.xlu0 %v2592_v52  ;;  %v2595_v56 = vsel %vm1465_vm1, %v2381_v50, 0.0  ;;  %v2379_v58 = vmul.f32 %v5013_v60, %v2244_v48 }
 0x210   : > { %v4344_v57 = vpop.f32.mrf.mxu1 }
 0x211   : > { %v1880_v59 = vadd.f32 %v4344_v57, %v5001_v46  ;;  %2596 = vadd.xlane.f32.xlu1 %v2595_v56  ;;  %v2247_v61 = vmax.f32 %v1869_v55, 0.0  ;;  %v2384_v0 = vmul.f32 %v5013_v60, %v2249_v54  ;;  %v2589_v4 = vsel %vm1465_vm1, %v2379_v58, 0.0 }
 0x212   : > { %v1871_v62 = vpop.f32.mrf.mxu1 }
 0x213   : > { %v2250_v1 = vmax.f32 %v1880_v59, 0.0  ;;  %v1872_v2 = vadd.f32 %v5001_v46, %v1871_v62  ;;  %2587 = vadd.xlane.f32.xlu0 %v2586_v63  ;;  %v2604_v9 = vsel %vm1465_vm1, %v2384_v0, 0.0  ;;  %v2382_v10 = vmul.f32 %v5013_v60, %v2247_v61 }
 0x214   : > { %v4347_v3 = vpop.f32.mrf.mxu1 }
 0x215   : > { %v2248_v5 = vmax.f32 %v1872_v2, 0.0  ;;  %v1893_v6 = vadd.f32 %v4347_v3, %v5001_v46  ;;  %2590 = vadd.xlane.f32.xlu1 %v2589_v4  ;;  %v2385_v7 = vmul.f32 %v5013_v60, %v2250_v1  ;;  %v2598_v18 = vsel %vm1465_vm1, %v2382_v10, 0.0 }
 0x216   : > { %v1884_v8 = vpop.f32.mrf.mxu1 }
 0x217   : > { %v2253_v11 = vmax.f32 %v1893_v6, 0.0  ;;  %v1885_v12 = vadd.f32 %v5001_v46, %v1884_v8  ;;  %2605 = vadd.xlane.f32.xlu0 %v2604_v9  ;;  %v2607_v13 = vsel %vm1465_vm1, %v2385_v7, 0.0  ;;  %v2383_v15 = vmul.f32 %v5013_v60, %v2248_v5 }
 0x218   : > { %v4348_v14 = vpop.f32.mrf.mxu1 }
 0x219   : > { %v1896_v42 = vadd.f32 %v4348_v14, %v5001_v46  ;;  %2608 = vadd.xlane.f32.xlu1 %v2607_v13  ;;  %v2251_v16 = vmax.f32 %v1885_v12, 0.0  ;;  %v2388_v19 = vmul.f32 %v5013_v60, %v2253_v11  ;;  %v2601_v23 = vsel %vm1465_vm1, %v2383_v15, 0.0 }
 0x21a   : > { %v1887_v17 = vpop.f32.mrf.mxu1 }
 0x21b   : > { %v2254_v20 = vmax.f32 %v1896_v42, 0.0  ;;  %v1888_v21 = vadd.f32 %v5001_v46, %v1887_v17  ;;  %2599 = vadd.xlane.f32.xlu0 %v2598_v18  ;;  %v2616_v28 = vsel %vm1465_vm1, %v2388_v19, 0.0  ;;  %v2386_v29 = vmul.f32 %v5013_v60, %v2251_v16 }
 0x21c   : > { %v4351_v22 = vpop.f32.mrf.mxu1 }
 0x21d   : > { %v2252_v24 = vmax.f32 %v1888_v21, 0.0  ;;  %v1909_v25 = vadd.f32 %v4351_v22, %v5001_v46  ;;  %2602 = vadd.xlane.f32.xlu1 %v2601_v23  ;;  %v2389_v26 = vmul.f32 %v5013_v60, %v2254_v20  ;;  %v2610_v38 = vsel %vm1465_vm1, %v2386_v29, 0.0 }
 0x21e   : > { %v1900_v27 = vpop.f32.mrf.mxu1 }
 0x21f   : > { %v2257_v30 = vmax.f32 %v1909_v25, 0.0  ;;  %v1901_v37 = vadd.f32 %v5001_v46, %v1900_v27  ;;  %2617 = vadd.xlane.f32.xlu0 %v2616_v28  ;;  %v2619_v31 = vsel %vm1465_vm1, %v2389_v26, 0.0  ;;  %v2387_v33 = vmul.f32 %v5013_v60, %v2252_v24 }
 0x220   : > { %v4352_v32 = vpop.f32.mrf.mxu1 }
 0x221   : > { %v1912_v34 = vadd.f32 %v4352_v32, %v5001_v46  ;;  %2620 = vadd.xlane.f32.xlu1 %v2619_v31  ;;  %v2255_v35 = vmax.f32 %v1901_v37, 0.0  ;;  %v2392_v39 = vmul.f32 %v5013_v60, %v2257_v30  ;;  %v2613_v44 = vsel %vm1465_vm1, %v2387_v33, 0.0 }
 0x222   : > { %v1903_v36 = vpop.f32.mrf.mxu1 }
 0x223   : > { %v2258_v40 = vmax.f32 %v1912_v34, 0.0  ;;  %v1904_v41 = vadd.f32 %v5001_v46, %v1903_v36  ;;  %2611 = vadd.xlane.f32.xlu0 %v2610_v38  ;;  %v2628_v50 = vsel %vm1465_vm1, %v2392_v39, 0.0  ;;  %v2390_v51 = vmul.f32 %v5013_v60, %v2255_v35 }
 0x224   : > { %v4355_v43 = vpop.f32.mrf.mxu1  ;;  %v2996_v38 = vlaneseq }
 0x225   : > { %v2256_v45 = vmax.f32 %v1904_v41, 0.0  ;;  %v1925_v47 = vadd.f32 %v4355_v43, %v5001_v46  ;;  %2614 = vadd.xlane.f32.xlu1 %v2613_v44  ;;  %v2393_v48 = vmul.f32 %v5013_v60, %v2258_v40  ;;  %v2622_v61 = vsel %vm1465_vm1, %v2390_v51, 0.0 }
 0x226   : > { %v1916_v49 = vpop.f32.mrf.mxu1  ;;  %v5263_v51 = vand.u32 127, %v2996_v38 }
 0x227   : > { %v2261_v52 = vmax.f32 %v1925_v47, 0.0  ;;  %v1917_v53 = vadd.f32 %v5001_v46, %v1916_v49  ;;  %2629 = vadd.xlane.f32.xlu0 %v2628_v50  ;;  %v2631_v54 = vsel %vm1465_vm1, %v2393_v48, 0.0  ;;  %v2391_v56 = vmul.f32 %v5013_v60, %v2256_v45  ;;  %v5257_v45 = vld [vmem:[%s5984_s4] ss:$0 sm:$0xff] }
 0x228   : > { %v4356_v55 = vpop.f32.mrf.mxu1 }
 0x229   : > { %v1928_v57 = vadd.f32 %v4356_v55, %v5001_v46  ;;  %2632 = vadd.xlane.f32.xlu1 %v2631_v54  ;;  %v2259_v58 = vmax.f32 %v1917_v53, 0.0  ;;  %v2396_v62 = vmul.f32 %v5013_v60, %v2261_v52  ;;  %v2625_v2 = vsel %vm1465_vm1, %v2391_v56, 0.0 }
 0x22a   : > { %v1919_v59 = vpop.f32.mrf.mxu1 }
 0x22b   : > { %v2262_v63 = vmax.f32 %v1928_v57, 0.0  ;;  %v1920_v0 = vadd.f32 %v5001_v46, %v1919_v59  ;;  %2623 = vadd.xlane.f32.xlu0 %v2622_v61  ;;  %v2640_v7 = vsel %vm1465_vm1, %v2396_v62, 0.0  ;;  %v2394_v8 = vmul.f32 %v5013_v60, %v2259_v58 }
 0x22c   : > { %v4359_v1 = vpop.f32.mrf.mxu1  ;;  %v5269_v58 = vshrl.u32 %v2996_v38, 7 }
 0x22d   : > { %v2260_v3 = vmax.f32 %v1920_v0, 0.0  ;;  %v1941_v4 = vadd.f32 %v4359_v1, %v5001_v46  ;;  %2626 = vadd.xlane.f32.xlu1 %v2625_v2  ;;  %v2397_v5 = vmul.f32 %v5013_v60, %v2262_v63  ;;  %v2634_v16 = vsel %vm1465_vm1, %v2394_v8, 0.0  ;;  %v5276_v0 = vld [vmem:[%s5985_s5] ss:$0 sm:$0xff] }
 0x22e   : > { %v1932_v6 = vpop.f32.mrf.mxu1  ;;  %v3009_v63 = vadd.s32 4294967280, %v5263_v51  ;;  %v3037_v8 = vadd.s32 4294967248, %v5263_v51 }
 0x22f   : > { %v2265_v9 = vmax.f32 %v1941_v4, 0.0  ;;  %v1933_v10 = vadd.f32 %v5001_v46, %v1932_v6  ;;  %2641 = vadd.xlane.f32.xlu0 %v2640_v7  ;;  %v2643_v11 = vsel %vm1465_vm1, %v2397_v5, 0.0  ;;  %v2395_v13 = vmul.f32 %v5013_v60, %v2260_v3 }
 0x230   : > { %v4360_v12 = vpop.f32.mrf.mxu1  ;;  %v5280_v3 = vstv %s2850_s25  ;;  %v3016_v6 = vadd.s32 4294967272, %v5263_v51  ;;  %v3002_v7 = vadd.s32 4294967288, %v5263_v51  ;;  %s5933_s25 = scalar_lea.hbm %s5987_s7, %s4629_s16  ;;  %s4537_s16 = smov [#allocation3]  }
 0x231   : > { %v1944_v14 = vadd.f32 %v4360_v12, %v5001_v46  ;;  %2644 = vadd.xlane.f32.xlu1 %v2643_v11  ;;  %v2263_v15 = vmax.f32 %v1933_v10, 0.0  ;;  %v2400_v17 = vmul.f32 %v5013_v60, %v2265_v9  ;;  %v2637_v21 = vsel %vm1465_vm1, %v2395_v13, 0.0  ;;  %s4479_s9 = sshll.u32 %s4537_s16, 4  ;;  %s4480_s9 = int_to_ptr.vmem [resolvable:$false] %s4479_s9 }
 0x232   : > { %v1935_v42 = vpop.f32.mrf.mxu1  ;;  %v3044_v12 = vadd.s32 4294967240, %v5263_v51  ;;  %v5290_v13 = vsub.s32 %v3009_v63, %v5269_v58  ;;  %s4481_s10 = scalar_lea.vmem %s4480_s9, 256  ;;  %p4482_p0 = scmp.lt.s32.totalorder %s5935_s22, %s4480_s9 }
 0x233   : > { %v2266_v18 = vmax.f32 %v1944_v14, 0.0  ;;  %v1936_v19 = vadd.f32 %v5001_v46, %v1935_v42  ;;  %2635 = vadd.xlane.f32.xlu0 %v2634_v16  ;;  %v2652_v26 = vsel %vm1465_vm1, %v2400_v17, 0.0  ;;  %v2398_v27 = vmul.f32 %v5013_v60, %v2263_v15  ;;  %p4483_p1 = scmp.lt.s32.totalorder %s4481_s10, %s4475_s30 }
 0x234   : > { %v4363_v20 = vpop.f32.mrf.mxu1  ;;  %v3023_v16 = vadd.s32 4294967264, %v5263_v51 }
 0x235   : > { %v2264_v22 = vmax.f32 %v1936_v19, 0.0  ;;  %v1957_v23 = vadd.f32 %v4363_v20, %v5001_v46  ;;  %2638 = vadd.xlane.f32.xlu1 %v2637_v21  ;;  %v2401_v24 = vmul.f32 %v5013_v60, %v2266_v18  ;;  %v2646_v35 = vsel %vm1465_vm1, %v2398_v27, 0.0  ;;  %p4484_p2 = por %p4483_p1, %p4482_p0 }
 0x236   : > { %v1948_v25 = vpop.f32.mrf.mxu1  ;;  %v3030_v21 = vadd.s32 4294967256, %v5263_v51  ;;  %v5321_v38 = vsub.s32 %v3023_v16, %v5269_v58 }
 0x237   : > { %v2269_v28 = vmax.f32 %v1957_v23, 0.0  ;;  %v1949_v29 = vadd.f32 %v5001_v46, %v1948_v25  ;;  %2653 = vadd.xlane.f32.xlu0 %v2652_v26  ;;  %v2655_v30 = vsel %vm1465_vm1, %v2401_v24, 0.0  ;;  %v2399_v31 = vmul.f32 %v5013_v60, %v2264_v22  ;;  %p4485_p3 = pnand %p4484_p2, %p4478_p13 }
 0x238   : > { %v4364_v37 = vpop.f32.mrf.mxu1  ;;  %v5300_v22 = vsub.s32 %v5263_v51, %v5269_v58  ;;  %v5303_v25 = vsub.s32 %v3016_v6, %v5269_v58  ;;  %v5306_v26 = vsub.s32 %v3002_v7, %v5269_v58 }
 0x239   : > { %v1960_v32 = vadd.f32 %v4364_v37, %v5001_v46  ;;  %2656 = vadd.xlane.f32.xlu1 %v2655_v30  ;;  %v2267_v33 = vmax.f32 %v1949_v29, 0.0  ;;  %v2404_v36 = vmul.f32 %v5013_v60, %v2269_v28  ;;  %v2649_v43 = vsel %vm1465_vm1, %v2399_v31, 0.0 }
 0x23a   : > { %v1951_v34 = vpop.f32.mrf.mxu1  ;;  %v5311_v29 = vsub.s32 %v3037_v8, %v5269_v58  ;;  %v5314_v30 = vsub.s32 %v3044_v12, %v5269_v58 }
 0x23b   : > { %v2270_v39 = vmax.f32 %v1960_v32, 0.0  ;;  %v1952_v40 = vadd.f32 %v5001_v46, %v1951_v34  ;;  %2647 = vadd.xlane.f32.xlu0 %v2646_v35  ;;  %v2664_v50 = vsel %vm1465_vm1, %v2404_v36, 0.0  ;;  %v2402_v46 = vmul.f32 %v5013_v60, %v2267_v33 }
 0x23c   : > { %v4367_v41 = vpop.f32.mrf.mxu1  ;;  %v3065_v34 = vadd.s32 4294967216, %v5263_v51 }
 0x23d   : > { %v2268_v44 = vmax.f32 %v1952_v40, 0.0  ;;  %v1973_v47 = vadd.f32 %v5257_v45, %v4367_v41  ;;  %2650 = vadd.xlane.f32.xlu1 %v2649_v43  ;;  %v2405_v48 = vmul.f32 %v5013_v60, %v2270_v39  ;;  %v2658_v62 = vsel %vm1465_vm1, %v2402_v46, 0.0 }
 0x23e   : > { %v1964_v49 = vpop.f32.mrf.mxu1  ;;  %v5324_v39 = vsub.s32 %v3030_v21, %v5269_v58  ;;  %v3093_v21 = vadd.s32 4294967184, %v5263_v51 }
 0x23f   : > { %v2273_v52 = vmax.f32 %v1973_v47, 0.0  ;;  %v1965_v53 = vadd.f32 %v5257_v45, %v1964_v49  ;;  %2665 = vadd.xlane.f32.xlu0 %v2664_v50  ;;  %v2667_v54 = vsel %vm1465_vm1, %v2405_v48, 0.0  ;;  %v2403_v56 = vmul.f32 %v5013_v60, %v2268_v44 }
 0x240   : > { %v4368_v55 = vpop.f32.mrf.mxu1  ;;  %v3072_v47 = vadd.s32 4294967208, %v5263_v51  ;;  %v3051_v48 = vadd.s32 4294967232, %v5263_v51 }
 0x241   : > { %v1976_v57 = vadd.f32 %v5257_v45, %v4368_v55  ;;  %2668 = vadd.xlane.f32.xlu1 %v2667_v54  ;;  %v2271_v59 = vmax.f32 %v1965_v53, 0.0  ;;  %v2408_v1 = vmul.f32 %v5276_v0, %v2273_v52  ;;  %v2661_v5 = vsel %vm1465_vm1, %v2403_v56, 0.0 }
 0x242   : > { %v1967_v61 = vpop.f32.mrf.mxu1  ;;  %v3058_v53 = vadd.s32 4294967224, %v5263_v51 }
 0x243   : > { %v2274_v2 = vmax.f32 %v1976_v57, 0.0  ;;  %v1968_v60 = vadd.f32 %v5257_v45, %v1967_v61  ;;  %2659 = vadd.xlane.f32.xlu0 %v2658_v62  ;;  %v2676_v15 = vsel %vm1465_vm1, %v2408_v1, 0.0  ;;  %v2406_v42 = vmul.f32 %v5276_v0, %v2271_v59 }
 0x244   : > { %v4371_v4 = vpop.f32.mrf.mxu1  ;;  %v5337_v59 = vsub.s32 %v3065_v34, %v5269_v58 }
 0x245   : > { %v2272_v9 = vmax.f32 %v1968_v60, 0.0  ;;  %v1989_v10 = vadd.f32 %v5257_v45, %v4371_v4  ;;  %2662 = vadd.xlane.f32.xlu1 %v2661_v5  ;;  %v2409_v11 = vmul.f32 %v5276_v0, %v2274_v2  ;;  %v2474_v18 = vpop.xlane.xlu1 %2473  ;;  %v2670_v32 = vsel %vm1465_vm1, %v2406_v42, 0.0 }
 0x246   : > { %v1980_v14 = vpop.f32.mrf.mxu1  ;;  %v2854_v61 = vadd.f32 %v5280_v3, %v2474_v18 }
 0x247   : > { %v2277_v17 = vmax.f32 %v1989_v10, 0.0  ;;  %v1981_v19 = vadd.f32 %v5257_v45, %v1980_v14  ;;  %2677 = vadd.xlane.f32.xlu0 %v2676_v15  ;;  %v2679_v20 = vsel %vm1465_vm1, %v2409_v11, 0.0  ;;  %v2407_v27 = vmul.f32 %v5276_v0, %v2272_v9 }
 0x248   : > { %v2468_v23 = vpop.xlane.xlu0 %2467  ;;  %v4372_v24 = vpop.f32.mrf.mxu1  ;;  %v5348_v9 = vsub.s32 %v3072_v47, %v5269_v58  ;;  %v5351_v10 = vsub.s32 %v3051_v48, %v5269_v58  ;;  %v5354_v11 = vsub.s32 %v3058_v53, %v5269_v58  ;;  %v3013_v18 = vrot.slane %v2854_v61, %v5290_v13 }
 0x249   : > { %v1992_v28 = vadd.f32 %v5257_v45, %v4372_v24  ;;  %2680 = vadd.xlane.f32.xlu1 %v2679_v20  ;;  %v2275_v37 = vmax.f32 %v1981_v19, 0.0  ;;  %v2412_v33 = vmul.f32 %v5276_v0, %v2277_v17  ;;  %v2852_v40 = vadd.f32 %v5280_v3, %v2468_v23 }
 0x24a   : > { %v1983_v31 = vpop.f32.mrf.mxu1  ;;  %v2673_v44 = vsel %vm1465_vm1, %v2407_v27, 0.0  ;;  %v2477_v49 = vpop.xlane.xlu1 %2476 }
 0x24b   : > { %v2278_v35 = vmax.f32 %v1992_v28, 0.0  ;;  %v1984_v36 = vadd.f32 %v5257_v45, %v1983_v31  ;;  %2671 = vadd.xlane.f32.xlu0 %v2670_v32  ;;  %v2688_v55 = vsel %vm1465_vm1, %v2412_v33, 0.0  ;;  %v2410_v57 = vmul.f32 %v5276_v0, %v2275_v37 }
 0x24c   : > { %v2471_v41 = vpop.xlane.xlu0 %2470  ;;  %v4375_v43 = vpop.f32.mrf.mxu1  ;;  %v3001_v2 = vrot.slane %v2852_v40, %v5300_v22  ;;  %v2855_v60 = vadd.f32 %v5280_v3, %v2477_v49  ;;  %v3100_v37 = vadd.s32 4294967176, %v5263_v51  ;;  %v3079_v31 = vadd.s32 4294967200, %v5263_v51 }
 0x24d   : > { %v2276_v50 = vmax.f32 %v1984_v36, 0.0  ;;  %v2853_v46 = vadd.f32 %v5280_v3, %v2471_v41  ;;  %v2005_v52 = vadd.f32 %v5257_v45, %v4375_v43  ;;  %2674 = vadd.xlane.f32.xlu1 %v2673_v44  ;;  %v2413_v56 = vmul.f32 %v5276_v0, %v2278_v35 }
 0x24e   : > { %v1996_v54 = vpop.f32.mrf.mxu1  ;;  %v2682_v16 = vsel %vm1465_vm1, %v2410_v57, 0.0  ;;  %v3020_v23 = vrot.slane %v2855_v60, %v5303_v25 }
 0x24f   : > { %v3006_v62 = vrot.slane %v2853_v46, %v5306_v26  ;;  %v2281_v63 = vmax.f32 %v2005_v52, 0.0  ;;  %v1997_v1 = vadd.f32 %v5257_v45, %v1996_v54  ;;  %2689 = vadd.xlane.f32.xlu0 %v2688_v55  ;;  %v2691_v6 = vsel %vm1465_vm1, %v2413_v56, 0.0 }
 0x250   : > { %v2486_v4 = vpop.xlane.xlu0 %2485  ;;  %v4376_v5 = vpop.f32.mrf.mxu1  ;;  %v2411_v7 = vmul.f32 %v5276_v0, %v2276_v50 }
 0x251   : > { %v2008_v8 = vadd.f32 %v5257_v45, %v4376_v5  ;;  %2692 = vadd.xlane.f32.xlu1 %v2691_v6  ;;  %v3008_v12 = vsel %vm3007_vm2, %v3006_v62, %v3001_v2  ;;  %v2279_v14 = vmax.f32 %v1997_v1, 0.0  ;;  %v2416_v17 = vmul.f32 %v5276_v0, %v2281_v63 }
 0x252   : > { %v2489_v15 = vpop.xlane.xlu1 %2488  ;;  %v1999_v42 = vpop.f32.mrf.mxu1  ;;  %v2685_v28 = vsel %vm1465_vm1, %v2411_v7, 0.0  ;;  %v3015_v32 = vsel %vm3014_vm3, %v3013_v18, %v3008_v12  ;;  %v2858_v36 = vadd.f32 %v5280_v3, %v2486_v4  ;;  %v5383_v63 = vsub.s32 %v3093_v21, %v5269_v58 }
 0x253   : > { %v2282_v19 = vmax.f32 %v2008_v8, 0.0  ;;  %v2000_v20 = vadd.f32 %v5257_v45, %v1999_v42  ;;  %2683 = vadd.xlane.f32.xlu0 %v2682_v16  ;;  %v2700_v43 = vsel %vm1465_vm1, %v2416_v17, 0.0  ;;  %v2414_v47 = vmul.f32 %v5276_v0, %v2279_v14 }
 0x254   : > { %v2480_v24 = vpop.xlane.xlu0 %2479  ;;  %v4379_v27 = vpop.f32.mrf.mxu1  ;;  %v2859_v52 = vadd.f32 %v5280_v3, %v2489_v15  ;;  %v3022_v53 = vsel %vm3021_vm4, %v3020_v23, %v3015_v32  ;;  %v5386_v1 = vsub.s32 %v3100_v37, %v5269_v58  ;;  %v3041_v8 = vrot.slane %v2858_v36, %v5311_v29 }
 0x255   : > { %v2280_v33 = vmax.f32 %v2000_v20, 0.0  ;;  %v2856_v34 = vadd.f32 %v5280_v3, %v2480_v24  ;;  %v2021_v35 = vadd.f32 %v5257_v45, %v4379_v27  ;;  %2686 = vadd.xlane.f32.xlu1 %v2685_v28  ;;  %v2417_v44 = vmul.f32 %v5276_v0, %v2282_v19 }
 0x256   : > { %v2483_v40 = vpop.xlane.xlu1 %2482  ;;  %v2012_v41 = vpop.f32.mrf.mxu1  ;;  %v2694_v6 = vsel %vm1465_vm1, %v2414_v47, 0.0  ;;  %v5395_v15 = vsub.s32 %v3079_v31, %v5269_v58  ;;  %v3048_v42 = vrot.slane %v2859_v52, %v5314_v30  ;;  %v3086_v20 = vadd.s32 4294967192, %v5263_v51 }
 0x257   : > { %v3027_v48 = vrot.slane %v2856_v34, %v5321_v38  ;;  %v2285_v49 = vmax.f32 %v2021_v35, 0.0  ;;  %v2857_v50 = vadd.f32 %v5280_v3, %v2483_v40  ;;  %v2013_v46 = vadd.f32 %v5257_v45, %v2012_v41  ;;  %2701 = vadd.xlane.f32.xlu0 %v2700_v43 }
 0x258   : > { %v2498_v54 = vpop.xlane.xlu0 %2497  ;;  %v4380_v55 = vpop.f32.mrf.mxu1  ;;  %v2703_v56 = vsel %vm1465_vm1, %v2417_v44, 0.0  ;;  %v2415_v57 = vmul.f32 %v5276_v0, %v2280_v33 }
 0x259   : > { %v3029_v61 = vsel %vm3028_vm5, %v3027_v48, %v3022_v53  ;;  %v3034_v62 = vrot.slane %v2857_v50, %v5324_v39  ;;  %2704 = vadd.xlane.f32.xlu1 %v2703_v56  ;;  %v2283_v2 = vmax.f32 %v2013_v46, 0.0  ;;  %v2024_v60 = vadd.f32 %v5257_v45, %v4380_v55 }
 0x25a   : > { %v2501_v4 = vpop.xlane.xlu1 %2500  ;;  %v2015_v5 = vpop.f32.mrf.mxu1  ;;  %v2420_v7 = vmul.f32 %v5276_v0, %v2285_v49  ;;  %v2697_v19 = vsel %vm1465_vm1, %v2415_v57, 0.0  ;;  %v2862_v23 = vadd.f32 %v5280_v3, %v2498_v54 }
 0x25b   : > { %v3036_v12 = vsel %vm3035_vm6, %v3034_v62, %v3029_v61  ;;  %v2016_v14 = vadd.f32 %v5257_v45, %v2015_v5  ;;  %2695 = vadd.xlane.f32.xlu0 %v2694_v6  ;;  %v2286_v16 = vmax.f32 %v2024_v60, 0.0  ;;  %v2418_v34 = vmul.f32 %v5276_v0, %v2283_v2 }
 0x25c   : > { %v2492_v17 = vpop.xlane.xlu0 %2491  ;;  %v4383_v18 = vpop.f32.mrf.mxu1  ;;  %v3043_v21 = vsel %vm3042_vm7, %v3041_v8, %v3036_v12  ;;  %v2712_v32 = vsel %vm1465_vm1, %v2420_v7, 0.0  ;;  %v2863_v51 = vadd.f32 %v5280_v3, %v2501_v4  ;;  %v3069_v61 = vrot.slane %v2862_v23, %v5337_v59 }
 0x25d   : > { %v2284_v24 = vmax.f32 %v2016_v14, 0.0  ;;  %v2860_v27 = vadd.f32 %v5280_v3, %v2492_v17  ;;  %2698 = vadd.xlane.f32.xlu1 %v2697_v19  ;;  %v2037_v28 = vadd.f32 %v5257_v45, %v4383_v18  ;;  %v2421_v33 = vmul.f32 %v5276_v0, %v2286_v16 }
 0x25e   : > { %v2495_v37 = vpop.xlane.xlu1 %2494  ;;  %v2028_v31 = vpop.f32.mrf.mxu1  ;;  %v3050_v41 = vsel %vm3049_vm8, %v3048_v42, %v3043_v21  ;;  %v2706_v56 = vsel %vm1465_vm1, %v2418_v34, 0.0  ;;  %v3076_v60 = vrot.slane %v2863_v51, %v5348_v9  ;;  %v5425_v8 = vsub.s32 %v3086_v20, %v5269_v58 }
 0x25f   : > { %v3055_v35 = vrot.slane %v2860_v27, %v5351_v10  ;;  %v2861_v36 = vadd.f32 %v5280_v3, %v2495_v37  ;;  %v2029_v40 = vadd.f32 %v5257_v45, %v2028_v31  ;;  %2713 = vadd.xlane.f32.xlu0 %v2712_v32  ;;  %v2289_v43 = vmax.f32 %v2037_v28, 0.0 }
 0x260   : > { %v2510_v44 = vpop.xlane.xlu0 %2509  ;;  %v4384_v47 = vpop.f32.mrf.mxu1  ;;  %v2715_v48 = vsel %vm1465_vm1, %v2421_v33, 0.0  ;;  %v2419_v49 = vmul.f32 %v5276_v0, %v2284_v24 }
 0x261   : > { %v3057_v50 = vsel %vm3056_vm9, %v3055_v35, %v3050_v41  ;;  %v3062_v46 = vrot.slane %v2861_v36, %v5354_v11  ;;  %2716 = vadd.xlane.f32.xlu1 %v2715_v48  ;;  %v2287_v52 = vmax.f32 %v2029_v40, 0.0  ;;  %v2040_v53 = vadd.f32 %v5257_v45, %v4384_v47 }
 0x262   : > { %v2513_v54 = vpop.xlane.xlu1 %2512  ;;  %v2031_v55 = vpop.f32.mrf.mxu1  ;;  %v2424_v57 = vmul.f32 %v5276_v0, %v2289_v43  ;;  %v2709_v7 = vsel %vm1465_vm1, %v2419_v49, 0.0  ;;  %v2866_v14 = vadd.f32 %v5280_v3, %v2510_v44 }
 0x263   : > { %v3064_v62 = vsel %vm3063_vm10, %v3062_v46, %v3057_v50  ;;  %v2032_v2 = vadd.f32 %v5257_v45, %v2031_v55  ;;  %2707 = vadd.xlane.f32.xlu0 %v2706_v56  ;;  %v2290_v4 = vmax.f32 %v2040_v53, 0.0  ;;  %v2422_v58 = vmul.f32 %v5276_v0, %v2287_v52 }
 0x264   : > { %v2504_v5 = vpop.xlane.xlu0 %2503  ;;  %v4387_v6 = vpop.f32.mrf.mxu1  ;;  %v3071_v12 = vsel %vm3070_vm11, %v3069_v61, %v3064_v62  ;;  %v2724_v21 = vsel %vm1465_vm1, %v2424_v57, 0.0  ;;  %v2867_v20 = vadd.f32 %v5280_v3, %v2513_v54  ;;  %v3097_v35 = vrot.slane %v2866_v14, %v5383_v63 }
 0x265   : > { %v2288_v42 = vmax.f32 %v2032_v2, 0.0  ;;  %v2864_v16 = vadd.f32 %v5280_v3, %v2504_v5  ;;  %2710 = vadd.xlane.f32.xlu1 %v2709_v7  ;;  %v2053_v17 = vadd.f32 %v5257_v45, %v4387_v6  ;;  %v2425_v23 = vmul.f32 %v5276_v0, %v2290_v4 }
 0x266   : > { %v2507_v18 = vpop.xlane.xlu1 %2506  ;;  %v2044_v19 = vpop.f32.mrf.mxu1  ;;  %v3078_v37 = vsel %vm3077_vm12, %v3076_v60, %v3071_v12  ;;  %v2718_v48 = vsel %vm1465_vm1, %v2422_v58, 0.0  ;;  %v3104_v50 = vrot.slane %v2867_v20, %v5386_v1 }
 0x267   : > { %v3083_v24 = vrot.slane %v2864_v16, %v5395_v15  ;;  %v2865_v27 = vadd.f32 %v5280_v3, %v2507_v18  ;;  %v2045_v28 = vadd.f32 %v5257_v45, %v2044_v19  ;;  %2725 = vadd.xlane.f32.xlu0 %v2724_v21  ;;  %v2293_v31 = vmax.f32 %v2053_v17, 0.0 }
 0x268   : > { %v2522_v32 = vpop.xlane.xlu0 %2521  ;;  %v4388_v33 = vpop.f32.mrf.mxu1  ;;  %v2727_v34 = vsel %vm1465_vm1, %v2425_v23, 0.0  ;;  %v2423_v51 = vmul.f32 %v5276_v0, %v2288_v42 }
 0x269   : > { %v3085_v36 = vsel %vm3084_vm13, %v3083_v24, %v3078_v37  ;;  %v3090_v40 = vrot.slane %v2865_v27, %v5425_v8  ;;  %2728 = vadd.xlane.f32.xlu1 %v2727_v34  ;;  %v2291_v41 = vmax.f32 %v2045_v28, 0.0  ;;  %v2056_v43 = vadd.f32 %v5257_v45, %v4388_v33 }
 0x26a   : > { %v2525_v44 = vpop.xlane.xlu1 %2524  ;;  %v2047_v47 = vpop.f32.mrf.mxu1  ;;  %v2428_v49 = vmul.f32 %v5276_v0, %v2293_v31  ;;  %v2721_v57 = vsel %vm1465_vm1, %v2423_v51, 0.0  ;;  %v2870_v14 = vadd.f32 %v5280_v3, %v2522_v32 }
 0x26b   : > { %v3092_v46 = vsel %vm3091_vm14, %v3090_v40, %v3085_v36  ;;  %v2048_v52 = vadd.f32 %v5257_v45, %v2047_v47  ;;  %2719 = vadd.xlane.f32.xlu0 %v2718_v48  ;;  %v2294_v54 = vmax.f32 %v2056_v43, 0.0  ;;  %v2426_v12 = vmul.f32 %v5276_v0, %v2291_v41 }
 0x26c   : > { %v3099_v53 = vsel %vm3098_vm15, %v3097_v35, %v3092_v46  ;;  %v2516_v55 = vpop.xlane.xlu0 %2515  ;;  %v4391_v56 = vpop.f32.mrf.mxu1  ;;  %v2736_v6 = vsel %vm1465_vm1, %v2428_v49, 0.0  ;;  %v2871_v17 = vadd.f32 %v5280_v3, %v2525_v44  ;;  %v3137_v34 = vrot.slane %v2870_v14, %v5290_v13 }
 0x26d   : > { %v3106_v61 = vsel %vm3105_vm0, %v3104_v50, %v3099_v53  ;;  %v2292_v62 = vmax.f32 %v2048_v52, 0.0  ;;  %v2868_v2 = vadd.f32 %v5280_v3, %v2516_v55  ;;  %2722 = vadd.xlane.f32.xlu1 %v2721_v57  ;;  %v2069_v60 = vadd.f32 %v5257_v45, %v4391_v56 }
 0x26e   : > { %3107 = vst [vmem:[%s5457_s17] ss:$8 sm:$0x1] %v3106_v61  ;;  %v2519_v4 = vpop.xlane.xlu1 %2518  ;;  %v2060_v5 = vpop.f32.mrf.mxu1  ;;  %v2429_v7 = vmul.f32 %v5276_v0, %v2294_v54  ;;  %v2730_v32 = vsel %vm1465_vm1, %v2426_v12, 0.0  ;;  %v3142_v36 = vrot.slane %v2871_v17, %v5303_v25 }
 0x26f   : > { %v2869_v42 = vadd.f32 %v5280_v3, %v2519_v4  ;;  %v2061_v16 = vadd.f32 %v5257_v45, %v2060_v5  ;;  %2737 = vadd.xlane.f32.xlu0 %v2736_v6  ;;  %v2297_v18 = vmax.f32 %v2069_v60, 0.0  ;;  %v2427_v58 = vmul.f32 %v5276_v0, %v2292_v62 }
 0x270   : > { %v2534_v19 = vpop.xlane.xlu0 %2533  ;;  %v4392_v21 = vpop.f32.mrf.mxu1  ;;  %v2739_v23 = vsel %vm1465_vm1, %v2429_v7, 0.0  ;;  %v3128_v20 = vrot.slane %v2868_v2, %v5300_v22 }
 0x271   : > { %v3132_v24 = vrot.slane %v2869_v42, %v5306_v26  ;;  %v2072_v27 = vadd.f32 %v5257_v45, %v4392_v21  ;;  %2740 = vadd.xlane.f32.xlu1 %v2739_v23  ;;  %v2295_v28 = vmax.f32 %v2061_v16, 0.0  ;;  %v2432_v33 = vmul.f32 %v5276_v0, %v2297_v18 }
 0x272   : > { %v2537_v37 = vpop.xlane.xlu1 %2536  ;;  %v2063_v31 = vpop.f32.mrf.mxu1  ;;  %v2733_v44 = vsel %vm1465_vm1, %v2427_v58, 0.0  ;;  %v2874_v48 = vadd.f32 %v5280_v3, %v2534_v19 }
 0x273   : > { %v3133_v51 = vsel %vm3007_vm2, %v3132_v24, %v3128_v20  ;;  %v2298_v35 = vmax.f32 %v2072_v27, 0.0  ;;  %2731 = vadd.xlane.f32.xlu0 %v2730_v32  ;;  %v2064_v40 = vadd.f32 %v5257_v45, %v2063_v31  ;;  %v2748_v54 = vsel %vm1465_vm1, %v2432_v33, 0.0 }
 0x274   : > { %v2528_v41 = vpop.xlane.xlu0 %2527  ;;  %v4395_v43 = vpop.f32.mrf.mxu1  ;;  %v3138_v47 = vsel %vm3014_vm3, %v3137_v34, %v3133_v51  ;;  %v2430_v56 = vmul.f32 %v5276_v0, %v2295_v28  ;;  %v2875_v12 = vadd.f32 %v5280_v3, %v2537_v37  ;;  %v3157_v23 = vrot.slane %v2874_v48, %v5311_v29 }
 0x275   : > { %v2872_v49 = vadd.f32 %v5280_v3, %v2528_v41  ;;  %v2085_v50 = vadd.f32 %v5257_v45, %v4395_v43  ;;  %2734 = vadd.xlane.f32.xlu1 %v2733_v44  ;;  %v2296_v46 = vmax.f32 %v2064_v40, 0.0  ;;  %v2433_v55 = vmul.f32 %v5276_v0, %v2298_v35 }
 0x276   : > { %v2531_v52 = vpop.xlane.xlu1 %2530  ;;  %v2076_v53 = vpop.f32.mrf.mxu1  ;;  %v3143_v60 = vsel %vm3021_vm4, %v3142_v36, %v3138_v47  ;;  %v2742_v21 = vsel %vm1465_vm1, %v2430_v56, 0.0  ;;  %v3162_v32 = vrot.slane %v2875_v12, %v5314_v30 }
 0x277   : > { %v3147_v57 = vrot.slane %v2872_v49, %v5321_v38  ;;  %v2301_v61 = vmax.f32 %v2085_v50, 0.0  ;;  %v2873_v62 = vadd.f32 %v5280_v3, %v2531_v52  ;;  %v2077_v2 = vadd.f32 %v5257_v45, %v2076_v53  ;;  %2749 = vadd.xlane.f32.xlu0 %v2748_v54 }
 0x278   : > { %v2546_v4 = vpop.xlane.xlu0 %2545  ;;  %v4396_v5 = vpop.f32.mrf.mxu1  ;;  %v2751_v6 = vsel %vm1465_vm1, %v2433_v55, 0.0  ;;  %v2431_v7 = vmul.f32 %v5276_v0, %v2296_v46 }
 0x279   : > { %v3148_v14 = vsel %vm3028_vm5, %v3147_v57, %v3143_v60  ;;  %v3152_v42 = vrot.slane %v2873_v62, %v5324_v39  ;;  %2752 = vadd.xlane.f32.xlu1 %v2751_v6  ;;  %v2299_v16 = vmax.f32 %v2077_v2, 0.0  ;;  %v2088_v17 = vadd.f32 %v5257_v45, %v4396_v5 }
 0x27a   : > { %v2549_v18 = vpop.xlane.xlu1 %2548  ;;  %v2079_v19 = vpop.f32.mrf.mxu1  ;;  %v2436_v20 = vmul.f32 %v5276_v0, %v2301_v61  ;;  %v2745_v31 = vsel %vm1465_vm1, %v2431_v7, 0.0  ;;  %v2878_v36 = vadd.f32 %v5280_v3, %v2546_v4 }
 0x27b   : > { %v3153_v58 = vsel %vm3035_vm6, %v3152_v42, %v3148_v14  ;;  %2743 = vadd.xlane.f32.xlu0 %v2742_v21  ;;  %v2302_v24 = vmax.f32 %v2088_v17, 0.0  ;;  %v2080_v27 = vadd.f32 %v5257_v45, %v2079_v19  ;;  %v2434_v35 = vmul.f32 %v5276_v0, %v2299_v16 }
 0x27c   : > { %v2540_v28 = vpop.xlane.xlu0 %2539  ;;  %v4399_v37 = vpop.f32.mrf.mxu1  ;;  %v3158_v33 = vsel %vm3042_vm7, %v3157_v23, %v3153_v58  ;;  %v2760_v50 = vsel %vm1465_vm1, %v2436_v20, 0.0  ;;  %v2879_v57 = vadd.f32 %v5280_v3, %v2549_v18  ;;  %v3177_v6 = vrot.slane %v2878_v36, %v5337_v59 }
 0x27d   : > { %v2876_v34 = vadd.f32 %v5280_v3, %v2540_v28  ;;  %v2101_v51 = vadd.f32 %v5257_v45, %v4399_v37  ;;  %2746 = vadd.xlane.f32.xlu1 %v2745_v31  ;;  %v2300_v40 = vmax.f32 %v2080_v27, 0.0  ;;  %v2437_v44 = vmul.f32 %v5276_v0, %v2302_v24 }
 0x27e   : > { %v2543_v41 = vpop.xlane.xlu1 %2542  ;;  %v2092_v43 = vpop.f32.mrf.mxu1  ;;  %v3163_v52 = vsel %vm3049_vm8, %v3162_v32, %v3158_v33  ;;  %v2754_v18 = vsel %vm1465_vm1, %v2434_v35, 0.0  ;;  %v3182_v21 = vrot.slane %v2879_v57, %v5348_v9 }
 0x27f   : > { %v3167_v47 = vrot.slane %v2876_v34, %v5351_v10  ;;  %v2877_v48 = vadd.f32 %v5280_v3, %v2543_v41  ;;  %v2093_v49 = vadd.f32 %v5257_v45, %v2092_v43  ;;  %v2435_v46 = vmul.f32 %v5276_v0, %v2300_v40 }
 0x280   : > { %v2305_v53 = vmax.f32 %v2101_v51, 0.0  ;;  %v2558_v54 = vpop.xlane.xlu0 %2557  ;;  %v4400_v55 = vpop.f32.mrf.mxu1  ;;  %v2763_v56 = vsel %vm1465_vm1, %v2437_v44, 0.0 }
 0x281   : > { %v3168_v61 = vsel %vm3056_vm9, %v3167_v47, %v3163_v52  ;;  %v3172_v62 = vrot.slane %v2877_v48, %v5354_v11  ;;  %2761 = vadd.xlane.f32.xlu1 %v2760_v50  ;;  %2764 = vadd.xlane.f32.xlu0 %v2763_v56  ;;  %v2303_v2 = vmax.f32 %v2093_v49, 0.0  ;;  %v2104_v60 = vadd.f32 %v5257_v45, %v4400_v55 }
 0x282   : > { %v2561_v4 = vpop.xlane.xlu1 %2560  ;;  %v2095_v5 = vpop.f32.mrf.mxu1  ;;  %v2440_v14 = vmul.f32 %v5276_v0, %v2305_v53  ;;  %v2757_v19 = vsel %vm1465_vm1, %v2435_v46, 0.0  ;;  %v2882_v27 = vadd.f32 %v5280_v3, %v2558_v54 }
 0x283   : > { %v3173_v7 = vsel %vm3063_vm10, %v3172_v62, %v3168_v61  ;;  %v2096_v12 = vadd.f32 %v5257_v45, %v2095_v5  ;;  %v2306_v42 = vmax.f32 %v2104_v60, 0.0  ;;  %v2438_v24 = vmul.f32 %v5276_v0, %v2303_v2 }
 0x284   : > { %v2552_v16 = vpop.xlane.xlu0 %2551  ;;  %v4403_v17 = vpop.f32.mrf.mxu1  ;;  %v3178_v23 = vsel %vm3070_vm11, %v3177_v6, %v3173_v7  ;;  %v2883_v33 = vadd.f32 %v5280_v3, %v2561_v4  ;;  %v2772_v44 = vsel %vm1465_vm1, %v2440_v14, 0.0  ;;  %v3197_v46 = vrot.slane %v2882_v27, %v5383_v63 }
 0x285   : > { %v2304_v58 = vmax.f32 %v2096_v12, 0.0  ;;  %v2880_v20 = vadd.f32 %v5280_v3, %v2552_v16  ;;  %2755 = vadd.xlane.f32.xlu1 %v2754_v18  ;;  %2758 = vadd.xlane.f32.xlu0 %v2757_v19  ;;  %v2441_v28 = vmul.f32 %v5276_v0, %v2306_v42  ;;  %v2117_v37 = vadd.f32 %v5257_v45, %v4403_v17 }
 0x286   : > { %v2555_v31 = vpop.xlane.xlu1 %2554  ;;  %v2108_v32 = vpop.f32.mrf.mxu1  ;;  %v3183_v36 = vsel %vm3077_vm12, %v3182_v21, %v3178_v23  ;;  %v3202_v55 = vrot.slane %v2883_v33, %v5386_v1  ;;  %v2766_v61 = vsel %vm1465_vm1, %v2438_v24, 0.0 }
 0x287   : > { %v3187_v34 = vrot.slane %v2880_v20, %v5395_v15  ;;  %v2881_v51 = vadd.f32 %v5280_v3, %v2555_v31  ;;  %v2109_v35 = vadd.f32 %v5257_v45, %v2108_v32  ;;  %v2309_v40 = vmax.f32 %v2117_v37, 0.0 }
 0x288   : > { %v2570_v41 = vpop.xlane.xlu0 %2569  ;;  %v4404_v43 = vpop.f32.mrf.mxu1  ;;  %v2775_v47 = vsel %vm1465_vm1, %v2441_v28, 0.0  ;;  %v2439_v48 = vmul.f32 %v5276_v0, %v2304_v58 }
 0x289   : > { %v3188_v49 = vsel %vm3084_vm13, %v3187_v34, %v3183_v36  ;;  %v3192_v50 = vrot.slane %v2881_v51, %v5425_v8  ;;  %2773 = vadd.xlane.f32.xlu1 %v2772_v44  ;;  %2776 = vadd.xlane.f32.xlu0 %v2775_v47  ;;  %v2120_v52 = vadd.f32 %v5257_v45, %v4404_v43  ;;  %v2307_v57 = vmax.f32 %v2109_v35, 0.0 }
 0x28a   : > { %v2573_v53 = vpop.xlane.xlu1 %2572  ;;  %v2111_v54 = vpop.f32.mrf.mxu1  ;;  %v2444_v62 = vmul.f32 %v5276_v0, %v2309_v40  ;;  %v2769_v42 = vsel %vm1465_vm1, %v2439_v48, 0.0  ;;  %v2886_v23 = vadd.f32 %v5280_v3, %v2570_v41 }
 0x28b   : > { %v3193_v56 = vsel %vm3091_vm14, %v3192_v50, %v3188_v49  ;;  %v2310_v60 = vmax.f32 %v2120_v52, 0.0  ;;  %v2112_v4 = vadd.f32 %v5257_v45, %v2111_v54  ;;  %v2442_v21 = vmul.f32 %v5276_v0, %v2307_v57 }
 0x28c   : > { %v3198_v2 = vsel %vm3098_vm15, %v3197_v46, %v3193_v56  ;;  %v2564_v5 = vpop.xlane.xlu0 %2563  ;;  %v4407_v6 = vpop.f32.mrf.mxu1  ;;  %v2784_v37 = vsel %vm1465_vm1, %v2444_v62, 0.0  ;;  %v2887_v51 = vadd.f32 %v5280_v3, %v2573_v53  ;;  %v3235_v40 = vrot.slane %v2886_v23, %v5290_v13 }
 0x28d   : > { %v3203_v7 = vsel %vm3105_vm0, %v3202_v55, %v3198_v2  ;;  %v2884_v12 = vadd.f32 %v5280_v3, %v2564_v5  ;;  %v2133_v14 = vadd.f32 %v5257_v45, %v4407_v6  ;;  %2767 = vadd.xlane.f32.xlu1 %v2766_v61  ;;  %v2445_v16 = vmul.f32 %v5276_v0, %v2310_v60 }
 0x28e   : > { %4012 = vst [vmem:[%s5457_s17 + $0x1] ss:$8 sm:$0x1] %v3203_v7  ;;  %v2308_v17 = vmax.f32 %v2112_v4, 0.0  ;;  %2770 = vadd.xlane.f32.xlu0 %v2769_v42  ;;  %v2567_v18 = vpop.xlane.xlu1 %2566  ;;  %v2124_v19 = vpop.f32.mrf.mxu1  ;;  %v2778_v50 = vsel %vm1465_vm1, %v2442_v21, 0.0  ;;  %v3240_v55 = vrot.slane %v2887_v51, %v5303_v25 }
 0x28f   : > { %v2885_v58 = vadd.f32 %v5280_v3, %v2567_v18  ;;  %v2313_v20 = vmax.f32 %v2133_v14, 0.0  ;;  %v2125_v24 = vadd.f32 %v5257_v45, %v2124_v19  ;;  %v2787_v31 = vsel %vm1465_vm1, %v2445_v16, 0.0 }
 0x290   : > { %v2582_v27 = vpop.xlane.xlu0 %2581  ;;  %v5562_v28 = vpop.f32.mrf.mxu1  ;;  %v2443_v32 = vmul.f32 %v5276_v0, %v2308_v17  ;;  %v3226_v33 = vrot.slane %v2884_v12, %v5300_v22 }
 0x291   : > { %v3230_v34 = vrot.slane %v2885_v58, %v5306_v26  ;;  %2785 = vadd.xlane.f32.xlu1 %v2784_v37  ;;  %v2448_v43 = vmul.f32 %v5276_v0, %v2313_v20  ;;  %v2311_v44 = vmax.f32 %v2125_v24, 0.0  ;;  %v2890_v56 = vadd.f32 %v5280_v3, %v2582_v27 }
 0x292   : > { %2788 = vadd.xlane.f32.xlu0 %v2787_v31  ;;  %v2585_v35 = vpop.xlane.xlu1 %2584  ;;  %v2127_v36 = vpop.f32.mrf.mxu1  ;;  %v2781_v54 = vsel %vm1465_vm1, %v2443_v32, 0.0 }
 0x293   : > { %v3231_v41 = vsel %vm3007_vm2, %v3230_v34, %v3226_v33  ;;  %v2128_v47 = vadd.f32 %v5257_v45, %v2127_v36  ;;  %v2446_v6 = vmul.f32 %v5276_v0, %v2311_v44  ;;  %v2796_v16 = vsel %vm1465_vm1, %v2448_v43, 0.0 }
 0x294   : > { %v2576_v48 = vpop.xlane.xlu0 %2575  ;;  %v4411_v49 = vpop.f32.mrf.mxu1  ;;  %v3236_v46 = vsel %vm3014_vm3, %v3235_v40, %v3231_v41  ;;  %v2891_v17 = vadd.f32 %v5280_v3, %v2585_v35  ;;  %v3255_v37 = vrot.slane %v2890_v56, %v5311_v29 }
 0x295   : > { %v2888_v52 = vadd.f32 %v5280_v3, %v2576_v48  ;;  %v2149_v53 = vadd.f32 %v5257_v45, %v4411_v49  ;;  %2779 = vadd.xlane.f32.xlu1 %v2778_v50  ;;  %v2312_v57 = vmax.f32 %v2128_v47, 0.0  ;;  %v3241_v12 = vsel %vm3021_vm4, %v3240_v55, %v3236_v46 }
 0x296   : > { %2782 = vadd.xlane.f32.xlu0 %v2781_v54  ;;  %v2579_v61 = vpop.xlane.xlu1 %2578  ;;  %v2140_v62 = vpop.f32.mrf.mxu1  ;;  %v2790_v36 = vsel %vm1465_vm1, %v2446_v6, 0.0  ;;  %v3260_v40 = vrot.slane %v2891_v17, %v5314_v30 }
 0x297   : > { %v3245_v2 = vrot.slane %v2888_v52, %v5321_v38  ;;  %v2317_v60 = vmax.f32 %v2149_v53, 0.0  ;;  %v2889_v4 = vadd.f32 %v5280_v3, %v2579_v61  ;;  %v2141_v5 = vadd.f32 %v5257_v45, %v2140_v62 }
 0x298   : > { %v2447_v7 = vmul.f32 %v5276_v0, %v2312_v57  ;;  %v2594_v14 = vpop.xlane.xlu0 %2593  ;;  %v4412_v42 = vpop.f32.mrf.mxu1 }
 0x299   : > { %v3246_v18 = vsel %vm3028_vm5, %v3245_v2, %v3241_v12  ;;  %v3250_v19 = vrot.slane %v2889_v4, %v5324_v39  ;;  %v2315_v21 = vmax.f32 %v2141_v5, 0.0  ;;  %2797 = vadd.xlane.f32.xlu1 %v2796_v16  ;;  %v2452_v23 = vmul.f32 %v5276_v0, %v2317_v60 }
 0x29a   : > { %v2152_v58 = vadd.f32 %v5257_v45, %v4412_v42  ;;  %v2597_v20 = vpop.xlane.xlu1 %2596  ;;  %v2143_v24 = vpop.f32.mrf.mxu1  ;;  %v2793_v27 = vsel %vm1465_vm1, %v2447_v7, 0.0  ;;  %v2894_v47 = vadd.f32 %v5280_v3, %v2594_v14 }
 0x29b   : > { %v3251_v31 = vsel %vm3035_vm6, %v3250_v19, %v3246_v18  ;;  %v2144_v32 = vadd.f32 %v5257_v45, %v2143_v24  ;;  %2794 = vadd.xlane.f32.xlu0 %v2793_v27  ;;  %v2450_v33 = vmul.f32 %v5276_v0, %v2315_v21  ;;  %v2895_v48 = vadd.f32 %v5280_v3, %v2597_v20 }
 0x29c   : > { %v2318_v34 = vmax.f32 %v2152_v58, 0.0  ;;  %v2588_v51 = vpop.xlane.xlu0 %2587  ;;  %v4415_v35 = vpop.f32.mrf.mxu1  ;;  %v3256_v41 = vsel %vm3042_vm7, %v3255_v37, %v3251_v31  ;;  %v2808_v52 = vsel %vm1465_vm1, %v2452_v23, 0.0  ;;  %v3275_v18 = vrot.slane %v2894_v47, %v5337_v59  ;;  %v5633_v31 = vld [vmem:[%s5985_s5] ss:$0 sm:$0xff] }
 0x29d   : > { %v2316_v43 = vmax.f32 %v2144_v32, 0.0  ;;  %v2892_v44 = vadd.f32 %v5280_v3, %v2588_v51  ;;  %2791 = vadd.xlane.f32.xlu1 %v2790_v36  ;;  %v2165_v49 = vadd.f32 %v5257_v45, %v4415_v35  ;;  %v3261_v61 = vsel %vm3049_vm8, %v3260_v40, %v3256_v41 }
 0x29e   : > { %v2591_v50 = vpop.xlane.xlu1 %2590  ;;  %v2156_v46 = vpop.f32.mrf.mxu1  ;;  %v2453_v57 = vmul.f32 %v5276_v0, %v2318_v34  ;;  %v2802_v4 = vsel %vm1465_vm1, %v2450_v33, 0.0  ;;  %v3280_v19 = vrot.slane %v2895_v48, %v5348_v9 }
 0x29f   : > { %v2451_v53 = vmul.f32 %v5276_v0, %v2316_v43  ;;  %v3265_v54 = vrot.slane %v2892_v44, %v5351_v10  ;;  %v2893_v55 = vadd.f32 %v5280_v3, %v2591_v50  ;;  %v2157_v56 = vadd.f32 %v5257_v45, %v2156_v46  ;;  %2809 = vadd.xlane.f32.xlu0 %v2808_v52  ;;  %v5619_v45 = vld [vmem:[%s5984_s4] ss:$0 sm:$0xff] }
 0x2a0   : > { %v2321_v62 = vmax.f32 %v2165_v49, 0.0  ;;  %v2606_v2 = vpop.xlane.xlu0 %2605  ;;  %v4416_v60 = vpop.f32.mrf.mxu1  ;;  %v2811_v27 = vsel %vm1465_vm1, %v2453_v57, 0.0 }
 0x2a1   : > { %v3266_v5 = vsel %vm3056_vm9, %v3265_v54, %v3261_v61  ;;  %v3270_v6 = vrot.slane %v2893_v55, %v5354_v11  ;;  %v2319_v7 = vmax.f32 %v2157_v56, 0.0  ;;  %2803 = vadd.xlane.f32.xlu1 %v2802_v4  ;;  %v2168_v14 = vadd.f32 %v5619_v45, %v4416_v60 }
 0x2a2   : > { %v2456_v12 = vmul.f32 %v5276_v0, %v2321_v62  ;;  %v2609_v42 = vpop.xlane.xlu1 %2608  ;;  %v2159_v16 = vpop.f32.mrf.mxu1  ;;  %v2805_v17 = vsel %vm1465_vm1, %v2451_v53, 0.0  ;;  %v2898_v0 = vadd.f32 %v5280_v3, %v2606_v2 }
 0x2a3   : > { %v3271_v21 = vsel %vm3063_vm10, %v3270_v6, %v3266_v5  ;;  %2806 = vadd.xlane.f32.xlu0 %v2805_v17  ;;  %v2322_v23 = vmax.f32 %v2168_v14, 0.0  ;;  %v2160_v58 = vadd.f32 %v5619_v45, %v2159_v16  ;;  %v2454_v32 = vmul.f32 %v5633_v31, %v2319_v7 }
 0x2a4   : > { %v2600_v20 = vpop.xlane.xlu0 %2599  ;;  %v4419_v24 = vpop.f32.mrf.mxu1  ;;  %v3276_v37 = vsel %vm3070_vm11, %v3275_v18, %v3271_v21  ;;  %v2899_v35 = vadd.f32 %v5280_v3, %v2609_v42  ;;  %v2820_v43 = vsel %vm1465_vm1, %v2456_v12, 0.0  ;;  %v3295_v55 = vrot.slane %v2898_v0, %v5383_v63 }
 0x2a5   : > { %v2896_v33 = vadd.f32 %v5280_v3, %v2600_v20  ;;  %v2181_v34 = vadd.f32 %v5619_v45, %v4419_v24  ;;  %2812 = vadd.xlane.f32.xlu1 %v2811_v27  ;;  %v2457_v51 = vmul.f32 %v5633_v31, %v2322_v23  ;;  %v2320_v36 = vmax.f32 %v2160_v58, 0.0 }
 0x2a6   : > { %v2603_v40 = vpop.xlane.xlu1 %2602  ;;  %v2172_v41 = vpop.f32.mrf.mxu1  ;;  %v3281_v46 = vsel %vm3077_vm12, %v3280_v19, %v3276_v37  ;;  %v2814_v5 = vsel %vm1465_vm1, %v2454_v32, 0.0  ;;  %v3300_v6 = vrot.slane %v2899_v35, %v5386_v1 }
 0x2a7   : > { %v3285_v44 = vrot.slane %v2896_v33, %v5395_v15  ;;  %v2325_v47 = vmax.f32 %v2181_v34, 0.0  ;;  %v2897_v48 = vadd.f32 %v5280_v3, %v2603_v40  ;;  %v2173_v49 = vadd.f32 %v5619_v45, %v2172_v41  ;;  %2821 = vadd.xlane.f32.xlu0 %v2820_v43 }
 0x2a8   : > { %v2455_v50 = vmul.f32 %v5633_v31, %v2320_v36  ;;  %v2618_v52 = vpop.xlane.xlu0 %2617  ;;  %v4420_v53 = vpop.f32.mrf.mxu1  ;;  %v2823_v54 = vsel %vm1465_vm1, %v2457_v51, 0.0  ;;  %v2136_v43 = vadd.f32 %v5619_v45, %v5562_v28 }
 0x2a9   : > { %v3286_v56 = vsel %vm3084_vm13, %v3285_v44, %v3281_v46  ;;  %v3290_v57 = vrot.slane %v2897_v48, %v5425_v8  ;;  %2824 = vadd.xlane.f32.xlu1 %v2823_v54  ;;  %v2460_v61 = vmul.f32 %v5633_v31, %v2325_v47  ;;  %v2323_v62 = vmax.f32 %v2173_v49, 0.0 }
 0x2aa   : > { %v2184_v2 = vadd.f32 %v5619_v45, %v4420_v53  ;;  %v2621_v60 = vpop.xlane.xlu1 %2620  ;;  %v2175_v4 = vpop.f32.mrf.mxu1  ;;  %v2817_v18 = vsel %vm1465_vm1, %v2455_v50, 0.0  ;;  %v2902_v32 = vadd.f32 %v5280_v3, %v2618_v52 }
 0x2ab   : > { %v3291_v7 = vsel %vm3091_vm14, %v3290_v57, %v3286_v56  ;;  %v2176_v12 = vadd.f32 %v5619_v45, %v2175_v4  ;;  %2815 = vadd.xlane.f32.xlu0 %v2814_v5  ;;  %v2458_v23 = vmul.f32 %v5633_v31, %v2323_v62  ;;  %v2832_v37 = vsel %vm1465_vm1, %v2460_v61, 0.0 }
 0x2ac   : > { %v3296_v14 = vsel %vm3098_vm15, %v3295_v55, %v3291_v7  ;;  %v2326_v42 = vmax.f32 %v2184_v2, 0.0  ;;  %v2612_v16 = vpop.xlane.xlu0 %2611  ;;  %v4423_v17 = vpop.f32.mrf.mxu1  ;;  %v2903_v44 = vadd.f32 %v5280_v3, %v2621_v60  ;;  %v3333_v55 = vrot.slane %v2902_v32, %v5290_v13 }
 0x2ad   : > { %v3301_v19 = vsel %vm3105_vm0, %v3300_v6, %v3296_v14  ;;  %v2324_v21 = vmax.f32 %v2176_v12, 0.0  ;;  %v2900_v0 = vadd.f32 %v5280_v3, %v2612_v16  ;;  %2818 = vadd.xlane.f32.xlu1 %v2817_v18  ;;  %v2197_v20 = vadd.f32 %v5619_v45, %v4423_v17 }
 0x2ae   : > { %4013 = vst [vmem:[%s5457_s17 + $0x2] ss:$8 sm:$0x1] %v3301_v19  ;;  %v2461_v58 = vmul.f32 %v5633_v31, %v2326_v42  ;;  %v2615_v24 = vpop.xlane.xlu1 %2614  ;;  %v2188_v27 = vpop.f32.mrf.mxu1  ;;  %v2826_v54 = vsel %vm1465_vm1, %v2458_v23, 0.0  ;;  %v2314_v62 = vmax.f32 %v2136_v43, 0.0  ;;  %v3338_v2 = vrot.slane %v2903_v44, %v5303_v25 }
 0x2af   : > { %v2901_v33 = vadd.f32 %v5280_v3, %v2615_v24  ;;  %v2189_v34 = vadd.f32 %v5619_v45, %v2188_v27  ;;  %2833 = vadd.xlane.f32.xlu0 %v2832_v37  ;;  %v2459_v51 = vmul.f32 %v5633_v31, %v2324_v21  ;;  %v2329_v35 = vmax.f32 %v2197_v20, 0.0 }
 0x2b0   : > { %v2630_v36 = vpop.xlane.xlu0 %2629  ;;  %v4424_v40 = vpop.f32.mrf.mxu1  ;;  %v2835_v41 = vsel %vm1465_vm1, %v2461_v58, 0.0  ;;  %v3324_v47 = vrot.slane %v2900_v0, %v5300_v22  ;;  %v2449_v21 = vmul.f32 %v5633_v31, %v2314_v62 }
 0x2b1   : > { %v3328_v48 = vrot.slane %v2901_v33, %v5306_v26  ;;  %2836 = vadd.xlane.f32.xlu1 %v2835_v41  ;;  %v2464_v49 = vmul.f32 %v5633_v31, %v2329_v35  ;;  %v2327_v50 = vmax.f32 %v2189_v34, 0.0  ;;  %v2200_v46 = vadd.f32 %v5619_v45, %v4424_v40 }
 0x2b2   : > { %v2633_v52 = vpop.xlane.xlu1 %2632  ;;  %v2191_v53 = vpop.f32.mrf.mxu1  ;;  %v2829_v61 = vsel %vm1465_vm1, %v2459_v51, 0.0  ;;  %v2799_v41 = vsel %vm1465_vm1, %v2449_v21, 0.0 }
 0x2b3   : > { %v3329_v28 = vsel %vm3007_vm2, %v3328_v48, %v3324_v47  ;;  %2827 = vadd.xlane.f32.xlu0 %v2826_v54  ;;  %v2192_v56 = vadd.f32 %v5619_v45, %v2191_v53  ;;  %v2462_v5 = vmul.f32 %v5633_v31, %v2327_v50  ;;  %v2330_v6 = vmax.f32 %v2200_v46, 0.0 }
 0x2b4   : > { %v2624_v57 = vpop.xlane.xlu0 %2623  ;;  %v3334_v60 = vsel %vm3014_vm3, %v3333_v55, %v3329_v28  ;;  %v2844_v14 = vsel %vm1465_vm1, %v2464_v49, 0.0  ;;  %v2906_v45 = vadd.f32 %v5280_v3, %v2630_v36  ;;  %v2907_v20 = vadd.f32 %v5280_v3, %v2633_v52 }
 0x2b5   : > { %v2904_v4 = vadd.f32 %v5280_v3, %v2624_v57  ;;  %2830 = vadd.xlane.f32.xlu1 %v2829_v61  ;;  %v2328_v7 = vmax.f32 %v2192_v56, 0.0  ;;  %v3339_v18 = vsel %vm3021_vm4, %v3338_v2, %v3334_v60  ;;  %v2465_v58 = vmul.f32 %v5633_v31, %v2330_v6 }
 0x2b6   : > { %v2627_v12 = vpop.xlane.xlu1 %2626  ;;  %v2838_v37 = vsel %vm1465_vm1, %v2462_v5, 0.0  ;;  %v3353_v32 = vrot.slane %v2906_v45, %v5311_v29 }
 0x2b7   : > { %v3343_v42 = vrot.slane %v2904_v4, %v5321_v38  ;;  %v2905_v16 = vadd.f32 %v5280_v3, %v2627_v12  ;;  %2845 = vadd.xlane.f32.xlu0 %v2844_v14  ;;  %v2463_v17 = vmul.f32 %v5633_v31, %v2328_v7  ;;  %v3358_v31 = vrot.slane %v2907_v20, %v5314_v30 }
 0x2b8   : > { %v2642_v19 = vpop.xlane.xlu0 %2641  ;;  %v2847_v40 = vsel %vm1465_vm1, %v2465_v58, 0.0 }
 0x2b9   : > { %v3344_v0 = vsel %vm3028_vm5, %v3343_v42, %v3339_v18  ;;  %v3348_v23 = vrot.slane %v2905_v16, %v5324_v39  ;;  %v2841_v27 = vsel %vm1465_vm1, %v2463_v17, 0.0  ;;  %v2910_v43 = vadd.f32 %v5280_v3, %v2642_v19 }
 0x2ba   : > { %v2645_v24 = vpop.xlane.xlu1 %2644  ;;  %2842 = vadd.xlane.f32.xlu1 %v2841_v27 }
 0x2bb   : > { %v3349_v33 = vsel %vm3035_vm6, %v3348_v23, %v3344_v0  ;;  %2839 = vadd.xlane.f32.xlu0 %v2838_v37  ;;  %v2911_v52 = vadd.f32 %v5280_v3, %v2645_v24  ;;  %v3373_v54 = vrot.slane %v2910_v43, %v5337_v59 }
 0x2bc   : > { %v2636_v34 = vpop.xlane.xlu0 %2635  ;;  %v3354_v51 = vsel %vm3042_vm7, %v3353_v32, %v3349_v33 }
 0x2bd   : > { %v2908_v35 = vadd.f32 %v5280_v3, %v2636_v34  ;;  %v3359_v48 = vsel %vm3049_vm8, %v3358_v31, %v3354_v51  ;;  %v3378_v61 = vrot.slane %v2911_v52, %v5348_v9 }
 0x2be   : > { %v2639_v36 = vpop.xlane.xlu1 %2638  ;;  %2848 = vadd.xlane.f32.xlu1 %v2847_v40 }
 0x2bf   : > { %v3363_v44 = vrot.slane %v2908_v35, %v5351_v10  ;;  %v2909_v47 = vadd.f32 %v5280_v3, %v2639_v36  ;;  %2800 = vadd.xlane.f32.xlu0 %v2799_v41 }
 0x2c0   : > { %v2654_v49 = vpop.xlane.xlu0 %2653 }
 0x2c1   : > { %v3364_v50 = vsel %vm3056_vm9, %v3363_v44, %v3359_v48  ;;  %v3368_v46 = vrot.slane %v2909_v47, %v5354_v11  ;;  %v2914_v62 = vadd.f32 %v5280_v3, %v2654_v49 }
 0x2c2   : > { %v2657_v53 = vpop.xlane.xlu1 %2656 }
 0x2c3   : > { %v3369_v55 = vsel %vm3063_vm10, %v3368_v46, %v3364_v50  ;;  %v2915_v60 = vadd.f32 %v5280_v3, %v2657_v53  ;;  %v3393_v45 = vrot.slane %v2914_v62, %v5383_v63 }
 0x2c4   : > { %v2648_v28 = vpop.xlane.xlu0 %2647  ;;  %v3374_v56 = vsel %vm3070_vm11, %v3373_v54, %v3369_v55 }
 0x2c5   : > { %v2912_v57 = vadd.f32 %v5280_v3, %v2648_v28  ;;  %v3379_v6 = vsel %vm3077_vm12, %v3378_v61, %v3374_v56  ;;  %v3398_v16 = vrot.slane %v2915_v60, %v5386_v1 }
 0x2c6   : > { %v2651_v2 = vpop.xlane.xlu1 %2650 }
 0x2c7   : > { %v3383_v4 = vrot.slane %v2912_v57, %v5395_v15  ;;  %v2913_v5 = vadd.f32 %v5280_v3, %v2651_v2 }
 0x2c8   : > { %v2666_v7 = vpop.xlane.xlu0 %2665 }
 0x2c9   : > { %v3384_v12 = vsel %vm3084_vm13, %v3383_v4, %v3379_v6  ;;  %v3388_v14 = vrot.slane %v2913_v5, %v5425_v8  ;;  %v2918_v58 = vadd.f32 %v5280_v3, %v2666_v7 }
 0x2ca   : > { %v2669_v42 = vpop.xlane.xlu1 %2668 }
 0x2cb   : > { %v3389_v17 = vsel %vm3091_vm14, %v3388_v14, %v3384_v12  ;;  %v2919_v32 = vadd.f32 %v5280_v3, %v2669_v42  ;;  %v3431_v34 = vrot.slane %v2918_v58, %v5290_v13 }
 0x2cc   : > { %v3394_v18 = vsel %vm3098_vm15, %v3393_v45, %v3389_v17  ;;  %v2660_v19 = vpop.xlane.xlu0 %2659 }
 0x2cd   : > { %v3399_v21 = vsel %vm3105_vm0, %v3398_v16, %v3394_v18  ;;  %v2916_v0 = vadd.f32 %v5280_v3, %v2660_v19  ;;  %v3436_v40 = vrot.slane %v2919_v32, %v5303_v25 }
 0x2ce   : > { %4014 = vst [vmem:[%s5457_s17 + $0x3] ss:$8 sm:$0x1] %v3399_v21  ;;  %v2663_v23 = vpop.xlane.xlu1 %2662 }
 0x2cf   : > { %v2917_v20 = vadd.f32 %v5280_v3, %v2663_v23  ;;  %v3422_v27 = vrot.slane %v2916_v0, %v5300_v22 }
 0x2d0   : > { %v2678_v24 = vpop.xlane.xlu0 %2677 }
 0x2d1   : > { %v3426_v37 = vrot.slane %v2917_v20, %v5306_v26  ;;  %v2922_v43 = vadd.f32 %v5280_v3, %v2678_v24 }
 0x2d2   : > { %v2681_v33 = vpop.xlane.xlu1 %2680 }
 0x2d3   : > { %v3427_v51 = vsel %vm3007_vm2, %v3426_v37, %v3422_v27  ;;  %v2923_v52 = vadd.f32 %v5280_v3, %v2681_v33  ;;  %v3451_v54 = vrot.slane %v2922_v43, %v5311_v29 }
 0x2d4   : > { %v2672_v35 = vpop.xlane.xlu0 %2671  ;;  %v3432_v31 = vsel %vm3014_vm3, %v3431_v34, %v3427_v51 }
 0x2d5   : > { %v2920_v36 = vadd.f32 %v5280_v3, %v2672_v35  ;;  %v3437_v48 = vsel %vm3021_vm4, %v3436_v40, %v3432_v31  ;;  %v3456_v61 = vrot.slane %v2923_v52, %v5314_v30 }
 0x2d6   : > { %v2675_v41 = vpop.xlane.xlu1 %2674 }
 0x2d7   : > { %v3441_v44 = vrot.slane %v2920_v36, %v5321_v38  ;;  %v2921_v47 = vadd.f32 %v5280_v3, %v2675_v41 }
 0x2d8   : > { %v2690_v49 = vpop.xlane.xlu0 %2689 }
 0x2d9   : > { %v3442_v50 = vsel %vm3028_vm5, %v3441_v44, %v3437_v48  ;;  %v3446_v46 = vrot.slane %v2921_v47, %v5324_v39  ;;  %v2926_v2 = vadd.f32 %v5280_v3, %v2690_v49 }
 0x2da   : > { %v2693_v53 = vpop.xlane.xlu1 %2692 }
 0x2db   : > { %v3447_v55 = vsel %vm3035_vm6, %v3446_v46, %v3442_v50  ;;  %v2927_v14 = vadd.f32 %v5280_v3, %v2693_v53  ;;  %v3471_v42 = vrot.slane %v2926_v2, %v5337_v59 }
 0x2dc   : > { %v2684_v28 = vpop.xlane.xlu0 %2683  ;;  %v3452_v56 = vsel %vm3042_vm7, %v3451_v54, %v3447_v55 }
 0x2dd   : > { %v2924_v57 = vadd.f32 %v5280_v3, %v2684_v28  ;;  %v3457_v5 = vsel %vm3049_vm8, %v3456_v61, %v3452_v56  ;;  %v3476_v21 = vrot.slane %v2927_v14, %v5348_v9 }
 0x2de   : > { %v2687_v62 = vpop.xlane.xlu1 %2686 }
 0x2df   : > { %v3461_v60 = vrot.slane %v2924_v57, %v5351_v10  ;;  %v2925_v4 = vadd.f32 %v5280_v3, %v2687_v62 }
 0x2e0   : > { %v2702_v6 = vpop.xlane.xlu0 %2701 }
 0x2e1   : > { %v3462_v7 = vsel %vm3056_vm9, %v3461_v60, %v3457_v5  ;;  %v3466_v12 = vrot.slane %v2925_v4, %v5354_v11  ;;  %v2930_v0 = vadd.f32 %v5280_v3, %v2702_v6 }
 0x2e2   : > { %v2705_v45 = vpop.xlane.xlu1 %2704 }
 0x2e3   : > { %v3467_v16 = vsel %vm3063_vm10, %v3466_v12, %v3462_v7  ;;  %v2931_v58 = vadd.f32 %v5280_v3, %v2705_v45  ;;  %v3491_v34 = vrot.slane %v2930_v0, %v5383_v63 }
 0x2e4   : > { %v2696_v17 = vpop.xlane.xlu0 %2695  ;;  %v3472_v18 = vsel %vm3070_vm11, %v3471_v42, %v3467_v16 }
 0x2e5   : > { %v2928_v19 = vadd.f32 %v5280_v3, %v2696_v17  ;;  %v3477_v27 = vsel %vm3077_vm12, %v3476_v21, %v3472_v18  ;;  %v3496_v35 = vrot.slane %v2931_v58, %v5386_v1 }
 0x2e6   : > { %v2699_v23 = vpop.xlane.xlu1 %2698 }
 0x2e7   : > { %v3481_v20 = vrot.slane %v2928_v19, %v5395_v15  ;;  %v2929_v24 = vadd.f32 %v5280_v3, %v2699_v23 }
 0x2e8   : > { %v2714_v37 = vpop.xlane.xlu0 %2713 }
 0x2e9   : > { %v3482_v32 = vsel %vm3084_vm13, %v3481_v20, %v3477_v27  ;;  %v3486_v33 = vrot.slane %v2929_v24, %v5425_v8  ;;  %v2934_v47 = vadd.f32 %v5280_v3, %v2714_v37 }
 0x2ea   : > { %v2717_v51 = vpop.xlane.xlu1 %2716 }
 0x2eb   : > { %v3487_v31 = vsel %vm3091_vm14, %v3486_v33, %v3482_v32  ;;  %v2935_v52 = vadd.f32 %v5280_v3, %v2717_v51  ;;  %v3529_v54 = vrot.slane %v2934_v47, %v5290_v13 }
 0x2ec   : > { %v3492_v36 = vsel %vm3098_vm15, %v3491_v34, %v3487_v31  ;;  %v2708_v40 = vpop.xlane.xlu0 %2707 }
 0x2ed   : > { %v3497_v41 = vsel %vm3105_vm0, %v3496_v35, %v3492_v36  ;;  %v2932_v43 = vadd.f32 %v5280_v3, %v2708_v40  ;;  %v3534_v61 = vrot.slane %v2935_v52, %v5303_v25 }
 0x2ee   : > { %4015 = vst [vmem:[%s5457_s17 + $0x4] ss:$8 sm:$0x1] %v3497_v41  ;;  %v2711_v44 = vpop.xlane.xlu1 %2710 }
 0x2ef   : > { %v2933_v48 = vadd.f32 %v5280_v3, %v2711_v44  ;;  %v3520_v50 = vrot.slane %v2932_v43, %v5300_v22 }
 0x2f0   : > { %v2726_v49 = vpop.xlane.xlu0 %2725 }
 0x2f1   : > { %v3524_v46 = vrot.slane %v2933_v48, %v5306_v26  ;;  %v2938_v2 = vadd.f32 %v5280_v3, %v2726_v49 }
 0x2f2   : > { %v2729_v53 = vpop.xlane.xlu1 %2728 }
 0x2f3   : > { %v3525_v55 = vsel %vm3007_vm2, %v3524_v46, %v3520_v50  ;;  %v2939_v14 = vadd.f32 %v5280_v3, %v2729_v53  ;;  %v3549_v42 = vrot.slane %v2938_v2, %v5311_v29 }
 0x2f4   : > { %v2720_v28 = vpop.xlane.xlu0 %2719  ;;  %v3530_v56 = vsel %vm3014_vm3, %v3529_v54, %v3525_v55 }
 0x2f5   : > { %v2936_v57 = vadd.f32 %v5280_v3, %v2720_v28  ;;  %v3535_v5 = vsel %vm3021_vm4, %v3534_v61, %v3530_v56  ;;  %v3554_v21 = vrot.slane %v2939_v14, %v5314_v30 }
 0x2f6   : > { %v2723_v62 = vpop.xlane.xlu1 %2722 }
 0x2f7   : > { %v3539_v60 = vrot.slane %v2936_v57, %v5321_v38  ;;  %v2937_v4 = vadd.f32 %v5280_v3, %v2723_v62 }
 0x2f8   : > { %v2738_v6 = vpop.xlane.xlu0 %2737 }
 0x2f9   : > { %v3540_v7 = vsel %vm3028_vm5, %v3539_v60, %v3535_v5  ;;  %v3544_v12 = vrot.slane %v2937_v4, %v5324_v39  ;;  %v2942_v23 = vadd.f32 %v5280_v3, %v2738_v6 }
 0x2fa   : > { %v2741_v45 = vpop.xlane.xlu1 %2740 }
 0x2fb   : > { %v3545_v16 = vsel %vm3035_vm6, %v3544_v12, %v3540_v7  ;;  %v2943_v33 = vadd.f32 %v5280_v3, %v2741_v45  ;;  %v3569_v51 = vrot.slane %v2942_v23, %v5337_v59 }
 0x2fc   : > { %v2732_v17 = vpop.xlane.xlu0 %2731  ;;  %v3550_v18 = vsel %vm3042_vm7, %v3549_v42, %v3545_v16 }
 0x2fd   : > { %v2940_v19 = vadd.f32 %v5280_v3, %v2732_v17  ;;  %v3555_v24 = vsel %vm3049_vm8, %v3554_v21, %v3550_v18  ;;  %v3574_v41 = vrot.slane %v2943_v33, %v5348_v9 }
 0x2fe   : > { %v2735_v0 = vpop.xlane.xlu1 %2734 }
 0x2ff   : > { %v3559_v58 = vrot.slane %v2940_v19, %v5351_v10  ;;  %v2941_v20 = vadd.f32 %v5280_v3, %v2735_v0 }
 0x300   : > { %v2750_v27 = vpop.xlane.xlu0 %2749 }
 0x301   : > { %v3560_v37 = vsel %vm3056_vm9, %v3559_v58, %v3555_v24  ;;  %v3564_v32 = vrot.slane %v2941_v20, %v5354_v11  ;;  %v2946_v43 = vadd.f32 %v5280_v3, %v2750_v27 }
 0x302   : > { %v2753_v34 = vpop.xlane.xlu1 %2752 }
 0x303   : > { %v3565_v35 = vsel %vm3063_vm10, %v3564_v32, %v3560_v37  ;;  %v2947_v47 = vadd.f32 %v5280_v3, %v2753_v34  ;;  %v3589_v53 = vrot.slane %v2946_v43, %v5383_v63 }
 0x304   : > { %v2744_v31 = vpop.xlane.xlu0 %2743  ;;  %v3570_v36 = vsel %vm3070_vm11, %v3569_v51, %v3565_v35 }
 0x305   : > { %v2944_v40 = vadd.f32 %v5280_v3, %v2744_v31  ;;  %v3575_v50 = vsel %vm3077_vm12, %v3574_v41, %v3570_v36  ;;  %v3594_v28 = vrot.slane %v2947_v47, %v5386_v1 }
 0x306   : > { %v2747_v44 = vpop.xlane.xlu1 %2746 }
 0x307   : > { %v3579_v48 = vrot.slane %v2944_v40, %v5395_v15  ;;  %v2945_v49 = vadd.f32 %v5280_v3, %v2747_v44 }
 0x309   : > { %v3580_v46 = vsel %vm3084_vm13, %v3579_v48, %v3575_v50  ;;  %v3584_v52 = vrot.slane %v2945_v49, %v5425_v8 }
 0x30a   : > { %v2762_v54 = vpop.xlane.xlu1 %2761  ;;  %v2765_v55 = vpop.xlane.xlu0 %2764 }
 0x30b   : > { %v3585_v56 = vsel %vm3091_vm14, %v3584_v52, %v3580_v46  ;;  %v2950_v0 = vadd.f32 %v5280_v3, %v2762_v54  ;;  %v2951_v24 = vadd.f32 %v5280_v3, %v2765_v55 }
 0x30c   : > { %v3590_v57 = vsel %vm3098_vm15, %v3589_v53, %v3585_v56 }
 0x30d   : > { %v3595_v61 = vsel %vm3105_vm0, %v3594_v28, %v3590_v57  ;;  %v3627_v37 = vrot.slane %v2950_v0, %v5290_v13  ;;  %v3632_v36 = vrot.slane %v2951_v24, %v5303_v25 }
 0x30e   : > { %4016 = vst [vmem:[%s5457_s17 + $0x5] ss:$8 sm:$0x1] %v3595_v61  ;;  %v2756_v62 = vpop.xlane.xlu1 %2755  ;;  %v2759_v2 = vpop.xlane.xlu0 %2758 }
 0x30f   : > { %v2948_v42 = vadd.f32 %v5280_v3, %v2756_v62  ;;  %v2949_v16 = vadd.f32 %v5280_v3, %v2759_v2 }
 0x311   : > { %v3618_v19 = vrot.slane %v2948_v42, %v5300_v22  ;;  %v3622_v21 = vrot.slane %v2949_v16, %v5306_v26 }
 0x312   : > { %v2774_v60 = vpop.xlane.xlu1 %2773  ;;  %v2777_v4 = vpop.xlane.xlu0 %2776 }
 0x313   : > { %v3623_v27 = vsel %vm3007_vm2, %v3622_v21, %v3618_v19  ;;  %v2954_v49 = vadd.f32 %v5280_v3, %v2774_v60  ;;  %v2955_v56 = vadd.f32 %v5280_v3, %v2777_v4 }
 0x314   : > { %v3628_v34 = vsel %vm3014_vm3, %v3627_v37, %v3623_v27 }
 0x315   : > { %v3633_v43 = vsel %vm3021_vm4, %v3632_v36, %v3628_v34  ;;  %v3647_v61 = vrot.slane %v2954_v49, %v5311_v29  ;;  %v3652_v42 = vrot.slane %v2955_v56, %v5314_v30 }
 0x316   : > { %v2768_v5 = vpop.xlane.xlu1 %2767 }
 0x317   : > { %v2771_v6 = vpop.xlane.xlu0 %2770  ;;  %v2952_v58 = vadd.f32 %v5280_v3, %v2768_v5 }
 0x318   : > { %v2953_v33 = vadd.f32 %v5280_v3, %v2771_v6 }
 0x319   : > { %v3637_v51 = vrot.slane %v2952_v58, %v5321_v38 }
 0x31a   : > { %v2786_v7 = vpop.xlane.xlu1 %2785  ;;  %v3642_v44 = vrot.slane %v2953_v33, %v5324_v39 }
 0x31b   : > { %v5827_v12 = vpop.xlane.xlu0 %2788  ;;  %v3638_v50 = vsel %vm3028_vm5, %v3637_v51, %v3633_v43  ;;  %v2958_v24 = vadd.f32 %v5280_v3, %v2786_v7 }
 0x31c   : > { %v3643_v57 = vsel %vm3035_vm6, %v3642_v44, %v3638_v50 }
 0x31d   : > { %v3648_v6 = vsel %vm3042_vm7, %v3647_v61, %v3643_v57  ;;  %v3667_v36 = vrot.slane %v2958_v24, %v5337_v59 }
 0x31e   : > { %v2780_v14 = vpop.xlane.xlu1 %2779  ;;  %v3653_v21 = vsel %vm3049_vm8, %v3652_v42, %v3648_v6 }
 0x31f   : > { %v2783_v45 = vpop.xlane.xlu0 %2782  ;;  %v2956_v54 = vadd.f32 %v5280_v3, %v2780_v14 }
 0x321   : > { %v3657_v14 = vrot.slane %v2956_v54, %v5351_v10 }
 0x322   : > { %v5831_v17 = vpop.xlane.xlu1 %2797 }
 0x323   : > { %v3658_v27 = vsel %vm3056_vm9, %v3657_v14, %v3653_v21  ;;  %v2962_v61 = vadd.f32 %v5280_v3, %v5831_v17 }
 0x324   : > { %v5833_v18 = vpop.xlane.xlu0 %2794 }
 0x326   : > { %v2792_v23 = vpop.xlane.xlu1 %2791 }
 0x327   : > { %v2960_v34 = vadd.f32 %v5280_v3, %v2792_v23 }
 0x328   : > { %v2810_v20 = vpop.xlane.xlu0 %2809 }
 0x329   : > { %v2966_v47 = vadd.f32 %v5280_v3, %v2810_v20 }
 0x32a   : > { %v2804_v32 = vpop.xlane.xlu1 %2803 }
 0x32b   : > { %v2964_v35 = vadd.f32 %v5280_v3, %v2804_v32 }
 0x32c   : > { %v2807_v31 = vpop.xlane.xlu0 %2806 }
 0x32d   : > { %v2965_v40 = vadd.f32 %v5280_v3, %v2807_v31  ;;  %v3716_v46 = vrot.slane %v2964_v35, %v5300_v22  ;;  %v2957_v22 = vadd.f32 %v5280_v3, %v2783_v45  ;;  %v2959_v35 = vadd.f32 %v5280_v3, %v5827_v12 }
 0x32e   : > { %v2813_v41 = vpop.xlane.xlu1 %2812  ;;  %v3677_v12 = vrot.slane %v2960_v34, %v5395_v15 }
 0x32f   : > { %v3720_v48 = vrot.slane %v2965_v40, %v5306_v26  ;;  %v2967_v52 = vadd.f32 %v5280_v3, %v2813_v41  ;;  %v3725_v26 = vrot.slane %v2966_v47, %v5290_v13  ;;  %v3662_v0 = vrot.slane %v2957_v22, %v5354_v11 }
 0x330   : > { %v2822_v53 = vpop.xlane.xlu0 %2821  ;;  %v3672_v49 = vrot.slane %v2959_v35, %v5348_v9 }
 0x331   : > { %v3721_v55 = vsel %vm3007_vm2, %v3720_v48, %v3716_v46  ;;  %v3730_v62 = vrot.slane %v2967_v52, %v5303_v25  ;;  %v2970_v13 = vadd.f32 %v5280_v3, %v2822_v53  ;;  %v3663_v31 = vsel %vm3063_vm10, %v3662_v0, %v3658_v27 }
 0x332   : > { %v2825_v28 = vpop.xlane.xlu1 %2824  ;;  %v3726_v60 = vsel %vm3014_vm3, %v3725_v26, %v3721_v55  ;;  %v3668_v44 = vsel %vm3070_vm11, %v3667_v36, %v3663_v31  ;;  %v2961_v46 = vadd.f32 %v5280_v3, %v5833_v18 }
 0x333   : > { %v3731_v19 = vsel %vm3021_vm4, %v3730_v62, %v3726_v60  ;;  %v2971_v37 = vadd.f32 %v5280_v3, %v2825_v28  ;;  %v3745_v32 = vrot.slane %v2970_v13, %v5311_v29  ;;  %v3673_v52 = vsel %vm3077_vm12, %v3672_v49, %v3668_v44 }
 0x334   : > { %v2816_v2 = vpop.xlane.xlu0 %2815  ;;  %v3678_v55 = vsel %vm3084_vm13, %v3677_v12, %v3673_v52 }
 0x335   : > { %v2968_v5 = vadd.f32 %v5280_v3, %v2816_v2  ;;  %v3750_v40 = vrot.slane %v2971_v37, %v5314_v30 }
 0x336   : > { %v2819_v4 = vpop.xlane.xlu1 %2818 }
 0x337   : > { %v3735_v16 = vrot.slane %v2968_v5, %v5321_v38  ;;  %v2969_v25 = vadd.f32 %v5280_v3, %v2819_v4 }
 0x338   : > { %v2834_v45 = vpop.xlane.xlu0 %2833 }
 0x339   : > { %v3736_v58 = vsel %vm3028_vm5, %v3735_v16, %v3731_v19  ;;  %v3740_v20 = vrot.slane %v2969_v25, %v5324_v39  ;;  %v2974_v29 = vadd.f32 %v5280_v3, %v2834_v45 }
 0x33a   : > { %v2837_v38 = vpop.xlane.xlu1 %2836 }
 0x33b   : > { %v3741_v33 = vsel %vm3035_vm6, %v3740_v20, %v3736_v58  ;;  %v3765_v53 = vrot.slane %v2974_v29, %v5337_v59  ;;  %v3682_v59 = vrot.slane %v2961_v46, %v5425_v8 }
 0x33c   : > { %v2828_v51 = vpop.xlane.xlu0 %2827  ;;  %v3746_v39 = vsel %vm3042_vm7, %v3745_v32, %v3741_v33 }
 0x33d   : > { %v2972_v7 = vadd.f32 %v5280_v3, %v2828_v51  ;;  %v3751_v47 = vsel %vm3049_vm8, %v3750_v40, %v3746_v39  ;;  %v3683_v60 = vsel %vm3091_vm14, %v3682_v59, %v3678_v55 }
 0x33e   : > { %v2831_v41 = vpop.xlane.xlu1 %2830 }
 0x33f   : > { %v3755_v43 = vrot.slane %v2972_v7, %v5351_v10  ;;  %v2973_v23 = vadd.f32 %v5280_v3, %v2831_v41  ;;  %v2975_v10 = vadd.f32 %v5280_v3, %v2837_v38 }
 0x340   : > { %v2846_v48 = vpop.xlane.xlu0 %2845 }
 0x341   : > { %v3756_v50 = vsel %vm3056_vm9, %v3755_v43, %v3751_v47  ;;  %v3760_v30 = vrot.slane %v2973_v23, %v5354_v11  ;;  %v2978_v26 = vadd.f32 %v5280_v3, %v2846_v48  ;;  %v3770_v62 = vrot.slane %v2975_v10, %v5348_v9 }
 0x343   : > { %v3761_v54 = vsel %vm3063_vm10, %v3760_v30, %v3756_v50  ;;  %v2843_v28 = vpop.xlane.xlu1 %2842  ;;  %v3785_v4 = vrot.slane %v2978_v26, %v5383_v63 }
 0x344   : > { %v2840_v56 = vpop.xlane.xlu0 %2839  ;;  %v3766_v57 = vsel %vm3070_vm11, %v3765_v53, %v3761_v54  ;;  %v2977_v11 = vadd.f32 %v5280_v3, %v2843_v28 }
 0x345   : > { %v2976_v18 = vadd.f32 %v5280_v3, %v2840_v56  ;;  %v3771_v5 = vsel %vm3077_vm12, %v3770_v62, %v3766_v57 }
 0x346   : > { %v3780_v2 = vrot.slane %v2977_v11, %v5425_v8 }
 0x347   : > { %v3775_v22 = vrot.slane %v2976_v18, %v5395_v15  ;;  %v2849_v6 = vpop.xlane.xlu1 %2848  ;;  %v3687_v15 = vrot.slane %v2962_v61, %v5383_v63 }
 0x348   : > { %v2801_v14 = vpop.xlane.xlu0 %2800  ;;  %v2979_v9 = vadd.f32 %v5280_v3, %v2849_v6 }
 0x349   : > { %v3776_v17 = vsel %vm3084_vm13, %v3775_v22, %v3771_v5  ;;  %v2963_v8 = vadd.f32 %v5280_v3, %v2801_v14  ;;  %v3688_v19 = vsel %vm3098_vm15, %v3687_v15, %v3683_v60 }
 0x34a   : > { %v3781_v42 = vsel %vm3091_vm14, %v3780_v2, %v3776_v17  ;;  %v3790_v16 = vrot.slane %v2979_v9, %v5386_v1 }
 0x34b   : > { %v3786_v13 = vsel %vm3098_vm15, %v3785_v4, %v3781_v42  ;;  %v3692_v25 = vrot.slane %v2963_v8, %v5386_v1 }
 0x34c   : > { %v3791_v3 = vsel %vm3105_vm0, %v3790_v16, %v3786_v13 }
 0x34d   : > { %v3693_v63 = vsel %vm3105_vm0, %v3692_v25, %v3688_v19  ;;  %4018 = vst [vmem:[%s5457_s17 + $0x7] ss:$8 sm:$0x1] %v3791_v3 }
 0x34e   : > { %4017 = vst [vmem:[%s5457_s17 + $0x6] ss:$8 sm:$0x1] %v3693_v63 }
 0x34f   : > { %4488 = shalt.err (!%p4485_p3)
}
 0x350   : > { %s4489_s15 = scalar_lea.hbm %s5933_s25, 128  ;;  %s4493_s18 = scalar_lea.hbm %s5987_s7, 256 }
 0x351   : > { %p4490_p4 = scmp.ne.s32.totalorder %s5933_s25, %s4489_s15  ;;  %p4494_p9 = scmp.lt.s32.totalorder %s5933_s25, %s5987_s7 }
 0x352   : > { %p4495_p10 = scmp.lt.s32.totalorder %s4493_s18, %s4489_s15 }
 0x353   : > { %p4491_p7 = pnand %p4490_p4, %p4616_p5 }
 0x354   : > { %p4496_p11 = por %p4495_p10, %p4494_p9 }
 0x355   : > { %p4492_p8 = pneg %p4491_p7 }
 0x357   : > { %p4497_p12 = pnand %p4496_p11, %p4492_p8 }
 0x359   : > { %4500 = shalt.err (!%p4497_p12)
}
 0x35a   : > { %4425 = dma.vmem_to_hbm [thread:$0]  (%p4616_p5), %s5935_s22, 128, %s5933_s25, %s3796_s6  }
 0x35b PF: > { %p4431_p13 = scmp.ge.s32.totalorder %s4535_s29, 2  ;;  %s3821_s21 = sand.u32 1, %s4523_s26  }
 0x35c   : > { %s3822_s23 = scalar_lea.sflag [#allocation4], %s3821_s21 }
 0x35d   : > { %p4428_p0 = pnand %p4431_p13, %p4620_p6 }
 0x35f   : > { %p4429_p1 = pneg %p4428_p0 }
 0x361   : > { %4518 = dma.done.wait (%p4429_p1), %s3822_s23, 128  }
 0x362   : > { %4520 = vsyncadd (%p4429_p1), %s3822_s23, 4294967168  ;;  %p18_p2 = scmp.ge.s32.totalorder %s4604_s8, 4   ;;  %s5990_s26 = smov %s4527_s27 }
 0x363   : > { %s5991_s27 = smov %s4531_s28  ;;  %s5992_s28 = smov %s4614_s11 }
 0x364   : > { %s5993_s29 = smov %s4604_s8  ;;  %20 = sbr.rel (!%p18_p2) target bundleno = 5 (0x5), region = 90 }
 0x369   :  { %3827 = vsyncpa [#allocation4], 1 }
 0x36a   :  { %3829 = vsyncpa [#allocation4 + $0x1], 1 }

</bundles_post_ra>
